<compile_context>
chip_gen: v6e
topology: v6e:2x2x1
jax: 0.10.0
libtpu: 0.0.40
codegen_flags: <defaults>
</compile_context>

<pallas_src>
import functools

import jax
import jax.numpy as jnp
from jax import lax
from jax.experimental import pallas as pl
from jax.experimental.pallas import tpu as pltpu


def _bottleneck_kernel(x_ref, w1_ref, w2_ref, w3_ref,
                       b1_ref, b2_ref, b3_ref, mask_ref,
                       o_ref, h1_ref, col_ref, *, H, W, Cp):
    # x_ref block: (1, P, Cp) f32 with zeroed spatial halo / channel padding.
    # w1/w3: (Cp, Cp) bf16 (BN scale folded), w2: (9*Cp, Cp) bf16.
    # b*: (1, Cp) f32.  mask: (P, 1) f32, 1.0 on interior pixels.
    Wp = W + 2
    P = (H + 2) * Wp
    M = ((Wp + 1 + 7) // 8) * 8          # 8-aligned top/bottom margin rows

    xb = x_ref[0].astype(jnp.bfloat16)   # (P, Cp) bf16 MXU operand

    # ---- conv1 (1x1) + folded bn1 + relu --------------------------------
    h1 = jnp.dot(xb, w1_ref[...], preferred_element_type=jnp.float32)
    h1 = jnp.maximum(h1 + b1_ref[...], 0.0)
    # Halo pixels must be exactly zero so conv2 sees proper zero padding.
    # Only the small margins + interior are written (no full-buffer zeroing).
    h1_ref[pl.ds(0, M), :] = jnp.zeros((M, Cp), jnp.float32)
    h1_ref[pl.ds(M + P, M), :] = jnp.zeros((M, Cp), jnp.float32)
    h1_ref[pl.ds(M, P), :] = h1 * mask_ref[...]

    # ---- conv2 (3x3, pad 1): im2col + one K = 9*Cp matmul ---------------
    # Tap (dh, dw) of output pixel r is h1 at flat offset r + (dh-1)*Wp+(dw-1);
    # the margin in h1_ref keeps every shifted read in bounds, and every col
    # store is lane-aligned (multiples of Cp) starting at row 0.
    for dh in range(3):
        for dw in range(3):
            t = dh * 3 + dw
            d = (dh - 1) * Wp + (dw - 1)
            tap = h1_ref[pl.ds(M + d, P), :]
            col_ref[:, t * Cp:(t + 1) * Cp] = tap.astype(jnp.bfloat16)
    h2 = jnp.dot(col_ref[...], w2_ref[...], preferred_element_type=jnp.float32)
    h2 = jnp.maximum(h2 + b2_ref[...], 0.0)

    # ---- conv3 (1x1) + folded bn3 + residual + relu ---------------------
    h3 = jnp.dot(h2.astype(jnp.bfloat16), w3_ref[...],
                 preferred_element_type=jnp.float32)
    o_ref[0] = jnp.maximum(h3 + b3_ref[...] + x_ref[0], 0.0)


def bottleneck_block(x_nhwc, w1, w2, w3, bn1, bn2, bn3):
    """x_nhwc: (N, H, W, C) float32.
    w1, w3: (C, C)    [in_ch, out_ch] for the 1x1 convs
    w2:     (9, C, C) [tap = dh*3+dw, in_ch, out_ch] for the 3x3 conv
    bn*:    (scale, bias) each of shape (1, C) (folded BatchNorm).
    """
    N, H, W, C = x_nhwc.shape
    Cp = ((max(C, 128) + 127) // 128) * 128        # lane-dense channel padding
    Hp, Wp = H + 2, W + 2
    P = Hp * Wp
    M = ((Wp + 1 + 7) // 8) * 8
    s1, b1 = bn1
    s2, b2 = bn2
    s3, b3 = bn3

    # Spatial halo + channel padding, flattened to (N, P, Cp).
    x_pad = jnp.pad(x_nhwc, ((0, 0), (1, 1), (1, 1), (0, Cp - C)))
    x_pad = x_pad.reshape(N, P, Cp)

    # Fold BN scales into conv output channels, zero-pad, cast to bf16.
    def pad2(m):
        return jnp.pad(m, ((0, Cp - C), (0, Cp - C)))

    w1f = pad2(w1 * s1.reshape(1, C)).astype(jnp.bfloat16)
    w3f = pad2(w3 * s3.reshape(1, C)).astype(jnp.bfloat16)
    w2f = jnp.pad(w2 * s2.reshape(1, 1, C), ((0, 0), (0, Cp - C), (0, Cp - C)))
    w2f = w2f.reshape(9 * Cp, Cp).astype(jnp.bfloat16)

    def padb(b):
        return jnp.pad(b.reshape(-1), (0, Cp - C)).reshape(1, Cp)

    b1p, b2p, b3p = padb(b1), padb(b2), padb(b3)

    # Interior-pixel mask (zeros on the halo ring), computed once on host.
    mask = jnp.zeros((Hp, Wp), jnp.float32).at[1:H + 1, 1:W + 1].set(1.0)
    mask = mask.reshape(P, 1)

    kernel = functools.partial(_bottleneck_kernel, H=H, W=W, Cp=Cp)

    out = pl.pallas_call(
        kernel,
        out_shape=jax.ShapeDtypeStruct((N, P, Cp), jnp.float32),
        grid_spec=pltpu.PrefetchScalarGridSpec(
            num_scalar_prefetch=0,
            grid=(N,),
            in_specs=[
                pl.BlockSpec((1, P, Cp), lambda n: (n, 0, 0)),   # x
                pl.BlockSpec((Cp, Cp), lambda n: (0, 0)),        # w1 (folded)
                pl.BlockSpec((9 * Cp, Cp), lambda n: (0, 0)),    # w2 (folded)
                pl.BlockSpec((Cp, Cp), lambda n: (0, 0)),        # w3 (folded)
                pl.BlockSpec((1, Cp), lambda n: (0, 0)),         # b1
                pl.BlockSpec((1, Cp), lambda n: (0, 0)),         # b2
                pl.BlockSpec((1, Cp), lambda n: (0, 0)),         # b3
                pl.BlockSpec((P, 1), lambda n: (0, 0)),          # interior mask
            ],
            out_specs=pl.BlockSpec((1, P, Cp), lambda n: (n, 0, 0)),
            scratch_shapes=[
                pltpu.VMEM((2 * M + P, Cp), jnp.float32),        # h1 (+margins)
                pltpu.VMEM((P, 9 * Cp), jnp.bfloat16),           # im2col
            ],
        ),
        compiler_params=pltpu.CompilerParams(
            dimension_semantics=("parallel",)),
    )(x_pad, w1f, w2f, w3f, b1p, b2p, b3p, mask)

    # Strip halo pixels and channel padding back to NHWC.
    return out.reshape(N, Hp, Wp, Cp)[:, 1:H + 1, 1:W + 1, :C]


def _fold_bn(gamma, beta, mean, var, eps=1e-5):
    scale = gamma / jnp.sqrt(var + eps)
    bias = beta - mean * scale
    return scale.reshape(1, -1), bias.reshape(1, -1)


def _reference(x_nhwc, w1, w2, w3, bn1, bn2, bn3):
    """Pure-JAX reference mirroring the kernel numerics: BN scale folded into
    the (bf16-rounded) conv weights, bf16-rounded activations, f32 accumulate,
    f32 bias / ReLU / residual."""
    s1, b1 = bn1
    s2, b2 = bn2
    s3, b3 = bn3
    C = x_nhwc.shape[-1]
    q = lambda a: a.astype(jnp.bfloat16).astype(jnp.float32)
    dn = lax.conv_dimension_numbers(x_nhwc.shape, (1, 1, C, C),
                                    ("NHWC", "HWIO", "NHWC"))
    w1f = q(w1 * s1.reshape(1, C)).reshape(1, 1, C, C)
    w3f = q(w3 * s3.reshape(1, C)).reshape(1, 1, C, C)
    w2f = q(w2 * s2.reshape(1, 1, C)).reshape(3, 3, C, C)

    h1 = lax.conv_general_dilated(q(x_nhwc), w1f, (1, 1), "VALID",
                                  dimension_numbers=dn)
    h1 = jnp.maximum(h1 + b1.reshape(1, 1, 1, C), 0.0)
    h2 = lax.conv_general_dilated(q(h1), w2f, (1, 1), ((1, 1), (1, 1)),
                                  dimension_numbers=dn)
    h2 = jnp.maximum(h2 + b2.reshape(1, 1, 1, C), 0.0)
    h3 = lax.conv_general_dilated(q(h2), w3f, (1, 1), "VALID",
                                  dimension_numbers=dn)
    h3 = h3 + b3.reshape(1, 1, 1, C)
    return jnp.maximum(h3 + x_nhwc, 0.0)


if __name__ == "__main__":
    # Small deterministic config: N=2, C (= inplanes = planes) = 32, 16x16.
    N, H, W, C = 2, 16, 16, 32
    key = jax.random.PRNGKey(0)
    keys = jax.random.split(key, 16)

    # Input (conceptually NCHW like PyTorch) -> converted to NHWC.
    x_nchw = jax.random.normal(keys[0], (N, C, H, W), jnp.float32)
    x_nhwc = jnp.transpose(x_nchw, (0, 2, 3, 1))

    # Conv weights (PyTorch layout OIHW) -> kernel layouts.
    w1_oihw = jax.random.normal(keys[1], (C, C, 1, 1), jnp.float32) * 0.1
    w2_oihw = jax.random.normal(keys[2], (C, C, 3, 3), jnp.float32) * 0.1
    w3_oihw = jax.random.normal(keys[3], (C, C, 1, 1), jnp.float32) * 0.1
    w1 = jnp.transpose(w1_oihw[:, :, 0, 0], (1, 0))                  # (Cin, Cout)
    w3 = jnp.transpose(w3_oihw[:, :, 0, 0], (1, 0))                  # (Cin, Cout)
    w2 = jnp.transpose(w2_oihw, (2, 3, 1, 0)).reshape(9, C, C)       # (tap, Cin, Cout)

    # Synthetic, deterministic BatchNorm parameters (folded, inference form).
    def bn_params(k):
        kg, kb, km, kv = jax.random.split(k, 4)
        gamma = 1.0 + 0.1 * jax.random.normal(kg, (C,), jnp.float32)
        beta = 0.1 * jax.random.normal(kb, (C,), jnp.float32)
        mean = 0.1 * jax.random.normal(km, (C,), jnp.float32)
        var = 0.5 + jnp.abs(jax.random.normal(kv, (C,), jnp.float32))
        return _fold_bn(gamma, beta, mean, var)

    bn1 = bn_params(keys[4])
    bn2 = bn_params(keys[5])
    bn3 = bn_params(keys[6])

    out = bottleneck_block(x_nhwc, w1, w2, w3, bn1, bn2, bn3)
    out = jax.block_until_ready(out)

    ref = _reference(x_nhwc, w1, w2, w3, bn1, bn2, bn3)
    assert out.shape == (N, H, W, C)
    assert jnp.allclose(out, ref, atol=2e-2, rtol=2e-2), "mismatch vs reference"

    print("KERNEL_OK")
</pallas_src>

<mosaic_0001>
module attributes {stable_mosaic.version = 11 : i64} {
  func.func @_bottleneck_kernel(%arg0: i32, %arg1: memref<1x324x128xf32, #tpu.memory_space<vmem>>, %arg2: memref<128x128xbf16, #tpu.memory_space<vmem>>, %arg3: memref<1152x128xbf16, #tpu.memory_space<vmem>>, %arg4: memref<128x128xbf16, #tpu.memory_space<vmem>>, %arg5: memref<1x128xf32, #tpu.memory_space<vmem>>, %arg6: memref<1x128xf32, #tpu.memory_space<vmem>>, %arg7: memref<1x128xf32, #tpu.memory_space<vmem>>, %arg8: memref<324x1xf32, #tpu.memory_space<vmem>>, %arg9: memref<1x324x128xf32, #tpu.memory_space<vmem>>, %arg10: memref<372x128xf32, #tpu.memory_space<vmem>>, %arg11: memref<324x1152xbf16, #tpu.memory_space<vmem>>) attributes {dimension_semantics = [#tpu.dimension_semantics<parallel>], iteration_bounds = array<i64: 2>, scalar_prefetch = 0 : i64, scratch_operands = 2 : i64, tpu.core_type = #tpu.core_type<tc>, window_params = [{transform_indices = @transform_0, window_bounds = array<i64: 1, 324, 128>}, {pipeline_mode = #tpu.pipeline_mode<synchronous>, transform_indices = @transform_1, window_bounds = array<i64: 128, 128>}, {pipeline_mode = #tpu.pipeline_mode<synchronous>, transform_indices = @transform_2, window_bounds = array<i64: 1152, 128>}, {pipeline_mode = #tpu.pipeline_mode<synchronous>, transform_indices = @transform_3, window_bounds = array<i64: 128, 128>}, {pipeline_mode = #tpu.pipeline_mode<synchronous>, transform_indices = @transform_4, window_bounds = array<i64: 1, 128>}, {pipeline_mode = #tpu.pipeline_mode<synchronous>, transform_indices = @transform_5, window_bounds = array<i64: 1, 128>}, {pipeline_mode = #tpu.pipeline_mode<synchronous>, transform_indices = @transform_6, window_bounds = array<i64: 1, 128>}, {pipeline_mode = #tpu.pipeline_mode<synchronous>, transform_indices = @transform_7, window_bounds = array<i64: 324, 1>}, {transform_indices = @transform_8, window_bounds = array<i64: 1, 324, 128>}]} {
    %c0 = arith.constant 0 : index
    %c0_0 = arith.constant 0 : index
    %c0_1 = arith.constant 0 : index
    %0 = vector.load %arg1[%c0, %c0_0, %c0_1] : memref<1x324x128xf32, #tpu.memory_space<vmem>>, vector<1x324x128xf32>
    %1 = vector.shape_cast %0 : vector<1x324x128xf32> to vector<324x128xf32>
    %2 = arith.truncf %1 : vector<324x128xf32> to vector<324x128xbf16>
    %c0_2 = arith.constant 0 : index
    %c0_3 = arith.constant 0 : index
    %3 = vector.load %arg2[%c0_2, %c0_3] : memref<128x128xbf16, #tpu.memory_space<vmem>>, vector<128x128xbf16>
    %cst = arith.constant dense<0.000000e+00> : vector<324x128xf32>
    %4 = tpu.matmul %2, %3, %cst {dimension_numbers = #tpu.dot_dimension_numbers<[1], [0], [0], [1], [0, 0, 1, 1], [], []>} : vector<324x128xbf16>, vector<128x128xbf16>, vector<324x128xf32> -> vector<324x128xf32>
    %c0_4 = arith.constant 0 : index
    %c0_5 = arith.constant 0 : index
    %5 = vector.load %arg5[%c0_4, %c0_5] : memref<1x128xf32, #tpu.memory_space<vmem>>, vector<1x128xf32>
    %6 = vector.broadcast %5 : vector<1x128xf32> to vector<324x128xf32>
    %7 = arith.addf %4, %6 : vector<324x128xf32>
    %cst_6 = arith.constant 0.000000e+00 : f32
    %8 = vector.broadcast %cst_6 : f32 to vector<324x128xf32>
    %9 = arith.maximumf %7, %8 : vector<324x128xf32>
    %cst_7 = arith.constant 0.000000e+00 : f32
    %10 = vector.broadcast %cst_7 : f32 to vector<24x128xf32>
    %c0_8 = arith.constant 0 : index
    %c0_9 = arith.constant 0 : index
    %11 = vector.load %arg10[%c0_8, %c0_9] : memref<372x128xf32, #tpu.memory_space<vmem>>, vector<24x128xf32>
    tpu.vector_store %arg10[%c0_8, %c0_9], %10 {strides = array<i32>} : memref<372x128xf32, #tpu.memory_space<vmem>>, vector<24x128xf32>,
    %cst_10 = arith.constant 0.000000e+00 : f32
    %12 = vector.broadcast %cst_10 : f32 to vector<24x128xf32>
    %c348 = arith.constant 348 : index
    %c0_11 = arith.constant 0 : index
    %13 = vector.load %arg10[%c348, %c0_11] : memref<372x128xf32, #tpu.memory_space<vmem>>, vector<24x128xf32>
    tpu.vector_store %arg10[%c348, %c0_11], %12 {strides = array<i32>} : memref<372x128xf32, #tpu.memory_space<vmem>>, vector<24x128xf32>,
    %c0_12 = arith.constant 0 : index
    %c0_13 = arith.constant 0 : index
    %14 = vector.load %arg8[%c0_12, %c0_13] : memref<324x1xf32, #tpu.memory_space<vmem>>, vector<324x1xf32>
    %15 = vector.broadcast %14 : vector<324x1xf32> to vector<324x128xf32>
    %16 = arith.mulf %9, %15 : vector<324x128xf32>
    %c24 = arith.constant 24 : index
    %c0_14 = arith.constant 0 : index
    %17 = vector.load %arg10[%c24, %c0_14] : memref<372x128xf32, #tpu.memory_space<vmem>>, vector<324x128xf32>
    tpu.vector_store %arg10[%c24, %c0_14], %16 {strides = array<i32>} : memref<372x128xf32, #tpu.memory_space<vmem>>, vector<324x128xf32>,
    %c5 = arith.constant 5 : index
    %c0_15 = arith.constant 0 : index
    %18 = vector.load %arg10[%c5, %c0_15] : memref<372x128xf32, #tpu.memory_space<vmem>>, vector<324x128xf32>
    %19 = arith.truncf %18 : vector<324x128xf32> to vector<324x128xbf16>
    %c0_16 = arith.constant 0 : index
    %c0_17 = arith.constant 0 : index
    %20 = vector.load %arg11[%c0_16, %c0_17] : memref<324x1152xbf16, #tpu.memory_space<vmem>>, vector<324x128xbf16>
    tpu.vector_store %arg11[%c0_16, %c0_17], %19 {strides = array<i32>} : memref<324x1152xbf16, #tpu.memory_space<vmem>>, vector<324x128xbf16>,
    %c6 = arith.constant 6 : index
    %c0_18 = arith.constant 0 : index
    %21 = vector.load %arg10[%c6, %c0_18] : memref<372x128xf32, #tpu.memory_space<vmem>>, vector<324x128xf32>
    %22 = arith.truncf %21 : vector<324x128xf32> to vector<324x128xbf16>
    %c0_19 = arith.constant 0 : index
    %c128 = arith.constant 128 : index
    %23 = vector.load %arg11[%c0_19, %c128] : memref<324x1152xbf16, #tpu.memory_space<vmem>>, vector<324x128xbf16>
    tpu.vector_store %arg11[%c0_19, %c128], %22 {strides = array<i32>} : memref<324x1152xbf16, #tpu.memory_space<vmem>>, vector<324x128xbf16>,
    %c7 = arith.constant 7 : index
    %c0_20 = arith.constant 0 : index
    %24 = vector.load %arg10[%c7, %c0_20] : memref<372x128xf32, #tpu.memory_space<vmem>>, vector<324x128xf32>
    %25 = arith.truncf %24 : vector<324x128xf32> to vector<324x128xbf16>
    %c0_21 = arith.constant 0 : index
    %c256 = arith.constant 256 : index
    %26 = vector.load %arg11[%c0_21, %c256] : memref<324x1152xbf16, #tpu.memory_space<vmem>>, vector<324x128xbf16>
    tpu.vector_store %arg11[%c0_21, %c256], %25 {strides = array<i32>} : memref<324x1152xbf16, #tpu.memory_space<vmem>>, vector<324x128xbf16>,
    %c23 = arith.constant 23 : index
    %c0_22 = arith.constant 0 : index
    %27 = vector.load %arg10[%c23, %c0_22] : memref<372x128xf32, #tpu.memory_space<vmem>>, vector<324x128xf32>
    %28 = arith.truncf %27 : vector<324x128xf32> to vector<324x128xbf16>
    %c0_23 = arith.constant 0 : index
    %c384 = arith.constant 384 : index
    %29 = vector.load %arg11[%c0_23, %c384] : memref<324x1152xbf16, #tpu.memory_space<vmem>>, vector<324x128xbf16>
    tpu.vector_store %arg11[%c0_23, %c384], %28 {strides = array<i32>} : memref<324x1152xbf16, #tpu.memory_space<vmem>>, vector<324x128xbf16>,
    %c24_24 = arith.constant 24 : index
    %c0_25 = arith.constant 0 : index
    %30 = vector.load %arg10[%c24_24, %c0_25] : memref<372x128xf32, #tpu.memory_space<vmem>>, vector<324x128xf32>
    %31 = arith.truncf %30 : vector<324x128xf32> to vector<324x128xbf16>
    %c0_26 = arith.constant 0 : index
    %c512 = arith.constant 512 : index
    %32 = vector.load %arg11[%c0_26, %c512] : memref<324x1152xbf16, #tpu.memory_space<vmem>>, vector<324x128xbf16>
    tpu.vector_store %arg11[%c0_26, %c512], %31 {strides = array<i32>} : memref<324x1152xbf16, #tpu.memory_space<vmem>>, vector<324x128xbf16>,
    %c25 = arith.constant 25 : index
    %c0_27 = arith.constant 0 : index
    %33 = vector.load %arg10[%c25, %c0_27] : memref<372x128xf32, #tpu.memory_space<vmem>>, vector<324x128xf32>
    %34 = arith.truncf %33 : vector<324x128xf32> to vector<324x128xbf16>
    %c0_28 = arith.constant 0 : index
    %c640 = arith.constant 640 : index
    %35 = vector.load %arg11[%c0_28, %c640] : memref<324x1152xbf16, #tpu.memory_space<vmem>>, vector<324x128xbf16>
    tpu.vector_store %arg11[%c0_28, %c640], %34 {strides = array<i32>} : memref<324x1152xbf16, #tpu.memory_space<vmem>>, vector<324x128xbf16>,
    %c41 = arith.constant 41 : index
    %c0_29 = arith.constant 0 : index
    %36 = vector.load %arg10[%c41, %c0_29] : memref<372x128xf32, #tpu.memory_space<vmem>>, vector<324x128xf32>
    %37 = arith.truncf %36 : vector<324x128xf32> to vector<324x128xbf16>
    %c0_30 = arith.constant 0 : index
    %c768 = arith.constant 768 : index
    %38 = vector.load %arg11[%c0_30, %c768] : memref<324x1152xbf16, #tpu.memory_space<vmem>>, vector<324x128xbf16>
    tpu.vector_store %arg11[%c0_30, %c768], %37 {strides = array<i32>} : memref<324x1152xbf16, #tpu.memory_space<vmem>>, vector<324x128xbf16>,
    %c42 = arith.constant 42 : index
    %c0_31 = arith.constant 0 : index
    %39 = vector.load %arg10[%c42, %c0_31] : memref<372x128xf32, #tpu.memory_space<vmem>>, vector<324x128xf32>
    %40 = arith.truncf %39 : vector<324x128xf32> to vector<324x128xbf16>
    %c0_32 = arith.constant 0 : index
    %c896 = arith.constant 896 : index
    %41 = vector.load %arg11[%c0_32, %c896] : memref<324x1152xbf16, #tpu.memory_space<vmem>>, vector<324x128xbf16>
    tpu.vector_store %arg11[%c0_32, %c896], %40 {strides = array<i32>} : memref<324x1152xbf16, #tpu.memory_space<vmem>>, vector<324x128xbf16>,
    %c43 = arith.constant 43 : index
    %c0_33 = arith.constant 0 : index
    %42 = vector.load %arg10[%c43, %c0_33] : memref<372x128xf32, #tpu.memory_space<vmem>>, vector<324x128xf32>
    %43 = arith.truncf %42 : vector<324x128xf32> to vector<324x128xbf16>
    %c0_34 = arith.constant 0 : index
    %c1024 = arith.constant 1024 : index
    %44 = vector.load %arg11[%c0_34, %c1024] : memref<324x1152xbf16, #tpu.memory_space<vmem>>, vector<324x128xbf16>
    tpu.vector_store %arg11[%c0_34, %c1024], %43 {strides = array<i32>} : memref<324x1152xbf16, #tpu.memory_space<vmem>>, vector<324x128xbf16>,
    %c0_35 = arith.constant 0 : index
    %c0_36 = arith.constant 0 : index
    %45 = vector.load %arg11[%c0_35, %c0_36] : memref<324x1152xbf16, #tpu.memory_space<vmem>>, vector<324x1152xbf16>
    %c0_37 = arith.constant 0 : index
    %c0_38 = arith.constant 0 : index
    %46 = vector.load %arg3[%c0_37, %c0_38] : memref<1152x128xbf16, #tpu.memory_space<vmem>>, vector<1152x128xbf16>
    %cst_39 = arith.constant dense<0.000000e+00> : vector<324x128xf32>
    %47 = tpu.matmul %45, %46, %cst_39 {dimension_numbers = #tpu.dot_dimension_numbers<[1], [0], [0], [1], [0, 0, 1, 1], [], []>} : vector<324x1152xbf16>, vector<1152x128xbf16>, vector<324x128xf32> -> vector<324x128xf32>
    %c0_40 = arith.constant 0 : index
    %c0_41 = arith.constant 0 : index
    %48 = vector.load %arg6[%c0_40, %c0_41] : memref<1x128xf32, #tpu.memory_space<vmem>>, vector<1x128xf32>
    %49 = vector.broadcast %48 : vector<1x128xf32> to vector<324x128xf32>
    %50 = arith.addf %47, %49 : vector<324x128xf32>
    %cst_42 = arith.constant 0.000000e+00 : f32
    %51 = vector.broadcast %cst_42 : f32 to vector<324x128xf32>
    %52 = arith.maximumf %50, %51 : vector<324x128xf32>
    %53 = arith.truncf %52 : vector<324x128xf32> to vector<324x128xbf16>
    %c0_43 = arith.constant 0 : index
    %c0_44 = arith.constant 0 : index
    %54 = vector.load %arg4[%c0_43, %c0_44] : memref<128x128xbf16, #tpu.memory_space<vmem>>, vector<128x128xbf16>
    %cst_45 = arith.constant dense<0.000000e+00> : vector<324x128xf32>
    %55 = tpu.matmul %53, %54, %cst_45 {dimension_numbers = #tpu.dot_dimension_numbers<[1], [0], [0], [1], [0, 0, 1, 1], [], []>} : vector<324x128xbf16>, vector<128x128xbf16>, vector<324x128xf32> -> vector<324x128xf32>
    %c0_46 = arith.constant 0 : index
    %c0_47 = arith.constant 0 : index
    %56 = vector.load %arg7[%c0_46, %c0_47] : memref<1x128xf32, #tpu.memory_space<vmem>>, vector<1x128xf32>
    %57 = vector.broadcast %56 : vector<1x128xf32> to vector<324x128xf32>
    %58 = arith.addf %55, %57 : vector<324x128xf32>
    %c0_48 = arith.constant 0 : index
    %c0_49 = arith.constant 0 : index
    %c0_50 = arith.constant 0 : index
    %59 = vector.load %arg1[%c0_48, %c0_49, %c0_50] : memref<1x324x128xf32, #tpu.memory_space<vmem>>, vector<1x324x128xf32>
    %60 = vector.shape_cast %59 : vector<1x324x128xf32> to vector<324x128xf32>
    %61 = arith.addf %58, %60 : vector<324x128xf32>
    %cst_51 = arith.constant 0.000000e+00 : f32
    %62 = vector.broadcast %cst_51 : f32 to vector<324x128xf32>
    %63 = arith.maximumf %61, %62 : vector<324x128xf32>
    %c0_52 = arith.constant 0 : index
    %c0_53 = arith.constant 0 : index
    %c0_54 = arith.constant 0 : index
    %64 = vector.load %arg9[%c0_52, %c0_53, %c0_54] : memref<1x324x128xf32, #tpu.memory_space<vmem>>, vector<1x324x128xf32>
    %65 = vector.shape_cast %64 : vector<1x324x128xf32> to vector<324x128xf32>
    %66 = vector.shape_cast %63 : vector<324x128xf32> to vector<1x324x128xf32>
    tpu.vector_store %arg9[%c0_52, %c0_53, %c0_54], %66 {strides = array<i32>} : memref<1x324x128xf32, #tpu.memory_space<vmem>>, vector<1x324x128xf32>,
    return
  }
  func.func @transform_0(%arg0: i32) -> (i32, i32, i32) {
    %c0_i32 = arith.constant 0 : i32
    %c0_i32_0 = arith.constant 0 : i32
    %c0_i32_1 = arith.constant 0 : i32
    return %arg0, %c0_i32, %c0_i32_0 : i32, i32, i32
  }
  func.func @transform_1(%arg0: i32) -> (i32, i32) {
    %c0_i32 = arith.constant 0 : i32
    %c0_i32_0 = arith.constant 0 : i32
    %c0_i32_1 = arith.constant 0 : i32
    return %c0_i32, %c0_i32_0 : i32, i32
  }
  func.func @transform_2(%arg0: i32) -> (i32, i32) {
    %c0_i32 = arith.constant 0 : i32
    %c0_i32_0 = arith.constant 0 : i32
    %c0_i32_1 = arith.constant 0 : i32
    return %c0_i32, %c0_i32_0 : i32, i32
  }
  func.func @transform_3(%arg0: i32) -> (i32, i32) {
    %c0_i32 = arith.constant 0 : i32
    %c0_i32_0 = arith.constant 0 : i32
    %c0_i32_1 = arith.constant 0 : i32
    return %c0_i32, %c0_i32_0 : i32, i32
  }
  func.func @transform_4(%arg0: i32) -> (i32, i32) {
    %c0_i32 = arith.constant 0 : i32
    %c0_i32_0 = arith.constant 0 : i32
    %c0_i32_1 = arith.constant 0 : i32
    return %c0_i32, %c0_i32_0 : i32, i32
  }
  func.func @transform_5(%arg0: i32) -> (i32, i32) {
    %c0_i32 = arith.constant 0 : i32
    %c0_i32_0 = arith.constant 0 : i32
    %c0_i32_1 = arith.constant 0 : i32
    return %c0_i32, %c0_i32_0 : i32, i32
  }
  func.func @transform_6(%arg0: i32) -> (i32, i32) {
    %c0_i32 = arith.constant 0 : i32
    %c0_i32_0 = arith.constant 0 : i32
    %c0_i32_1 = arith.constant 0 : i32
    return %c0_i32, %c0_i32_0 : i32, i32
  }
  func.func @transform_7(%arg0: i32) -> (i32, i32) {
    %c0_i32 = arith.constant 0 : i32
    %c0_i32_0 = arith.constant 0 : i32
    %c0_i32_1 = arith.constant 0 : i32
    return %c0_i32, %c0_i32_0 : i32, i32
  }
  func.func @transform_8(%arg0: i32) -> (i32, i32, i32) {
    %c0_i32 = arith.constant 0 : i32
    %c0_i32_0 = arith.constant 0 : i32
    %c0_i32_1 = arith.constant 0 : i32
    return %arg0, %c0_i32, %c0_i32_0 : i32, i32, i32
  }
}

</mosaic_0001>

<bundles_post_ra>
// kernel: tpu_custom_call.1
= control target key start
LH: loop header
LB: loop body
LE: loop exit
PB: predicated region body
PF: predicated region fallthrough
CT: control target
= control target key end

     0   :  { %s8392_s27 = smov 0   ;;  %s9782_s0 = inlined_call_operand.vmem [shape: f32[2,324,128], index: 0, kind: input, shape index: {}]   ;;  %s9783_s1 = inlined_call_operand.vmem [shape: bf16[128,128], index: 1, kind: input, shape index: {}]   ;;  %s9784_s2 = inlined_call_operand.vmem [shape: bf16[1152,128], index: 2, kind: input, shape index: {}]   ;;  %s9785_s3 = inlined_call_operand.vmem [shape: bf16[128,128], index: 3, kind: input, shape index: {}]   ;;  %s9786_s4 = inlined_call_operand.vmem [shape: f32[1,128], index: 4, kind: input, shape index: {}]   ;;  %s9787_s5 = inlined_call_operand.vmem [shape: f32[1,128], index: 5, kind: input, shape index: {}]   ;;  %s9788_s6 = inlined_call_operand.vmem [shape: f32[1,128], index: 6, kind: input, shape index: {}]   ;;  %s9789_s7 = inlined_call_operand.vmem [shape: f32[324,1], index: 7, kind: input, shape index: {}]   ;;  %s9790_s8 = inlined_call_operand.vmem [shape: f32[2,324,128], index: 8, kind: output, shape index: {}]  }
   0x1 LB: > { %s6530_s28 = sadd.s32 4294967295, %s8342_s27   ;;  %p6534_p0 = scmp.ge.s32.totalorder %s8342_s27, 1  ;;  %s8342_s27 = sphi %s8392_s27, %s18_s27  }
   0x2   : > { %p262_p1 = scmp.lt.s32.totalorder %s8342_s27, 3 }
   0x4   : > { %p263_p2 = pnand %p6534_p0, %p262_p1 }
   0x5   : > { %p296_p3 = scmp.lt.s32.totalorder (!%p263_p2), %s6530_s28, 1 }
   0x6   : > { %266 = sbr.rel (%p263_p2) target bundleno = 1276 (0x4fc), region = 52 }
   0xb   : > { %v7974_v0 = vld [vmem:[%s9783_s1 + $0x38] sm:$0xff]   ;;  %v8344_v1 = vmov 0.0   ;;  %v7975_v2 = vld [vmem:[%s9783_s1 + $0x30] sm:$0xff]   ;;  %v8345_v3 = vmov 0   ;;  %vm8346_vm0 = vmmov 0   ;;  %v7976_v4 = vld [vmem:[%s9783_s1 + $0x28] sm:$0xff]  }
   0xc   : > { %7644 = vmatprep.subr.bf16.mxu0 %v8344_v1  ;;  %681 = vst [vmem:[#allocation2] sm:$0xff] %v8344_v1  ;;  %682 = vst [vmem:[#allocation2 + $0x8] sm:$0xff] %v8344_v1  ;;  %7944 = vmatprep.subr.bf16.mxu1 %v8344_v1  ;;  %v687_v5 = vld [vmem:[%s9789_s7] sm:$0xff]  ;;  %v688_v6 = vld [vmem:[%s9789_s7 + $0x8] sm:$0xff]  ;;  %s9792_s28 = smov (!%p296_p3, %s6530_s28), 1 }
   0xd   : > { %683 = vst [vmem:[#allocation2 + $0x10] sm:$0xff] %v8344_v1  ;;  %684 = vst [vmem:[#allocation2 + $0x15c] sm:$0xff] %v8344_v1  ;;  %7645 = vmatpush3.bf16.msra.mxu0 %v7974_v0  ;;  %7952 = vmatpush3.bf16.msra.mxu1 %v7974_v0  ;;  %v689_v7 = vld [vmem:[%s9789_s7 + $0x10] sm:$0xff]  ;;  %v7977_v8 = vld [vmem:[%s9783_s1 + $0x20] sm:$0xff]   ;;  %s7960_s13 = smul.u32 328, %s9792_s28 }
   0xe   : > { %685 = vst [vmem:[#allocation2 + $0x164] sm:$0xff] %v8344_v1  ;;  %686 = vst [vmem:[#allocation2 + $0x16c] sm:$0xff] %v8344_v1  ;;  %7646 = vmatprep.subr.bf16.mxu0 %v8344_v1  ;;  %7945 = vmatprep.subr.bf16.mxu1 %v8344_v1  ;;  %v691_v9 = vld [vmem:[%s9789_s7 + $0x20] sm:$0xff]  ;;  %v690_v10 = vld [vmem:[%s9789_s7 + $0x18] sm:$0xff] }
   0xf   : > { %7972 = vset.pattern.permute.xlu0 %v8345_v3  ;;  %7660 = vmatprep.mubr.msk.bf16.mxu0 %vm8346_vm0, %v8344_v1  ;;  %v7978_v11 = vld [vmem:[%s9783_s1 + $0x18] sm:$0xff]   ;;  %v693_v12 = vld [vmem:[%s9789_s7 + $0x30] sm:$0xff]  ;;  %v692_v13 = vld [vmem:[%s9789_s7 + $0x28] sm:$0xff]  ;;  %s8484_s22 = scalar_lea.vmem %s9782_s0, %s7960_s13  ;;  %s9656_s29 = scalar_lea.vmem %s9790_s8, %s7960_s13 }
  0x10   : > { %7704 = vmatprep.mubr.msk.bf16.mxu1 %vm8346_vm0, %v8344_v1  ;;  %7973 = vset.pattern.permute.xlu1 %v8345_v3  ;;  %v7979_v14 = vld [vmem:[%s9783_s1 + $0x10] sm:$0xff]   ;;  %v695_v15 = vld [vmem:[%s9789_s7 + $0x40] sm:$0xff]  ;;  %v694_v16 = vld [vmem:[%s9789_s7 + $0x38] sm:$0xff] }
  0x11   : > { %7647 = vmatpush3.bf16.msra.mxu0 %v7975_v2  ;;  %7953 = vmatpush3.bf16.msra.mxu1 %v7975_v2  ;;  %v7980_v17 = vld [vmem:[%s9783_s1 + $0x8] sm:$0xff]   ;;  %v7981_v18 = vld [vmem:[%s9783_s1] sm:$0xff]   ;;  %v697_v20 = vld [vmem:[%s9789_s7 + $0x50] sm:$0xff] }
  0x12   : > { %7648 = vmatprep.subr.bf16.mxu0 %v8344_v1  ;;  %7946 = vmatprep.subr.bf16.mxu1 %v8344_v1  ;;  %v307_v19 = vld [vmem:[%s8484_s22] sm:$0xff]  ;;  %v696_v21 = vld [vmem:[%s9789_s7 + $0x48] sm:$0xff]  ;;  %v329_v23 = vld [vmem:[%s8484_s22 + $0xb0] sm:$0xff] }
  0x13   : > { %730 = vperm.xlu0 %7972, %v687_v5   ;;  %740 = vperm.xlu1 %7973, %v689_v7   ;;  %v308_v22 = vld [vmem:[%s8484_s22 + $0x8] sm:$0xff]  ;;  %v330_v24 = vld [vmem:[%s8484_s22 + $0xb8] sm:$0xff]  ;;  %v699_v27 = vld [vmem:[%s9789_s7 + $0x60] sm:$0xff] }
  0x14   : > { %v348_v25 = vpack.c.bf16 %v308_v22, %v307_v19  ;;  %v359_v26 = vpack.c.bf16 %v330_v24, %v329_v23  ;;  %v698_v28 = vld [vmem:[%s9789_s7 + $0x58] sm:$0xff]  ;;  %v309_v29 = vld [vmem:[%s8484_s22 + $0x10] sm:$0xff]  ;;  %v700_v31 = vld [vmem:[%s9789_s7 + $0x68] sm:$0xff] }
  0x15   : > { %7649 = vmatpush3.bf16.msra.mxu0 %v7976_v4  ;;  %7954 = vmatpush3.bf16.msra.mxu1 %v7976_v4  ;;  %v701_v30 = vld [vmem:[%s9789_s7 + $0x70] sm:$0xff]  ;;  %v310_v32 = vld [vmem:[%s8484_s22 + $0x18] sm:$0xff]  ;;  %v331_v33 = vld [vmem:[%s8484_s22 + $0xc0] sm:$0xff] }
  0x16   : > { %7650 = vmatprep.subr.bf16.mxu0 %v8344_v1  ;;  %7947 = vmatprep.subr.bf16.mxu1 %v8344_v1  ;;  %v332_v34 = vld [vmem:[%s8484_s22 + $0xc8] sm:$0xff]  ;;  %v703_v35 = vld [vmem:[%s9789_s7 + $0x80] sm:$0xff]  ;;  %v7982_v36 = vld [vmem:[%s9784_s2 + $0x38] sm:$0xff]   ;;  %v349_v37 = vpack.c.bf16 %v310_v32, %v309_v29 }
  0x17   : > { %735 = vperm.xlu0 %7972, %v688_v6   ;;  %745 = vperm.xlu1 %7973, %v690_v10   ;;  %v360_v38 = vpack.c.bf16 %v332_v34, %v331_v33  ;;  %v702_v39 = vld [vmem:[%s9789_s7 + $0x78] sm:$0xff]  ;;  %v705_v40 = vld [vmem:[%s9789_s7 + $0x90] sm:$0xff]  ;;  %v704_v41 = vld [vmem:[%s9789_s7 + $0x88] sm:$0xff] }
  0x18   : > { %v7983_v42 = vld [vmem:[%s9784_s2 + $0x30] sm:$0xff]   ;;  %v311_v43 = vld [vmem:[%s8484_s22 + $0x20] sm:$0xff]  ;;  %v312_v44 = vld [vmem:[%s8484_s22 + $0x28] sm:$0xff] }
  0x19   : > { %7651 = vmatpush3.bf16.msra.mxu0 %v7977_v8  ;;  %7955 = vmatpush3.bf16.msra.mxu1 %v7977_v8  ;;  %v333_v45 = vld [vmem:[%s8484_s22 + $0xd0] sm:$0xff]  ;;  %v334_v46 = vld [vmem:[%s8484_s22 + $0xd8] sm:$0xff]  ;;  %v707_v47 = vld [vmem:[%s9789_s7 + $0xa0] sm:$0xff]  ;;  %v350_v50 = vpack.c.bf16 %v312_v44, %v311_v43 }
  0x1a   : > { %7652 = vmatprep.subr.bf16.mxu0 %v8344_v1  ;;  %7948 = vmatprep.subr.bf16.mxu1 %v8344_v1  ;;  %v706_v48 = vld [vmem:[%s9789_s7 + $0x98] sm:$0xff]  ;;  %v7984_v49 = vld [vmem:[%s9784_s2 + $0x28] sm:$0xff]   ;;  %v361_v51 = vpack.c.bf16 %v334_v46, %v333_v45  ;;  %v709_v52 = vld [vmem:[%s9789_s7 + $0xb0] sm:$0xff] }
  0x1b   : > { %750 = vperm.xlu0 %7972, %v691_v9   ;;  %755 = vperm.xlu1 %7973, %v692_v13   ;;  %v708_v53 = vld [vmem:[%s9789_s7 + $0xa8] sm:$0xff]  ;;  %v7985_v54 = vld [vmem:[%s9784_s2 + $0x20] sm:$0xff]   ;;  %v7988_v55 = vld [vmem:[%s9784_s2 + $0xb8] sm:$0xff]  }
  0x1c   : > { %v313_v56 = vld [vmem:[%s8484_s22 + $0x30] sm:$0xff]  ;;  %v314_v57 = vld [vmem:[%s8484_s22 + $0x38] sm:$0xff]  ;;  %v335_v58 = vld [vmem:[%s8484_s22 + $0xe0] sm:$0xff] }
  0x1d   : > { %7653 = vmatpush3.bf16.msra.mxu0 %v7978_v11  ;;  %7956 = vmatpush3.bf16.msra.mxu1 %v7978_v11  ;;  %v336_v59 = vld [vmem:[%s8484_s22 + $0xe8] sm:$0xff]  ;;  %v711_v60 = vld [vmem:[%s9789_s7 + $0xc0] sm:$0xff]  ;;  %v710_v61 = vld [vmem:[%s9789_s7 + $0xb8] sm:$0xff]  ;;  %v351_v63 = vpack.c.bf16 %v314_v57, %v313_v56 }
  0x1e   : > { %7654 = vmatprep.subr.bf16.mxu0 %v8344_v1  ;;  %7949 = vmatprep.subr.bf16.mxu1 %v8344_v1  ;;  %v7989_v62 = vld [vmem:[%s9784_s2 + $0xb0] sm:$0xff]   ;;  %v362_v0 = vpack.c.bf16 %v336_v59, %v335_v58  ;;  %v712_v4 = vld [vmem:[%s9789_s7 + $0xc8] sm:$0xff]  ;;  %v7986_v5 = vld [vmem:[%s9784_s2 + $0x18] sm:$0xff]  }
  0x1f   : > { %760 = vperm.xlu0 %7972, %v693_v12   ;;  %765 = vperm.xlu1 %7973, %v694_v16   ;;  %v713_v2 = vld [vmem:[%s9789_s7 + $0xd0] sm:$0xff]  ;;  %v7991_v6 = vld [vmem:[%s9784_s2 + $0xa8] sm:$0xff]   ;;  %v315_v7 = vld [vmem:[%s8484_s22 + $0x40] sm:$0xff] }
  0x20   : > { %v316_v8 = vld [vmem:[%s8484_s22 + $0x48] sm:$0xff]  ;;  %v337_v9 = vld [vmem:[%s8484_s22 + $0xf0] sm:$0xff]  ;;  %v338_v10 = vld [vmem:[%s8484_s22 + $0xf8] sm:$0xff] }
  0x21   : > { %7655 = vmatpush3.bf16.msra.mxu0 %v7979_v14  ;;  %7957 = vmatpush3.bf16.msra.mxu1 %v7979_v14  ;;  %v715_v11 = vld [vmem:[%s9789_s7 + $0xe0] sm:$0xff]  ;;  %v714_v12 = vld [vmem:[%s9789_s7 + $0xd8] sm:$0xff]  ;;  %v7987_v13 = vld [vmem:[%s9784_s2 + $0x10] sm:$0xff]   ;;  %v352_v14 = vpack.c.bf16 %v316_v8, %v315_v7 }
  0x22   : > { %7656 = vmatprep.subr.bf16.mxu0 %v8344_v1  ;;  %7950 = vmatprep.subr.bf16.mxu1 %v8344_v1  ;;  %v717_v16 = vld [vmem:[%s9789_s7 + $0xf0] sm:$0xff]  ;;  %v7993_v19 = vld [vmem:[%s9784_s2 + $0xa0] sm:$0xff]   ;;  %v340_v23 = vld [vmem:[%s8484_s22 + $0x108] sm:$0xff] }
  0x23   : > { %770 = vperm.xlu0 %7972, %v695_v15   ;;  %775 = vperm.xlu1 %7973, %v696_v21   ;;  %v363_v15 = vpack.c.bf16 %v338_v10, %v337_v9  ;;  %v318_v21 = vld [vmem:[%s8484_s22 + $0x58] sm:$0xff]  ;;  %v339_v22 = vld [vmem:[%s8484_s22 + $0x100] sm:$0xff]  ;;  %v721_v29 = vld [vmem:[%s9789_s7 + $0x110] sm:$0xff] }
  0x24   : > { %v719_v24 = vld [vmem:[%s9789_s7 + $0x100] sm:$0xff]  ;;  %v7997_v32 = vld [vmem:[%s9784_s2 + $0x90] sm:$0xff]   ;;  %v320_v34 = vld [vmem:[%s8484_s22 + $0x68] sm:$0xff] }
  0x25   : > { %7657 = vmatpush3.bf16.msra.mxu0 %v7980_v17  ;;  %7958 = vmatpush3.bf16.msra.mxu1 %v7980_v17  ;;  %v716_v17 = vld [vmem:[%s9789_s7 + $0xe8] sm:$0xff]  ;;  %v319_v33 = vld [vmem:[%s8484_s22 + $0x60] sm:$0xff]  ;;  %v7996_v44 = vld [vmem:[%s9784_s2 + $0x70] sm:$0xff]  }
  0x26   : > { %7658 = vmatprep.subr.bf16.mxu0 %v8344_v1  ;;  %7951 = vmatprep.subr.bf16.mxu1 %v8344_v1  ;;  %v724_v43 = vld [vmem:[%s9789_s7 + $0x128] sm:$0xff]  ;;  %v321_v46 = vld [vmem:[%s8484_s22 + $0x70] sm:$0xff]  ;;  %v323_v56 = vld [vmem:[%s8484_s22 + $0x80] sm:$0xff] }
  0x27   : > { %780 = vperm.xlu0 %7972, %v697_v20   ;;  %785 = vperm.xlu1 %7973, %v698_v28   ;;  %v317_v20 = vld [vmem:[%s8484_s22 + $0x50] sm:$0xff]  ;;  %v364_v28 = vpack.c.bf16 %v340_v23, %v339_v22  ;;  %v7998_v45 = vld [vmem:[%s9784_s2 + $0x88] sm:$0xff]   ;;  %v346_v59 = vld [vmem:[%s8484_s22 + $0x138] sm:$0xff] }
  0x28   : > { %v324_v57 = vld [vmem:[%s8484_s22 + $0x88] sm:$0xff]  ;;  %v345_v58 = vld [vmem:[%s8484_s22 + $0x130] sm:$0xff]  ;;  %v327_v10 = vld [vmem:[%s8484_s22 + $0xa0] sm:$0xff] }
  0x29   : > { %7659 = vmatpush3.bf16.msra.mxu0 %v7981_v18  ;;  %7959 = vmatpush3.bf16.msra.mxu1 %v7981_v18  ;;  %v7990_v18 = vld [vmem:[%s9784_s2 + $0x8] sm:$0xff]   ;;  %v8004_v8 = vld [vmem:[%s9784_s2 + $0xf0] sm:$0xff]   ;;  %v8008_v22 = vld [vmem:[%s9784_s2 + $0xe0] sm:$0xff]  }
  0x2a   : > { %4978 = vmatprep.subr.bf16.mxu1 %v8345_v3  ;;  %5178 = vmatprep.subr.bf16.mxu0 %v8345_v3  ;;  %v8005_v9 = vld [vmem:[%s9784_s2 + $0x50] sm:$0xff]   ;;  %v8009_v23 = vld [vmem:[%s9784_s2 + $0x40] sm:$0xff]  }
  0x2b   : > { %790 = vperm.xlu0 %7972, %v699_v27   ;;  %795 = vperm.xlu1 %7973, %v700_v31   ;;  %v353_v27 = vpack.c.bf16 %v318_v21, %v317_v20  ;;  %v7992_v31 = vld [vmem:[%s9784_s2] sm:$0xff]  }
  0x2c   : > { %7661 = vmatmul.mubr.bf16.vlgmr.msra.gmra.mxu0 %v348_v25  ;;  %7705 = vmatmul.mubr.bf16.vlgmr.msra.gmra.mxu1 %v359_v26  ;;  %v718_v25 = vld [vmem:[%s9789_s7 + $0xf8] sm:$0xff] }
  0x2d   : > { %7664 = vmatprep.mubr.msk.bf16.mxu0 %vm8346_vm0, %v8344_v1  ;;  %7708 = vmatprep.mubr.msk.bf16.mxu1 %vm8346_vm0, %v8344_v1  ;;  %v7995_v26 = vld [vmem:[%s9784_s2 + $0x98] sm:$0xff]  }
  0x2e   : > { %4979 = vmatpush1.bf16.msra.mxu1 %v7982_v36  ;;  %5179 = vmatpush1.bf16.msra.mxu0 %v7988_v55  ;;  %v342_v36 = vld [vmem:[%s8484_s22 + $0x118] sm:$0xff]  ;;  %v7999_v55 = vld [vmem:[%s9784_s2 + $0x68] sm:$0xff]  }
  0x2f   : > { %800 = vperm.xlu0 %7972, %v701_v30   ;;  %4980 = vmatprep.subr.bf16.mxu1 %v8345_v3  ;;  %v720_v30 = vld [vmem:[%s9789_s7 + $0x108] sm:$0xff] }
  0x30   : > { %805 = vperm.xlu1 %7973, %v702_v39   ;;  %5180 = vmatprep.subr.bf16.mxu0 %v8345_v3  ;;  %v7994_v39 = vld [vmem:[%s9784_s2 + $0x78] sm:$0xff]  }
  0x32   : > { %4981 = vmatpush1.bf16.msra.mxu1 %v7983_v42  ;;  %5181 = vmatpush1.bf16.msra.mxu0 %v7989_v62  ;;  %v725_v42 = vld [vmem:[%s9789_s7 + $0x130] sm:$0xff]  ;;  %v367_v62 = vpack.c.bf16 %v346_v59, %v345_v58  ;;  %v8069_v59 = vld [vmem:[%s9784_s2 + $0x108] sm:$0xff]  }
  0x33   : > { %810 = vperm.xlu0 %7972, %v703_v35   ;;  %4982 = vmatprep.subr.bf16.mxu1 %v8345_v3  ;;  %v341_v35 = vld [vmem:[%s8484_s22 + $0x110] sm:$0xff] }
  0x34   : > { %7665 = vmatmul.mubr.bf16.gmra.mxu0 %v349_v37  ;;  %7709 = vmatmul.mubr.bf16.gmra.mxu1 %v360_v38  ;;  %v723_v37 = vld [vmem:[%s9789_s7 + $0x120] sm:$0xff]  ;;  %v722_v38 = vld [vmem:[%s9789_s7 + $0x118] sm:$0xff] }
  0x35   : > { %7668 = vmatprep.mubr.msk.bf16.mxu0 %vm8346_vm0, %v8344_v1  ;;  %7712 = vmatprep.mubr.msk.bf16.mxu1 %vm8346_vm0, %v8344_v1 }
  0x36   : > { %815 = vperm.xlu1 %7973, %v704_v41   ;;  %4983 = vmatpush1.bf16.msra.mxu1 %v7984_v49  ;;  %v365_v41 = vpack.c.bf16 %v342_v36, %v341_v35  ;;  %v344_v49 = vld [vmem:[%s8484_s22 + $0x128] sm:$0xff]  ;;  %v8024_v35 = vld [vmem:[%s9784_s2 + $0x130] sm:$0xff]  }
  0x37   : > { %820 = vperm.xlu0 %7972, %v705_v40   ;;  %4984 = vmatprep.subr.bf16.mxu1 %v8345_v3  ;;  %v354_v40 = vpack.c.bf16 %v320_v34, %v319_v33  ;;  %v8017_v33 = vld [vmem:[%s9784_s2 + $0xc0] sm:$0xff]   ;;  %v8015_v34 = vld [vmem:[%s9784_s2 + $0x138] sm:$0xff]  }
  0x38   : > { %5182 = vmatprep.subr.bf16.mxu0 %v8345_v3 }
  0x39   : > { %5183 = vmatpush1.bf16.msra.mxu0 %v7991_v6 }
  0x3a   : > { %825 = vperm.xlu1 %7973, %v706_v48   ;;  %4985 = vmatpush1.bf16.msra.mxu1 %v7985_v54  ;;  %v343_v48 = vld [vmem:[%s8484_s22 + $0x120] sm:$0xff] }
  0x3b   : > { %830 = vperm.xlu0 %7972, %v707_v47   ;;  %4986 = vmatprep.subr.bf16.mxu1 %v8345_v3  ;;  %v322_v47 = vld [vmem:[%s8484_s22 + $0x78] sm:$0xff]  ;;  %v366_v54 = vpack.c.bf16 %v344_v49, %v343_v48 }
  0x3c   : > { %7669 = vmatmul.mubr.bf16.gmra.mxu0 %v350_v50  ;;  %7713 = vmatmul.mubr.bf16.gmra.mxu1 %v361_v51  ;;  %v8000_v50 = vld [vmem:[%s9784_s2 + $0x80] sm:$0xff]  }
  0x3d   : > { %7672 = vmatprep.mubr.msk.bf16.mxu0 %vm8346_vm0, %v8344_v1  ;;  %7716 = vmatprep.mubr.msk.bf16.mxu1 %vm8346_vm0, %v8344_v1  ;;  %v727_v51 = vld [vmem:[%s9789_s7 + $0x140] sm:$0xf] }
  0x3e   : > { %835 = vperm.xlu1 %7973, %v708_v53   ;;  %4987 = vmatpush1.bf16.msra.mxu1 %v7986_v5  ;;  %v355_v53 = vpack.c.bf16 %v322_v47, %v321_v46  ;;  %v347_v5 = vld [vmem:[%s8484_s22 + $0x140] sm:$0xf] }
  0x3f   : > { %840 = vperm.xlu0 %7972, %v709_v52   ;;  %4988 = vmatprep.subr.bf16.mxu1 %v8345_v3  ;;  %v726_v52 = vld [vmem:[%s9789_s7 + $0x138] sm:$0xff]  ;;  %v368_v7 = vpack.c.bf16 %v347_v5, %v347_v5  ;;  %v8044_v46 = vld [vmem:[%s9784_s2 + $0x120] sm:$0xff]  }
  0x40   : > { %5184 = vmatprep.subr.bf16.mxu0 %v8345_v3 }
  0x41   : > { %5185 = vmatpush1.bf16.msra.mxu0 %v7993_v19 }
  0x42   : > { %845 = vperm.xlu1 %7973, %v710_v61   ;;  %4989 = vmatpush1.bf16.msra.mxu1 %v7987_v13  ;;  %v356_v61 = vpack.c.bf16 %v324_v57, %v323_v56  ;;  %v1015_v13 = vld [vmem:[#allocation2 + $0x5] sm:$0xff]  ;;  %v8058_v56 = vld [vmem:[%s9784_s2 + $0x110] sm:$0xff]  }
  0x43   : > { %850 = vperm.xlu0 %7972, %v711_v60   ;;  %4990 = vmatprep.subr.bf16.mxu1 %v8345_v3  ;;  %v8001_v60 = vld [vmem:[%s9784_s2 + $0x60] sm:$0xff]  }
  0x44   : > { %7673 = vmatmul.mubr.bf16.gmra.mxu0 %v351_v63  ;;  %7717 = vmatmul.mubr.bf16.gmra.mxu1 %v362_v0  ;;  %v8002_v63 = vld [vmem:[%s9784_s2 + $0xf8] sm:$0xff]  }
  0x45   : > { %7676 = vmatprep.mubr.msk.bf16.mxu0 %vm8346_vm0, %v8344_v1  ;;  %7720 = vmatprep.mubr.msk.bf16.mxu1 %vm8346_vm0, %v8344_v1  ;;  %v8003_v0 = vld [vmem:[%s9784_s2 + $0x58] sm:$0xff]  }
  0x46   : > { %855 = vperm.xlu1 %7973, %v712_v4   ;;  %4991 = vmatpush1.bf16.msra.mxu1 %v7990_v18  ;;  %v326_v4 = vld [vmem:[%s8484_s22 + $0x98] sm:$0xff]  ;;  %v1263_v18 = vld [vmem:[#allocation2 + $0xe] sm:$0xff] }
  0x47   : > { %860 = vperm.xlu0 %7972, %v713_v2   ;;  %5186 = vmatprep.subr.bf16.mxu0 %v8345_v3  ;;  %v325_v2 = vld [vmem:[%s8484_s22 + $0x90] sm:$0xff]  ;;  %v7230_v20 = vpack.c.bf16 %v1263_v18, %v1263_v18 }
  0x48   : > { %4992 = vmatprep.subr.bf16.mxu1 %v8345_v3  ;;  %5187 = vmatpush1.bf16.msra.mxu0 %v7995_v26  ;;  %v357_v6 = vpack.c.bf16 %v326_v4, %v325_v2 }
  0x49   : > { %5188 = vmatprep.subr.bf16.mxu0 %v8345_v3  ;;  %1469 = vst [vmem:[#allocation3 + $0x28] sm:$0xf] %v7230_v20 }
  0x4a   : > { %865 = vperm.xlu1 %7973, %v714_v12   ;;  %4993 = vmatpush1.bf16.msra.mxu1 %v7992_v31  ;;  %v8006_v12 = vld [vmem:[%s9784_s2 + $0xe8] sm:$0xff]  }
  0x4b   : > { %870 = vperm.xlu0 %7972, %v715_v11   ;;  %4994 = vmatprep.subr.bf16.mxu1 %v8345_v3  ;;  %v328_v11 = vld [vmem:[%s8484_s22 + $0xa8] sm:$0xff] }
  0x4c   : > { %7677 = vmatmul.mubr.bf16.gmra.mxu0 %v352_v14  ;;  %7721 = vmatmul.mubr.bf16.gmra.mxu1 %v363_v15  ;;  %v1016_v14 = vld [vmem:[#allocation2 + $0xd] sm:$0xff]  ;;  %v7188_v15 = vpack.c.bf16 %v1015_v13, %v1015_v13  ;;  %v358_v21 = vpack.c.bf16 %v328_v11, %v327_v10 }
  0x4d   : > { %7680 = vmatprep.mubr.msk.bf16.mxu0 %vm8346_vm0, %v8344_v1  ;;  %7724 = vmatprep.mubr.msk.bf16.mxu1 %vm8346_vm0, %v8344_v1 }
  0x4e   : > { %875 = vperm.xlu1 %7973, %v716_v17   ;;  %5189 = vmatpush1.bf16.msra.mxu0 %v7997_v32  ;;  %v1262_v17 = vld [vmem:[#allocation2 + $0x6] sm:$0xff]  ;;  %1221 = vst [vmem:[#allocation3] sm:$0xf] %v7188_v15 }
  0x4f   : > { %880 = vperm.xlu0 %7972, %v717_v16   ;;  %5190 = vmatprep.subr.bf16.mxu0 %v8345_v3  ;;  %v7189_v16 = vpack.c.bf16 %v1016_v14, %v1016_v14  ;;  %v7229_v19 = vpack.c.bf16 %v1262_v17, %v1262_v17  ;;  %v8016_v32 = vld [vmem:[%s9784_s2 + $0xc8] sm:$0xff]  }
  0x50   : > { %4995 = vmatpush2.bf16.msra.mxu1 %v7994_v39 }
  0x51   : > { %4996 = vmatprep.subr.bf16.mxu1 %v8345_v3  ;;  %1222 = vst [vmem:[#allocation3 + $0x24] sm:$0xf] %v7189_v16  ;;  %1468 = vst [vmem:[#allocation3 + $0x4] sm:$0xf] %v7229_v19 }
  0x52   : > { %885 = vperm.xlu1 %7973, %v718_v25   ;;  %5191 = vmatpush1.bf16.msra.mxu0 %v7998_v45 }
  0x53   : > { %890 = vperm.xlu0 %7972, %v719_v24   ;;  %5192 = vmatprep.subr.bf16.mxu0 %v8345_v3  ;;  %v8013_v24 = vld [vmem:[%s9784_s2 + $0xd8] sm:$0xff]  }
  0x54   : > { %7681 = vmatmul.mubr.bf16.gmra.mxu0 %v353_v27  ;;  %7725 = vmatmul.mubr.bf16.gmra.mxu1 %v364_v28  ;;  %v1509_v27 = vld [vmem:[#allocation2 + $0x7] sm:$0xff]  ;;  %v8014_v28 = vld [vmem:[%s9784_s2 + $0xd0] sm:$0xff]  }
  0x55   : > { %7684 = vmatprep.mubr.msk.bf16.mxu0 %vm8346_vm0, %v8344_v1  ;;  %7728 = vmatprep.mubr.msk.bf16.mxu1 %vm8346_vm0, %v8344_v1 }
  0x56   : > { %895 = vperm.xlu1 %7973, %v720_v30   ;;  %4997 = vmatpush2.bf16.msra.mxu1 %v7996_v44  ;;  %v1510_v30 = vld [vmem:[#allocation2 + $0xf] sm:$0xff] }
  0x57   : > { %900 = vperm.xlu0 %7972, %v721_v29   ;;  %4998 = vmatprep.subr.bf16.mxu1 %v8345_v3  ;;  %v7270_v29 = vpack.c.bf16 %v1509_v27, %v1509_v27  ;;  %v7271_v31 = vpack.c.bf16 %v1510_v30, %v1510_v30 }
  0x58   : > { %5193 = vmatpush1.bf16.msra.mxu0 %v8000_v50  ;;  %v8010_v25 = vld [vmem:[#allocation3] ss:$36 sps:$4 sm:$0xff]  }
  0x59   : > { %5194 = vmatprep.subr.bf16.mxu0 %v8345_v3  ;;  %v8012_v26 = vld [vmem:[#allocation3 + $0x4] ss:$36 sps:$4 sm:$0xff]   ;;  %1715 = vst [vmem:[#allocation3 + $0x8] sm:$0xf] %v7270_v29  ;;  %1716 = vst [vmem:[#allocation3 + $0x2c] sm:$0xf] %v7271_v31 }
  0x5a   : > { %905 = vperm.xlu1 %7973, %v722_v38   ;;  %4999 = vmatpush2.bf16.msra.mxu1 %v7999_v55  ;;  %v8051_v50 = vld [vmem:[%s9784_s2 + $0x118] sm:$0xff]  }
  0x5b   : > { %910 = vperm.xlu0 %7972, %v723_v37   ;;  %5000 = vmatprep.subr.bf16.mxu1 %v8345_v3 }
  0x5c   : > { %7685 = vmatmul.mubr.bf16.gmra.mxu0 %v354_v40  ;;  %7729 = vmatmul.mubr.bf16.gmra.mxu1 %v365_v41  ;;  %v8031_v40 = vld [vmem:[%s9784_s2 + $0x128] sm:$0xff]  }
  0x5d   : > { %7688 = vmatprep.mubr.msk.bf16.mxu0 %vm8346_vm0, %v8344_v1  ;;  %7732 = vmatprep.mubr.msk.bf16.mxu1 %vm8346_vm0, %v8344_v1 }
  0x5e   : > { %915 = vperm.xlu1 %7973, %v724_v43   ;;  %5001 = vmatpush2.bf16.msra.mxu1 %v8001_v60 }
  0x5f   : > { %920 = vperm.xlu0 %7972, %v725_v42   ;;  %5002 = vmatprep.subr.bf16.mxu1 %v8345_v3 }
  0x60   : > { %5195 = vmatpush2.bf16.msra.mxu0 %v8002_v63 }
  0x61   : > { %5196 = vmatprep.subr.bf16.mxu0 %v8345_v3 }
  0x62   : > { %925 = vperm.xlu1 %7973, %v726_v52   ;;  %5003 = vmatpush2.bf16.msra.mxu1 %v8003_v0 }
  0x63   : > { %930 = vperm.xlu0 %7972, %v727_v51   ;;  %5004 = vmatprep.subr.bf16.mxu1 %v8345_v3 }
  0x64   : > { %7689 = vmatmul.mubr.bf16.gmra.mxu0 %v355_v53  ;;  %7733 = vmatmul.mubr.bf16.gmra.mxu1 %v366_v54 }
  0x65   : > { %7692 = vmatprep.mubr.msk.bf16.mxu0 %vm8346_vm0, %v8344_v1  ;;  %7736 = vmatprep.mubr.msk.bf16.mxu1 %vm8346_vm0, %v8344_v1 }
  0x66   : > { %5197 = vmatpush2.bf16.msra.mxu0 %v8004_v8  ;;  %5005 = vmatpush2.bf16.msra.mxu1 %v8005_v9  ;;  %v8078_v8 = vld [vmem:[%s9784_s2 + $0x100] sm:$0xff]  }
  0x67   : > { %5198 = vmatprep.subr.bf16.mxu0 %v8345_v3  ;;  %5006 = vmatprep.subr.bf16.mxu1 %v8345_v3 }
  0x6a   : > { %5199 = vmatpush2.bf16.msra.mxu0 %v8006_v12 }
  0x6b   : > { %5200 = vmatprep.subr.bf16.mxu0 %v8345_v3 }
  0x6c   : > { %7693 = vmatmul.mubr.bf16.gmra.mxu0 %v356_v61  ;;  %7737 = vmatmul.mubr.bf16.gmra.mxu1 %v367_v62  ;;  %v8869_v62 = vld [vmem:[%s9786_s4] ss:$0 sm:$0xff] }
  0x6d   : > { %7696 = vmatprep.mubr.msk.bf16.mxu0 %vm8346_vm0, %v8344_v1  ;;  %7740 = vmatprep.mubr.msk.bf16.mxu1 %vm8346_vm0, %v8344_v1 }
  0x6e   : > { %5201 = vmatpush2.bf16.msra.mxu0 %v8008_v22 }
  0x6f   : > { %5202 = vmatprep.subr.bf16.mxu0 %v8345_v3 }
  0x72   : > { %5203 = vmatpush2.bf16.msra.mxu0 %v8013_v24 }
  0x73   : > { %5204 = vmatprep.subr.bf16.mxu0 %v8345_v3 }
  0x74   : > { %7697 = vmatmul.mubr.bf16.gmra.mxu0 %v357_v6  ;;  %7741 = vmatmul.mubr.bf16.gmra.mxu1 %v368_v7 }
  0x75   : > { %7700 = vmatprep.mubr.msk.bf16.mxu0 %vm8346_vm0, %v8344_v1  ;;  %v8007_v1 = vld [vmem:[%s9784_s2 + $0x48] sm:$0xff]   ;;  %5010 = vmatprep.mubr.bf16.mxu1 %v8012_v26 }
  0x76   : > { %5007 = vmatpush2.bf16.msra.mxu1 %v8007_v1  ;;  %5205 = vmatpush2.bf16.msra.mxu0 %v8014_v28 }
  0x77   : > { %5008 = vmatprep.subr.bf16.mxu1 %v8345_v3  ;;  %5206 = vmatprep.subr.bf16.mxu0 %v8345_v3 }
  0x7a   : > { %5009 = vmatpush2.bf16.msra.mxu1 %v8009_v23  ;;  %5207 = vmatpush2.bf16.msra.mxu0 %v8016_v32  ;;  %v8085_v32 = vld [vmem:[%s9784_s2 + $0x178] sm:$0xff]  }
  0x7b   : > { %5378 = vmatprep.subr.bf16.mxu1 %v8345_v3  ;;  %5208 = vmatprep.subr.bf16.mxu0 %v8345_v3 }
  0x7c   : > { %7701 = vmatmul.mubr.bf16.gmra.mxu0 %v358_v21 }
  0x7d   : > { %5011 = vmatmul.mubr.bf16.vlgmr.msra.gmra.mxu1 %v8010_v25 }
  0x7e   : > { %5209 = vmatpush2.bf16.msra.mxu0 %v8017_v33  ;;  %5379 = vmatpush1.bf16.msra.mxu1 %v8015_v34 }
  0x7f   : > { %5578 = vmatprep.subr.bf16.mxu0 %v8345_v3  ;;  %5380 = vmatprep.subr.bf16.mxu1 %v8345_v3 }
  0x82   : > { %5381 = vmatpush1.bf16.msra.mxu1 %v8024_v35 }
  0x83   : > { %5382 = vmatprep.subr.bf16.mxu1 %v8345_v3 }
  0x86   : > { %5383 = vmatpush1.bf16.msra.mxu1 %v8031_v40 }
  0x87   : > { %5384 = vmatprep.subr.bf16.mxu1 %v8345_v3 }
  0x8a   : > { %5385 = vmatpush1.bf16.msra.mxu1 %v8044_v46 }
  0x8b   : > { %5386 = vmatprep.subr.bf16.mxu1 %v8345_v3 }
  0x8e   : > { %v731_v36 = vpop.permute.xlu0 %730  ;;  %v8806_v37 = vpop.permute.xlu1 %740  ;;  %5387 = vmatpush1.bf16.msra.mxu1 %v8051_v50 }
  0x8f   : > { %5388 = vmatprep.subr.bf16.mxu1 %v8345_v3 }
  0x92   : > { %v8808_v38 = vpop.permute.xlu0 %735  ;;  %v8810_v39 = vpop.permute.xlu1 %745  ;;  %5389 = vmatpush1.bf16.msra.mxu1 %v8058_v56 }
  0x93   : > { %5390 = vmatprep.subr.bf16.mxu1 %v8345_v3 }
  0x96   : > { %v8815_v41 = vpop.permute.xlu0 %750  ;;  %v8818_v42 = vpop.permute.xlu1 %755  ;;  %5391 = vmatpush1.bf16.msra.mxu1 %v8069_v59 }
  0x97   : > { %5392 = vmatprep.subr.bf16.mxu1 %v8345_v3 }
  0x9a   : > { %v8820_v43 = vpop.permute.xlu0 %760  ;;  %v8822_v44 = vpop.permute.xlu1 %765  ;;  %5393 = vmatpush1.bf16.msra.mxu1 %v8078_v8 }
  0x9b   : > { %5394 = vmatprep.subr.bf16.mxu1 %v8345_v3 }
  0x9e   : > { %v8824_v45 = vpop.permute.xlu0 %770  ;;  %v8830_v47 = vpop.permute.xlu1 %775  ;;  %5395 = vmatpush2.bf16.msra.mxu1 %v8085_v32 }
  0x9f   : > { %5396 = vmatprep.subr.bf16.mxu1 %v8345_v3 }
  0xa2   : > { %v8832_v48 = vpop.permute.xlu0 %780  ;;  %v8834_v49 = vpop.permute.xlu1 %785 }
  0xa6   : > { %v8839_v51 = vpop.permute.xlu0 %790  ;;  %v8842_v52 = vpop.permute.xlu1 %795 }
  0xaa   : > { %v8844_v53 = vpop.permute.xlu0 %800 }
  0xab   : > { %v8846_v54 = vpop.permute.xlu1 %805 }
  0xae   : > { %v8848_v55 = vpop.permute.xlu0 %810 }
  0xb1   : > { %v8854_v57 = vpop.permute.xlu1 %815 }
  0xb2   : > { %v8856_v58 = vpop.permute.xlu0 %820 }
  0xb5   : > { %v8861_v60 = vpop.permute.xlu1 %825 }
  0xb6   : > { %v8864_v61 = vpop.permute.xlu0 %830 }
  0xb9   : > { %v8871_v2 = vpop.permute.xlu1 %835 }
  0xba   : > { %v841_v9 = vpop.permute.xlu0 %840 }
  0xbd   : > { %v846_v19 = vpop.permute.xlu1 %845 }
  0xbe   : > { %v851_v33 = vpop.permute.xlu0 %850 }
  0xec   : > { %v474_v63 = vpop.f32.mrf.mxu0  ;;  %v562_v0 = vpop.f32.mrf.mxu1 }
  0xed   : > { %v475_v4 = vadd.f32 %v8869_v62, %v474_v63  ;;  %v563_v5 = vadd.f32 %v8869_v62, %v562_v0 }
  0xee   : > { %v7662_v6 = vpop.f32.mrf.mxu0  ;;  %v7706_v7 = vpop.f32.mrf.mxu1 }
  0xef   : > { %v640_v10 = vmax.f32 %v475_v4, 0.0  ;;  %v662_v11 = vmax.f32 %v563_v5, 0.0 }
  0xf0   : > { %v477_v12 = vpop.f32.mrf.mxu0  ;;  %v565_v13 = vpop.f32.mrf.mxu1 }
  0xf1   : > { %v933_v14 = vmul.f32 %v731_v36, %v640_v10  ;;  %v955_v15 = vmul.f32 %v841_v9, %v662_v11  ;;  %v478_v16 = vadd.f32 %v8869_v62, %v477_v12  ;;  %v566_v17 = vadd.f32 %v8869_v62, %v565_v13 }
  0xf2   : > { %v7663_v18 = vpop.f32.mrf.mxu0  ;;  %v7707_v1 = vpop.f32.mrf.mxu1 }
  0xf3   : > { %974 = vst [vmem:[#allocation2 + $0x18] sm:$0xff] %v933_v14  ;;  %v7352_v20 = vpack.c.bf16 %v933_v14, %v933_v14  ;;  %996 = vst [vmem:[#allocation2 + $0xc8] sm:$0xff] %v955_v15  ;;  %v7374_v21 = vpack.c.bf16 %v955_v15, %v955_v15  ;;  %v641_v22 = vmax.f32 %v478_v16, 0.0  ;;  %v663_v23 = vmax.f32 %v566_v17, 0.0  ;;  %v856_v16 = vpop.permute.xlu1 %855 }
  0xf4   : > { %v482_v24 = vpop.f32.mrf.mxu0  ;;  %v570_v25 = vpop.f32.mrf.mxu1 }
  0xf5   : > { %2209 = vst [vmem:[#allocation3 + $0x10] sm:$0xf] %v7352_v20  ;;  %2231 = vst [vmem:[#allocation3 + $0x328] sm:$0xf] %v7374_v21  ;;  %v934_v26 = vmul.f32 %v8808_v38, %v641_v22  ;;  %v956_v27 = vmul.f32 %v846_v19, %v663_v23  ;;  %v483_v28 = vadd.f32 %v8869_v62, %v482_v24 }
  0xf6   : > { %v571_v29 = vadd.f32 %v8869_v62, %v570_v25  ;;  %v7666_v30 = vpop.f32.mrf.mxu0  ;;  %v7710_v31 = vpop.f32.mrf.mxu1 }
  0xf7   : > { %975 = vst [vmem:[#allocation2 + $0x20] sm:$0xff] %v934_v26  ;;  %v7353_v34 = vpack.c.bf16 %v934_v26, %v934_v26  ;;  %997 = vst [vmem:[#allocation2 + $0xd0] sm:$0xff] %v956_v27  ;;  %v7375_v35 = vpack.c.bf16 %v956_v27, %v956_v27  ;;  %v642_v36 = vmax.f32 %v483_v28, 0.0 }
  0xf8   : > { %v664_v40 = vmax.f32 %v571_v29, 0.0  ;;  %v485_v46 = vpop.f32.mrf.mxu0  ;;  %v573_v38 = vpop.f32.mrf.mxu1 }
  0xf9   : > { %2210 = vst [vmem:[#allocation3 + $0x34] sm:$0xf] %v7353_v34  ;;  %2232 = vst [vmem:[#allocation3 + $0x34c] sm:$0xf] %v7375_v35  ;;  %v935_v50 = vmul.f32 %v8806_v37, %v642_v36  ;;  %v486_v59 = vadd.f32 %v8869_v62, %v485_v46  ;;  %v574_v63 = vadd.f32 %v8869_v62, %v573_v38 }
  0xfa   : > { %v957_v56 = vmul.f32 %v851_v33, %v664_v40  ;;  %v1017_v0 = vld [vmem:[#allocation2 + $0x15] sm:$0xff]  ;;  %v7667_v6 = vpop.f32.mrf.mxu0  ;;  %v7711_v7 = vpop.f32.mrf.mxu1 }
  0xfb   : > { %v1264_v4 = vld [vmem:[#allocation2 + $0x16] sm:$0xff]  ;;  %v7190_v8 = vpack.c.bf16 %v1017_v0, %v1017_v0  ;;  %976 = vst [vmem:[#allocation2 + $0x28] sm:$0xff] %v935_v50  ;;  %v7354_v11 = vpack.c.bf16 %v935_v50, %v935_v50  ;;  %v643_v37 = vmax.f32 %v486_v59, 0.0  ;;  %v665_v13 = vmax.f32 %v574_v63, 0.0 }
  0xfc   : > { %v1511_v5 = vld [vmem:[#allocation2 + $0x17] sm:$0xff]  ;;  %v7231_v9 = vpack.c.bf16 %v1264_v4, %v1264_v4  ;;  %998 = vst [vmem:[#allocation2 + $0xd8] sm:$0xff] %v957_v56  ;;  %v7376_v12 = vpack.c.bf16 %v957_v56, %v957_v56  ;;  %v490_v14 = vpop.f32.mrf.mxu0  ;;  %v578_v15 = vpop.f32.mrf.mxu1 }
  0xfd   : > { %v7272_v10 = vpack.c.bf16 %v1511_v5, %v1511_v5  ;;  %1223 = vst [vmem:[#allocation3 + $0x48] sm:$0xf] %v7190_v8  ;;  %2211 = vst [vmem:[#allocation3 + $0x58] sm:$0xf] %v7354_v11  ;;  %v491_v17 = vadd.f32 %v8869_v62, %v490_v14  ;;  %v936_v20 = vmul.f32 %v8810_v39, %v643_v37  ;;  %v8096_v4 = vld [vmem:[%s9784_s2 + $0x170] sm:$0xff]  }
  0xfe   : > { %1470 = vst [vmem:[#allocation3 + $0x4c] sm:$0xf] %v7231_v9  ;;  %v1018_v18 = vld [vmem:[#allocation2 + $0x1d] sm:$0xff]  ;;  %2233 = vst [vmem:[#allocation3 + $0x370] sm:$0xf] %v7376_v12  ;;  %v958_v21 = vmul.f32 %v856_v16, %v665_v13  ;;  %v8894_v22 = vadd.f32 %v8869_v62, %v578_v15  ;;  %v7670_v23 = vpop.f32.mrf.mxu0  ;;  %v7714_v24 = vpop.f32.mrf.mxu1  ;;  %v1040_v29 = vld [vmem:[#allocation2 + $0xcd] sm:$0xff]  ;;  %5397 = vmatpush2.bf16.msra.mxu1 %v8096_v4 }
  0xff   : > { %1717 = vst [vmem:[#allocation3 + $0x50] sm:$0xf] %v7272_v10  ;;  %1962 = vst [vmem:[#allocation3 + $0xc] sm:$0xf] %v7272_v10  ;;  %v1265_v1 = vld [vmem:[#allocation2 + $0x1e] sm:$0xff]  ;;  %v7191_v25 = vpack.c.bf16 %v1018_v18, %v1018_v18  ;;  %v1287_v30 = vld [vmem:[#allocation2 + $0xce] sm:$0xff]  ;;  %v7213_v33 = vpack.c.bf16 %v1040_v29, %v1040_v29  ;;  %v7355_v39 = vpack.c.bf16 %v936_v20, %v936_v20  ;;  %v861_v13 = vpop.permute.xlu0 %860  ;;  %5398 = vmatprep.subr.bf16.mxu1 %v8345_v3 }
 0x100   : > { %v1512_v19 = vld [vmem:[#allocation2 + $0x1f] sm:$0xff]  ;;  %v7232_v26 = vpack.c.bf16 %v1265_v1, %v1265_v1  ;;  %v644_v31 = vmax.f32 %v491_v17, 0.0  ;;  %v7254_v34 = vpack.c.bf16 %v1287_v30, %v1287_v30  ;;  %v1534_v35 = vld [vmem:[#allocation2 + $0xcf] sm:$0xff]  ;;  %977 = vst [vmem:[#allocation2 + $0x30] sm:$0xff] %v936_v20  ;;  %999 = vst [vmem:[#allocation2 + $0xe0] sm:$0xff] %v958_v21  ;;  %v493_v46 = vpop.f32.mrf.mxu0  ;;  %v581_v38 = vpop.f32.mrf.mxu1  ;;  %v7377_v0 = vpack.c.bf16 %v958_v21, %v958_v21 }
 0x101   : > { %v7273_v27 = vpack.c.bf16 %v1512_v19, %v1512_v19  ;;  %v2250_v28 = vld [vmem:[#allocation2 + $0x19] sm:$0xff]  ;;  %v2272_v36 = vld [vmem:[#allocation2 + $0xc9] sm:$0xff]  ;;  %1224 = vst [vmem:[#allocation3 + $0x6c] sm:$0xf] %v7191_v25  ;;  %v7295_v50 = vpack.c.bf16 %v1534_v35, %v1534_v35  ;;  %1246 = vst [vmem:[#allocation3 + $0x384] sm:$0xf] %v7213_v33  ;;  %v8902_v11 = vadd.f32 %v8869_v62, %v493_v46 }
 0x102   : > { %v7393_v32 = vpack.c.bf16 %v2250_v28, %v2250_v28  ;;  %v2764_v40 = vld [vmem:[#allocation2 + $0xca] sm:$0xff]  ;;  %1471 = vst [vmem:[#allocation3 + $0x70] sm:$0xf] %v7232_v26  ;;  %v7415_v56 = vpack.c.bf16 %v2272_v36, %v2272_v36  ;;  %1493 = vst [vmem:[#allocation3 + $0x388] sm:$0xf] %v7254_v34  ;;  %v937_v9 = vmul.f32 %v8815_v41, %v644_v31  ;;  %v666_v10 = vmax.f32 %v8894_v22, 0.0  ;;  %v7671_v12 = vpop.f32.mrf.mxu0  ;;  %v7715_v37 = vpop.f32.mrf.mxu1 }
 0x103   : > { %1718 = vst [vmem:[#allocation3 + $0x74] sm:$0xf] %v7273_v27  ;;  %1963 = vst [vmem:[#allocation3 + $0x30] sm:$0xf] %v7273_v27  ;;  %v7495_v59 = vpack.c.bf16 %v2764_v40, %v2764_v40  ;;  %v3011_v63 = vld [vmem:[#allocation2 + $0xcb] sm:$0xff]  ;;  %v2251_v17 = vld [vmem:[#allocation2 + $0x21] sm:$0xff]  ;;  %v8905_v41 = vadd.f32 %v8869_v62, %v581_v38 }
 0x104   : > { %2456 = vst [vmem:[#allocation3 + $0x14] sm:$0xf] %v7393_v32  ;;  %v7536_v5 = vpack.c.bf16 %v3011_v63, %v3011_v63  ;;  %v1019_v6 = vld [vmem:[#allocation2 + $0x25] sm:$0xff]  ;;  %2212 = vst [vmem:[#allocation3 + $0x7c] sm:$0xf] %v7355_v39  ;;  %v1041_v18 = vld [vmem:[#allocation2 + $0xd5] sm:$0xff]  ;;  %v7394_v19 = vpack.c.bf16 %v2251_v17, %v2251_v17  ;;  %v7356_v25 = vpack.c.bf16 %v937_v9, %v937_v9  ;;  %v498_v26 = vpop.f32.mrf.mxu0  ;;  %v586_v27 = vpop.f32.mrf.mxu1 }
 0x105   : > { %v1266_v7 = vld [vmem:[#allocation2 + $0x26] sm:$0xff]  ;;  %1740 = vst [vmem:[#allocation3 + $0x38c] sm:$0xf] %v7295_v50  ;;  %1985 = vst [vmem:[#allocation3 + $0x348] sm:$0xf] %v7295_v50  ;;  %v7192_v14 = vpack.c.bf16 %v1019_v6, %v1019_v6  ;;  %v1288_v1 = vld [vmem:[#allocation2 + $0xd6] sm:$0xff]  ;;  %v7214_v20 = vpack.c.bf16 %v1041_v18, %v1041_v18  ;;  %v959_v32 = vmul.f32 %v861_v13, %v666_v10  ;;  %v866_v39 = vpop.permute.xlu1 %865 }
 0x106   : > { %v1513_v8 = vld [vmem:[#allocation2 + $0x27] sm:$0xff]  ;;  %2478 = vst [vmem:[#allocation3 + $0x32c] sm:$0xf] %v7415_v56  ;;  %2723 = vst [vmem:[#allocation3 + $0x2e8] sm:$0xf] %v7415_v56  ;;  %v7233_v15 = vpack.c.bf16 %v1266_v7, %v1266_v7  ;;  %v7255_v21 = vpack.c.bf16 %v1288_v1, %v1288_v1  ;;  %v1535_v22 = vld [vmem:[#allocation2 + $0xd7] sm:$0xff]  ;;  %v7674_v36 = vpop.f32.mrf.mxu0  ;;  %v7718_v40 = vpop.f32.mrf.mxu1  ;;  %v8914_v63 = vadd.f32 %v8869_v62, %v586_v27 }
 0x107   : > { %2970 = vst [vmem:[#allocation3 + $0x2ec] sm:$0xf] %v7495_v59  ;;  %v7274_v16 = vpack.c.bf16 %v1513_v8, %v1513_v8  ;;  %2234 = vst [vmem:[#allocation3 + $0x394] sm:$0xf] %v7377_v0  ;;  %v2273_v23 = vld [vmem:[#allocation2 + $0xd1] sm:$0xff]  ;;  %v7296_v28 = vpack.c.bf16 %v1535_v22, %v1535_v22  ;;  %v645_v34 = vmax.f32 %v8902_v11, 0.0  ;;  %v7378_v56 = vpack.c.bf16 %v959_v32, %v959_v32 }
 0x108   : > { %3217 = vst [vmem:[#allocation3 + $0x2f0] sm:$0xf] %v7536_v5  ;;  %v2765_v24 = vld [vmem:[#allocation2 + $0xd2] sm:$0xff]  ;;  %978 = vst [vmem:[#allocation2 + $0x38] sm:$0xff] %v937_v9  ;;  %v7416_v29 = vpack.c.bf16 %v2273_v23, %v2273_v23  ;;  %v667_v35 = vmax.f32 %v8905_v41, 0.0  ;;  %v8911_v59 = vadd.f32 %v8869_v62, %v498_v26  ;;  %v2252_v6 = vld [vmem:[#allocation2 + $0x29] sm:$0xff]  ;;  %v8917_v10 = vpop.f32.mrf.mxu0  ;;  %v8919_v11 = vpop.f32.mrf.mxu1 }
 0x109   : > { %1225 = vst [vmem:[#allocation3 + $0x90] sm:$0xf] %v7192_v14  ;;  %1472 = vst [vmem:[#allocation3 + $0x94] sm:$0xf] %v7233_v15  ;;  %v7496_v30 = vpack.c.bf16 %v2765_v24, %v2765_v24  ;;  %v3012_v31 = vld [vmem:[#allocation2 + $0xd3] sm:$0xff]  ;;  %v2744_v7 = vld [vmem:[#allocation2 + $0x2a] sm:$0xff]  ;;  %v938_v9 = vmul.f32 %v8818_v42, %v645_v34  ;;  %v7395_v12 = vpack.c.bf16 %v2252_v6, %v2252_v6 }
 0x10a   : > { %1719 = vst [vmem:[#allocation3 + $0x98] sm:$0xf] %v7274_v16  ;;  %1964 = vst [vmem:[#allocation3 + $0x54] sm:$0xf] %v7274_v16  ;;  %v7537_v33 = vpack.c.bf16 %v3012_v31, %v3012_v31  ;;  %v1020_v46 = vld [vmem:[#allocation2 + $0x2d] sm:$0xff]  ;;  %v7475_v37 = vpack.c.bf16 %v2744_v7, %v2744_v7  ;;  %v1042_v14 = vld [vmem:[#allocation2 + $0xdd] sm:$0xff]  ;;  %v960_v17 = vmul.f32 %v866_v39, %v667_v35  ;;  %v7675_v22 = vpop.f32.mrf.mxu0  ;;  %v7719_v23 = vpop.f32.mrf.mxu1 }
 0x10b   : > { %2457 = vst [vmem:[#allocation3 + $0x38] sm:$0xf] %v7394_v19  ;;  %1247 = vst [vmem:[#allocation3 + $0x3a8] sm:$0xf] %v7214_v20  ;;  %v1267_v38 = vld [vmem:[#allocation2 + $0x2e] sm:$0xff]  ;;  %v7193_v0 = vpack.c.bf16 %v1020_v46, %v1020_v46  ;;  %v1289_v15 = vld [vmem:[#allocation2 + $0xde] sm:$0xff]  ;;  %v7215_v18 = vpack.c.bf16 %v1042_v14, %v1042_v14 }
 0x10c   : > { %1494 = vst [vmem:[#allocation3 + $0x3ac] sm:$0xf] %v7255_v21  ;;  %2213 = vst [vmem:[#allocation3 + $0xa0] sm:$0xf] %v7356_v25  ;;  %v1514_v50 = vld [vmem:[#allocation2 + $0x2f] sm:$0xff]  ;;  %v7234_v4 = vpack.c.bf16 %v1267_v38, %v1267_v38  ;;  %v1536_v16 = vld [vmem:[#allocation2 + $0xdf] sm:$0xff]  ;;  %v7256_v1 = vpack.c.bf16 %v1289_v15, %v1289_v15  ;;  %v7357_v21 = vpack.c.bf16 %v938_v9, %v938_v9  ;;  %v506_v39 = vpop.f32.mrf.mxu0  ;;  %v8922_v46 = vpop.f32.mrf.mxu1 }
 0x10d   : > { %1741 = vst [vmem:[#allocation3 + $0x3b0] sm:$0xf] %v7296_v28  ;;  %1986 = vst [vmem:[#allocation3 + $0x36c] sm:$0xf] %v7296_v28  ;;  %v7275_v5 = vpack.c.bf16 %v1514_v50, %v1514_v50  ;;  %v2991_v8 = vld [vmem:[#allocation2 + $0x2b] sm:$0xff]  ;;  %v7297_v41 = vpack.c.bf16 %v1536_v16, %v1536_v16  ;;  %v2274_v42 = vld [vmem:[#allocation2 + $0xd9] sm:$0xff]  ;;  %v871_v38 = vpop.permute.xlu0 %870 }
 0x10e   : > { %2479 = vst [vmem:[#allocation3 + $0x350] sm:$0xf] %v7416_v29  ;;  %2724 = vst [vmem:[#allocation3 + $0x30c] sm:$0xf] %v7416_v29  ;;  %v7516_v13 = vpack.c.bf16 %v2991_v8, %v2991_v8  ;;  %v2766_v19 = vld [vmem:[#allocation2 + $0xda] sm:$0xff]  ;;  %v7417_v24 = vpack.c.bf16 %v2274_v42, %v2274_v42  ;;  %v646_v40 = vmax.f32 %v8911_v59, 0.0 }
 0x10f   : > { %2971 = vst [vmem:[#allocation3 + $0x310] sm:$0xf] %v7496_v30  ;;  %1000 = vst [vmem:[#allocation2 + $0xe8] sm:$0xff] %v959_v32  ;;  %v3013_v20 = vld [vmem:[#allocation2 + $0xdb] sm:$0xff]  ;;  %v7497_v25 = vpack.c.bf16 %v2766_v19, %v2766_v19  ;;  %v7379_v30 = vpack.c.bf16 %v960_v17, %v960_v17  ;;  %v2253_v34 = vld [vmem:[#allocation2 + $0x31] sm:$0xff] }
 0x110   : > { %3218 = vst [vmem:[#allocation3 + $0x314] sm:$0xf] %v7537_v33  ;;  %2235 = vst [vmem:[#allocation3 + $0x3b8] sm:$0xf] %v7378_v56  ;;  %v7538_v26 = vpack.c.bf16 %v3013_v20, %v3013_v20  ;;  %v1021_v27 = vld [vmem:[#allocation2 + $0x35] sm:$0xff]  ;;  %v7396_v50 = vpack.c.bf16 %v2253_v34, %v2253_v34  ;;  %v939_v8 = vmul.f32 %v8820_v43, %v646_v40 }
 0x111   : > { %1226 = vst [vmem:[#allocation3 + $0xb4] sm:$0xf] %v7193_v0  ;;  %1473 = vst [vmem:[#allocation3 + $0xb8] sm:$0xf] %v7234_v4  ;;  %v1268_v28 = vld [vmem:[#allocation2 + $0x36] sm:$0xff]  ;;  %v7194_v31 = vpack.c.bf16 %v1021_v27, %v1021_v27  ;;  %v668_v4 = vmax.f32 %v8914_v63, 0.0  ;;  %v8935_v63 = vadd.f32 %v8869_v62, %v506_v39  ;;  %v8946_v40 = vadd.f32 %v8869_v62, %v8922_v46 }
 0x112   : > { %1720 = vst [vmem:[#allocation3 + $0xbc] sm:$0xf] %v7275_v5  ;;  %1965 = vst [vmem:[#allocation3 + $0x78] sm:$0xf] %v7275_v5  ;;  %v1515_v29 = vld [vmem:[#allocation2 + $0x37] sm:$0xff]  ;;  %v7235_v32 = vpack.c.bf16 %v1268_v28, %v1268_v28  ;;  %v7358_v42 = vpack.c.bf16 %v939_v8, %v939_v8 }
 0x113   : > { %979 = vst [vmem:[#allocation2 + $0x40] sm:$0xff] %v938_v9  ;;  %2458 = vst [vmem:[#allocation3 + $0x5c] sm:$0xf] %v7395_v12  ;;  %v7276_v33 = vpack.c.bf16 %v1515_v29, %v1515_v29  ;;  %v2745_v35 = vld [vmem:[#allocation2 + $0x32] sm:$0xff]  ;;  %v8018_v5 = vld [vmem:[#allocation3 + $0x4c] ss:$36 sps:$4 sm:$0xff]   ;;  %v8928_v9 = vadd.f32 %v8869_v62, %v8917_v10 }
 0x114   : > { %2703 = vst [vmem:[#allocation3 + $0x18] sm:$0xf] %v7395_v12  ;;  %2950 = vst [vmem:[#allocation3 + $0x1c] sm:$0xf] %v7475_v37  ;;  %v2992_v36 = vld [vmem:[#allocation2 + $0x33] sm:$0xff]  ;;  %v7476_v56 = vpack.c.bf16 %v2745_v35, %v2745_v35  ;;  %v8932_v12 = vadd.f32 %v8869_v62, %v8919_v11  ;;  %v7678_v37 = vpop.f32.mrf.mxu0  ;;  %5018 = vmatprep.mubr.bf16.mxu1 %v8018_v5 }
 0x115   : > { %3197 = vst [vmem:[#allocation3 + $0x20] sm:$0xf] %v7516_v13  ;;  %1001 = vst [vmem:[#allocation2 + $0xf0] sm:$0xff] %v960_v17  ;;  %v7517_v0 = vpack.c.bf16 %v2992_v36, %v2992_v36  ;;  %v7722_v13 = vpop.f32.mrf.mxu1  ;;  %v8020_v19 = vld [vmem:[#allocation3 + $0x8] ss:$36 sps:$4 sm:$0xff]   ;;  %v647_v28 = vmax.f32 %v8928_v9, 0.0 }
 0x116   : > { %1248 = vst [vmem:[#allocation3 + $0x3cc] sm:$0xf] %v7215_v18  ;;  %1495 = vst [vmem:[#allocation3 + $0x3d0] sm:$0xf] %v7256_v1  ;;  %v1043_v59 = vld [vmem:[#allocation2 + $0xe5] sm:$0xff]  ;;  %v961_v18 = vmul.f32 %v871_v38, %v668_v4  ;;  %v8937_v22 = vpop.f32.mrf.mxu0  ;;  %v669_v29 = vmax.f32 %v8932_v12, 0.0 }
 0x117   : > { %1742 = vst [vmem:[#allocation3 + $0x3d4] sm:$0xf] %v7297_v41  ;;  %1987 = vst [vmem:[#allocation3 + $0x390] sm:$0xf] %v7297_v41  ;;  %v1290_v6 = vld [vmem:[#allocation2 + $0xe6] sm:$0xff]  ;;  %v7216_v14 = vpack.c.bf16 %v1043_v59, %v1043_v59  ;;  %v8939_v23 = vpop.f32.mrf.mxu1 }
 0x118   : > { %2214 = vst [vmem:[#allocation3 + $0xc4] sm:$0xf] %v7357_v21  ;;  %2480 = vst [vmem:[#allocation3 + $0x374] sm:$0xf] %v7417_v24  ;;  %v1537_v7 = vld [vmem:[#allocation2 + $0xe7] sm:$0xff]  ;;  %v7257_v15 = vpack.c.bf16 %v1290_v6, %v1290_v6  ;;  %v7380_v27 = vpack.c.bf16 %v961_v18, %v961_v18  ;;  %v7679_v39 = vpop.f32.mrf.mxu0 }
 0x119   : > { %2725 = vst [vmem:[#allocation3 + $0x330] sm:$0xf] %v7417_v24  ;;  %2972 = vst [vmem:[#allocation3 + $0x334] sm:$0xf] %v7497_v25  ;;  %v7298_v43 = vpack.c.bf16 %v1537_v7, %v1537_v7  ;;  %v2275_v16 = vld [vmem:[#allocation2 + $0xe1] sm:$0xff]  ;;  %v7723_v38 = vpop.f32.mrf.mxu1  ;;  %v940_v7 = vmul.f32 %v8822_v44, %v647_v28 }
 0x11a   : > { %3219 = vst [vmem:[#allocation3 + $0x338] sm:$0xf] %v7538_v26  ;;  %2236 = vst [vmem:[#allocation3 + $0x3dc] sm:$0xf] %v7379_v30  ;;  %v2767_v17 = vld [vmem:[#allocation2 + $0xe2] sm:$0xff]  ;;  %v7418_v1 = vpack.c.bf16 %v2275_v16, %v2275_v16  ;;  %v648_v30 = vmax.f32 %v8935_v63, 0.0 }
 0x11b   : > { %1227 = vst [vmem:[#allocation3 + $0xd8] sm:$0xf] %v7194_v31  ;;  %1474 = vst [vmem:[#allocation3 + $0xdc] sm:$0xf] %v7235_v32  ;;  %v3014_v10 = vld [vmem:[#allocation2 + $0xe3] sm:$0xff]  ;;  %v7498_v11 = vpack.c.bf16 %v2767_v17, %v2767_v17  ;;  %v2254_v34 = vld [vmem:[#allocation2 + $0x39] sm:$0xff]  ;;  %v7359_v17 = vpack.c.bf16 %v940_v7, %v940_v7 }
 0x11c   : > { %1721 = vst [vmem:[#allocation3 + $0xe0] sm:$0xf] %v7276_v33  ;;  %1966 = vst [vmem:[#allocation3 + $0x9c] sm:$0xf] %v7276_v33  ;;  %v7539_v41 = vpack.c.bf16 %v3014_v10, %v3014_v10  ;;  %v8022_v20 = vld [vmem:[#allocation3 + $0xc] ss:$36 sps:$4 sm:$0xff]  }
 0x11d   : > { %2459 = vst [vmem:[#allocation3 + $0x80] sm:$0xf] %v7396_v50  ;;  %2704 = vst [vmem:[#allocation3 + $0x3c] sm:$0xf] %v7396_v50  ;;  %v8023_v21 = vld [vmem:[#allocation3 + $0x48] ss:$36 sps:$4 sm:$0xff]   ;;  %5210 = vmatprep.mubr.bf16.mxu0 %v8022_v20  ;;  %v876_v50 = vpop.permute.xlu1 %875 }
 0x11e   : > { %2951 = vst [vmem:[#allocation3 + $0x40] sm:$0xf] %v7476_v56  ;;  %3198 = vst [vmem:[#allocation3 + $0x44] sm:$0xf] %v7517_v0  ;;  %v1022_v24 = vld [vmem:[#allocation2 + $0x3d] sm:$0xff]  ;;  %v7397_v56 = vpack.c.bf16 %v2254_v34, %v2254_v34  ;;  %v1044_v5 = vld [vmem:[#allocation2 + $0xed] sm:$0xff]  ;;  %5019 = vmatmul.mubr.bf16.gmra.mxu1 %v8023_v21  ;;  %v962_v13 = vmul.f32 %v876_v50, %v669_v29  ;;  %5211 = vmatmul.mubr.bf16.vlgmr.msra.gmra.mxu0 %v8020_v19  ;;  %v881_v21 = vpop.permute.xlu0 %880 }
 0x11f   : > { %980 = vst [vmem:[#allocation2 + $0x48] sm:$0xff] %v939_v8  ;;  %1249 = vst [vmem:[#allocation3 + $0x3f0] sm:$0xf] %v7216_v14  ;;  %v1269_v25 = vld [vmem:[#allocation2 + $0x3e] sm:$0xff]  ;;  %v7195_v31 = vpack.c.bf16 %v1022_v24, %v1022_v24  ;;  %v1291_v59 = vld [vmem:[#allocation2 + $0xee] sm:$0xff]  ;;  %v7217_v8 = vpack.c.bf16 %v1044_v5, %v1044_v5  ;;  %v514_v14 = vpop.f32.mrf.mxu0 }
 0x120   : > { %1496 = vst [vmem:[#allocation3 + $0x3f4] sm:$0xf] %v7257_v15  ;;  %1743 = vst [vmem:[#allocation3 + $0x3f8] sm:$0xf] %v7298_v43  ;;  %v1516_v26 = vld [vmem:[#allocation2 + $0x3f] sm:$0xff]  ;;  %v7236_v32 = vpack.c.bf16 %v1269_v25, %v1269_v25  ;;  %v1538_v6 = vld [vmem:[#allocation2 + $0xef] sm:$0xff]  ;;  %v7258_v46 = vpack.c.bf16 %v1291_v59, %v1291_v59  ;;  %v602_v15 = vpop.f32.mrf.mxu1 }
 0x121   : > { %1988 = vst [vmem:[#allocation3 + $0x3b4] sm:$0xf] %v7298_v43  ;;  %1002 = vst [vmem:[#allocation2 + $0xf8] sm:$0xff] %v961_v18  ;;  %v7277_v33 = vpack.c.bf16 %v1516_v26, %v1516_v26  ;;  %v2746_v35 = vld [vmem:[#allocation2 + $0x3a] sm:$0xff]  ;;  %v7299_v9 = vpack.c.bf16 %v1538_v6, %v1538_v6  ;;  %v2276_v12 = vld [vmem:[#allocation2 + $0xe9] sm:$0xff]  ;;  %v7381_v18 = vpack.c.bf16 %v962_v13, %v962_v13  ;;  %v7682_v19 = vpop.f32.mrf.mxu0 }
 0x122   : > { %2481 = vst [vmem:[#allocation3 + $0x398] sm:$0xf] %v7418_v1  ;;  %2726 = vst [vmem:[#allocation3 + $0x354] sm:$0xf] %v7418_v1  ;;  %v2993_v36 = vld [vmem:[#allocation2 + $0x3b] sm:$0xff]  ;;  %v7477_v0 = vpack.c.bf16 %v2746_v35, %v2746_v35  ;;  %v2768_v63 = vld [vmem:[#allocation2 + $0xea] sm:$0xff]  ;;  %v7419_v44 = vpack.c.bf16 %v2276_v12, %v2276_v12  ;;  %v941_v1 = vmul.f32 %v8824_v45, %v648_v30  ;;  %v7726_v20 = vpop.f32.mrf.mxu1 }
 0x123   : > { %2973 = vst [vmem:[#allocation3 + $0x358] sm:$0xf] %v7498_v11  ;;  %3220 = vst [vmem:[#allocation3 + $0x35c] sm:$0xf] %v7539_v41  ;;  %v7518_v4 = vpack.c.bf16 %v2993_v36, %v2993_v36  ;;  %v3015_v37 = vld [vmem:[#allocation2 + $0xeb] sm:$0xff]  ;;  %v7499_v43 = vpack.c.bf16 %v2768_v63, %v2768_v63  ;;  %v670_v11 = vmax.f32 %v8946_v40, 0.0  ;;  %v8953_v41 = vadd.f32 %v8869_v62, %v8937_v22  ;;  %v8965_v35 = vpop.f32.mrf.mxu0 }
 0x124   : > { %2215 = vst [vmem:[#allocation3 + $0xe8] sm:$0xf] %v7358_v42  ;;  %2237 = vst [vmem:[#allocation3 + $0x400] sm:$0xf] %v7380_v27  ;;  %v7540_v16 = vpack.c.bf16 %v3015_v37, %v3015_v37  ;;  %v8025_v10 = vld [vmem:[#allocation3 + $0x94] ss:$36 sps:$4 sm:$0xff]   ;;  %v8957_v45 = vadd.f32 %v8869_v62, %v8939_v23  ;;  %v8960_v22 = vadd.f32 %v8869_v62, %v514_v14  ;;  %v8967_v23 = vpop.f32.mrf.mxu1 }
 0x125   : > { %1228 = vst [vmem:[#allocation3 + $0xfc] sm:$0xf] %v7195_v31  ;;  %1475 = vst [vmem:[#allocation3 + $0x100] sm:$0xf] %v7236_v32  ;;  %v8027_v42 = vld [vmem:[#allocation3 + $0x54] ss:$36 sps:$4 sm:$0xff]   ;;  %5026 = vmatprep.mubr.bf16.mxu1 %v8025_v10  ;;  %v8963_v27 = vadd.f32 %v8869_v62, %v602_v15  ;;  %v7360_v34 = vpack.c.bf16 %v941_v1, %v941_v1 }
 0x126   : > { %1722 = vst [vmem:[#allocation3 + $0x104] sm:$0xf] %v7277_v33  ;;  %1967 = vst [vmem:[#allocation3 + $0xc0] sm:$0xf] %v7277_v33  ;;  %v1023_v24 = vld [vmem:[#allocation2 + $0x45] sm:$0xff]  ;;  %5218 = vmatprep.mubr.bf16.mxu0 %v8027_v42  ;;  %v671_v10 = vmax.f32 %v8957_v45, 0.0 }
 0x127   : > { %2460 = vst [vmem:[#allocation3 + $0xa4] sm:$0xf] %v7397_v56  ;;  %2705 = vst [vmem:[#allocation3 + $0x60] sm:$0xf] %v7397_v56  ;;  %v1270_v25 = vld [vmem:[#allocation2 + $0x46] sm:$0xff]  ;;  %v7196_v28 = vpack.c.bf16 %v1023_v24, %v1023_v24  ;;  %v963_v56 = vmul.f32 %v881_v21, %v670_v11 }
 0x128   : > { %2952 = vst [vmem:[#allocation3 + $0x64] sm:$0xf] %v7477_v0  ;;  %3199 = vst [vmem:[#allocation3 + $0x68] sm:$0xf] %v7518_v4  ;;  %v1517_v26 = vld [vmem:[#allocation2 + $0x47] sm:$0xff]  ;;  %v7237_v29 = vpack.c.bf16 %v1270_v25, %v1270_v25  ;;  %v1045_v38 = vld [vmem:[#allocation2 + $0xf5] sm:$0xff] }
 0x129   : > { %981 = vst [vmem:[#allocation2 + $0x50] sm:$0xff] %v940_v7  ;;  %1250 = vst [vmem:[#allocation3 + $0x414] sm:$0xf] %v7217_v8  ;;  %v7278_v30 = vpack.c.bf16 %v1517_v26, %v1517_v26  ;;  %v2255_v31 = vld [vmem:[#allocation2 + $0x41] sm:$0xff]  ;;  %v1292_v62 = vld [vmem:[#allocation2 + $0xf6] sm:$0xff]  ;;  %v7218_v0 = vpack.c.bf16 %v1045_v38, %v1045_v38  ;;  %v649_v8 = vmax.f32 %v8953_v41, 0.0  ;;  %v886_v41 = vpop.permute.xlu1 %885 }
 0x12a   : > { %1497 = vst [vmem:[#allocation3 + $0x418] sm:$0xf] %v7258_v46  ;;  %1744 = vst [vmem:[#allocation3 + $0x41c] sm:$0xf] %v7299_v9  ;;  %v2747_v32 = vld [vmem:[#allocation2 + $0x42] sm:$0xff]  ;;  %v7398_v36 = vpack.c.bf16 %v2255_v31, %v2255_v31  ;;  %v1539_v50 = vld [vmem:[#allocation2 + $0xf7] sm:$0xff]  ;;  %v7259_v4 = vpack.c.bf16 %v1292_v62, %v1292_v62  ;;  %v7683_v46 = vpop.f32.mrf.mxu0 }
 0x12b   : > { %1989 = vst [vmem:[#allocation3 + $0x3d8] sm:$0xf] %v7299_v9  ;;  %1003 = vst [vmem:[#allocation2 + $0x100] sm:$0xff] %v962_v13  ;;  %v2994_v33 = vld [vmem:[#allocation2 + $0x43] sm:$0xff]  ;;  %v7478_v40 = vpack.c.bf16 %v2747_v32, %v2747_v32  ;;  %v7300_v5 = vpack.c.bf16 %v1539_v50, %v1539_v50  ;;  %v2277_v59 = vld [vmem:[#allocation2 + $0xf1] sm:$0xff]  ;;  %v7727_v9 = vpop.f32.mrf.mxu1  ;;  %v7382_v13 = vpack.c.bf16 %v963_v56, %v963_v56 }
 0x12c   : > { %2482 = vst [vmem:[#allocation3 + $0x3bc] sm:$0xf] %v7419_v44  ;;  %2727 = vst [vmem:[#allocation3 + $0x378] sm:$0xf] %v7419_v44  ;;  %v7519_v39 = vpack.c.bf16 %v2994_v33, %v2994_v33  ;;  %v2769_v6 = vld [vmem:[#allocation2 + $0xf2] sm:$0xff]  ;;  %v7420_v12 = vpack.c.bf16 %v2277_v59, %v2277_v59  ;;  %v964_v50 = vmul.f32 %v886_v41, %v671_v10  ;;  %v891_v9 = vpop.permute.xlu0 %890 }
 0x12d   : > { %2974 = vst [vmem:[#allocation3 + $0x37c] sm:$0xf] %v7499_v43  ;;  %3221 = vst [vmem:[#allocation3 + $0x380] sm:$0xf] %v7540_v16  ;;  %v3016_v7 = vld [vmem:[#allocation2 + $0xf3] sm:$0xff]  ;;  %v7500_v63 = vpack.c.bf16 %v2769_v6, %v2769_v6  ;;  %v8975_v11 = vpop.f32.mrf.mxu1 }
 0x12e   : > { %2216 = vst [vmem:[#allocation3 + $0x10c] sm:$0xf] %v7359_v17  ;;  %2238 = vst [vmem:[#allocation3 + $0x424] sm:$0xf] %v7381_v18  ;;  %v7541_v37 = vpack.c.bf16 %v3016_v7, %v3016_v7  ;;  %v8029_v14 = vld [vmem:[#allocation3 + $0x90] ss:$36 sps:$4 sm:$0xff]   ;;  %v942_v17 = vmul.f32 %v8830_v47, %v649_v8 }
 0x12f   : > { %982 = vst [vmem:[#allocation2 + $0x58] sm:$0xff] %v941_v1  ;;  %1229 = vst [vmem:[#allocation3 + $0x120] sm:$0xf] %v7196_v28  ;;  %v8030_v15 = vld [vmem:[#allocation3 + $0x50] ss:$36 sps:$4 sm:$0xff]   ;;  %v650_v18 = vmax.f32 %v8960_v22, 0.0  ;;  %v8973_v1 = vpop.f32.mrf.mxu0  ;;  %5027 = vmatmul.mubr.bf16.gmra.mxu1 %v8029_v14  ;;  %v7730_v33 = vpop.f32.mrf.mxu1 }
 0x130   : > { %1476 = vst [vmem:[#allocation3 + $0x124] sm:$0xf] %v7237_v29  ;;  %1723 = vst [vmem:[#allocation3 + $0x128] sm:$0xf] %v7278_v30  ;;  %v1024_v44 = vld [vmem:[#allocation2 + $0x4d] sm:$0xff]  ;;  %v672_v47 = vmax.f32 %v8963_v27, 0.0  ;;  %5219 = vmatmul.mubr.bf16.gmra.mxu0 %v8030_v15  ;;  %v7361_v31 = vpack.c.bf16 %v942_v17, %v942_v17 }
 0x131   : > { %1968 = vst [vmem:[#allocation3 + $0xe4] sm:$0xf] %v7278_v30  ;;  %2217 = vst [vmem:[#allocation3 + $0x130] sm:$0xf] %v7360_v34  ;;  %v1271_v43 = vld [vmem:[#allocation2 + $0x4e] sm:$0xff]  ;;  %v7197_v42 = vpack.c.bf16 %v1024_v44, %v1024_v44  ;;  %v7686_v32 = vpop.f32.mrf.mxu0  ;;  %v943_v7 = vmul.f32 %v8832_v48, %v650_v18  ;;  %v8981_v46 = vpop.f32.mrf.mxu1  ;;  %v7383_v44 = vpack.c.bf16 %v964_v50, %v964_v50 }
 0x132   : > { %2461 = vst [vmem:[#allocation3 + $0xc8] sm:$0xf] %v7398_v36  ;;  %2706 = vst [vmem:[#allocation3 + $0x84] sm:$0xf] %v7398_v36  ;;  %v1518_v16 = vld [vmem:[#allocation2 + $0x4f] sm:$0xff]  ;;  %v7238_v19 = vpack.c.bf16 %v1271_v43, %v1271_v43  ;;  %v1046_v28 = vld [vmem:[#allocation2 + $0xfd] sm:$0xff] }
 0x133   : > { %2953 = vst [vmem:[#allocation3 + $0x88] sm:$0xf] %v7478_v40  ;;  %3200 = vst [vmem:[#allocation3 + $0x8c] sm:$0xf] %v7519_v39  ;;  %v7279_v20 = vpack.c.bf16 %v1518_v16, %v1518_v16  ;;  %v2256_v21 = vld [vmem:[#allocation2 + $0x49] sm:$0xff]  ;;  %v1293_v29 = vld [vmem:[#allocation2 + $0xfe] sm:$0xff]  ;;  %v7219_v34 = vpack.c.bf16 %v1046_v28, %v1046_v28  ;;  %v8979_v8 = vpop.f32.mrf.mxu0  ;;  %v7362_v41 = vpack.c.bf16 %v943_v7, %v943_v7 }
 0x134   : > { %1004 = vst [vmem:[#allocation2 + $0x108] sm:$0xff] %v963_v56  ;;  %1251 = vst [vmem:[#allocation3 + $0x438] sm:$0xf] %v7218_v0  ;;  %v2748_v24 = vld [vmem:[#allocation2 + $0x4a] sm:$0xff]  ;;  %v7399_v26 = vpack.c.bf16 %v2256_v21, %v2256_v21  ;;  %v1540_v30 = vld [vmem:[#allocation2 + $0xff] sm:$0xff]  ;;  %v7260_v36 = vpack.c.bf16 %v1293_v29, %v1293_v29 }
 0x135   : > { %1498 = vst [vmem:[#allocation3 + $0x43c] sm:$0xf] %v7259_v4  ;;  %1745 = vst [vmem:[#allocation3 + $0x440] sm:$0xf] %v7300_v5  ;;  %v2995_v25 = vld [vmem:[#allocation2 + $0x4b] sm:$0xff]  ;;  %v7479_v45 = vpack.c.bf16 %v2748_v24, %v2748_v24  ;;  %v7301_v40 = vpack.c.bf16 %v1540_v30, %v1540_v30  ;;  %v2278_v39 = vld [vmem:[#allocation2 + $0xf9] sm:$0xff] }
 0x136   : > { %1990 = vst [vmem:[#allocation3 + $0x3fc] sm:$0xf] %v7300_v5  ;;  %2483 = vst [vmem:[#allocation3 + $0x3e0] sm:$0xf] %v7420_v12  ;;  %v7520_v22 = vpack.c.bf16 %v2995_v25, %v2995_v25  ;;  %v2770_v38 = vld [vmem:[#allocation2 + $0xfa] sm:$0xff]  ;;  %v7421_v56 = vpack.c.bf16 %v2278_v39, %v2278_v39  ;;  %v2749_v14 = vld [vmem:[#allocation2 + $0x52] sm:$0xff] }
 0x137   : > { %2728 = vst [vmem:[#allocation3 + $0x39c] sm:$0xf] %v7420_v12  ;;  %2975 = vst [vmem:[#allocation3 + $0x3a0] sm:$0xf] %v7500_v63  ;;  %v3017_v62 = vld [vmem:[#allocation2 + $0xfb] sm:$0xff]  ;;  %v7501_v0 = vpack.c.bf16 %v2770_v38, %v2770_v38  ;;  %v2996_v15 = vld [vmem:[#allocation2 + $0x53] sm:$0xff]  ;;  %v7480_v43 = vpack.c.bf16 %v2749_v14, %v2749_v14 }
 0x138   : > { %3222 = vst [vmem:[#allocation3 + $0x3a4] sm:$0xf] %v7541_v37  ;;  %2239 = vst [vmem:[#allocation3 + $0x448] sm:$0xf] %v7382_v13  ;;  %v7542_v4 = vpack.c.bf16 %v3017_v62, %v3017_v62  ;;  %v1025_v5 = vld [vmem:[#allocation2 + $0x55] sm:$0xff]  ;;  %v7521_v16 = vpack.c.bf16 %v2996_v15, %v2996_v15 }
 0x139   : > { %983 = vst [vmem:[#allocation2 + $0x60] sm:$0xff] %v942_v17  ;;  %1230 = vst [vmem:[#allocation3 + $0x144] sm:$0xf] %v7197_v42  ;;  %v1272_v59 = vld [vmem:[#allocation2 + $0x56] sm:$0xff]  ;;  %v7198_v12 = vpack.c.bf16 %v1025_v5, %v1025_v5  ;;  %v7687_v42 = vpop.f32.mrf.mxu0 }
 0x13a   : > { %1477 = vst [vmem:[#allocation3 + $0x148] sm:$0xf] %v7238_v19  ;;  %1724 = vst [vmem:[#allocation3 + $0x14c] sm:$0xf] %v7279_v20  ;;  %v1519_v6 = vld [vmem:[#allocation2 + $0x57] sm:$0xff]  ;;  %v7239_v63 = vpack.c.bf16 %v1272_v59, %v1272_v59  ;;  %v7731_v19 = vpop.f32.mrf.mxu1 }
 0x13b   : > { %1969 = vst [vmem:[#allocation3 + $0x108] sm:$0xf] %v7279_v20  ;;  %2462 = vst [vmem:[#allocation3 + $0xec] sm:$0xf] %v7399_v26  ;;  %v7280_v37 = vpack.c.bf16 %v1519_v6, %v1519_v6  ;;  %v2257_v13 = vld [vmem:[#allocation2 + $0x51] sm:$0xff]  ;;  %v1047_v17 = vld [vmem:[#allocation2 + $0x105] sm:$0xff] }
 0x13c   : > { %2707 = vst [vmem:[#allocation3 + $0xa8] sm:$0xf] %v7399_v26  ;;  %2954 = vst [vmem:[#allocation3 + $0xac] sm:$0xf] %v7479_v45  ;;  %v7400_v48 = vpack.c.bf16 %v2257_v13, %v2257_v13  ;;  %v1294_v10 = vld [vmem:[#allocation2 + $0x106] sm:$0xff]  ;;  %v7220_v20 = vpack.c.bf16 %v1047_v17, %v1047_v17  ;;  %v8994_v27 = vpop.f32.mrf.mxu1 }
 0x13d   : > { %3201 = vst [vmem:[#allocation3 + $0xb0] sm:$0xf] %v7520_v22  ;;  %2218 = vst [vmem:[#allocation3 + $0x154] sm:$0xf] %v7361_v31  ;;  %v1541_v18 = vld [vmem:[#allocation2 + $0x107] sm:$0xff]  ;;  %v7261_v21 = vpack.c.bf16 %v1294_v10, %v1294_v10  ;;  %v965_v22 = vmul.f32 %v891_v9, %v672_v47 }
 0x13e   : > { %1252 = vst [vmem:[#allocation3 + $0x45c] sm:$0xf] %v7219_v34  ;;  %1499 = vst [vmem:[#allocation3 + $0x460] sm:$0xf] %v7260_v36  ;;  %v7302_v24 = vpack.c.bf16 %v1541_v18, %v1541_v18  ;;  %v2279_v25 = vld [vmem:[#allocation2 + $0x101] sm:$0xff]  ;;  %v8992_v34 = vpop.f32.mrf.mxu0 }
 0x13f   : > { %1746 = vst [vmem:[#allocation3 + $0x464] sm:$0xf] %v7301_v40  ;;  %1991 = vst [vmem:[#allocation3 + $0x420] sm:$0xf] %v7301_v40  ;;  %v2771_v26 = vld [vmem:[#allocation2 + $0x102] sm:$0xff]  ;;  %v7422_v28 = vpack.c.bf16 %v2279_v25, %v2279_v25  ;;  %v7384_v39 = vpack.c.bf16 %v965_v22, %v965_v22 }
 0x140   : > { %1005 = vst [vmem:[#allocation2 + $0x110] sm:$0xff] %v964_v50  ;;  %2484 = vst [vmem:[#allocation3 + $0x404] sm:$0xf] %v7421_v56  ;;  %v3018_v45 = vld [vmem:[#allocation2 + $0x103] sm:$0xff]  ;;  %v7502_v29 = vpack.c.bf16 %v2771_v26, %v2771_v26  ;;  %v8988_v31 = vld [vmem:[%s9786_s4] ss:$0 sm:$0xff] }
 0x141   : > { %2729 = vst [vmem:[#allocation3 + $0x3c0] sm:$0xf] %v7421_v56  ;;  %2976 = vst [vmem:[#allocation3 + $0x3c4] sm:$0xf] %v7501_v0  ;;  %v7543_v30 = vpack.c.bf16 %v3018_v45, %v3018_v45  ;;  %v518_v32 = vadd.f32 %v8988_v31, %v8965_v35  ;;  %v8032_v33 = vld [vmem:[#allocation3 + $0xdc] ss:$36 sps:$4 sm:$0xff]   ;;  %v606_v38 = vadd.f32 %v8988_v31, %v8967_v23  ;;  %v7690_v23 = vpop.f32.mrf.mxu0 }
 0x142   : > { %3223 = vst [vmem:[#allocation3 + $0x3c8] sm:$0xf] %v7542_v4  ;;  %984 = vst [vmem:[#allocation2 + $0x68] sm:$0xff] %v943_v7  ;;  %v1026_v47 = vld [vmem:[#allocation2 + $0x5d] sm:$0xff]  ;;  %v9000_v35 = vadd.f32 %v8988_v31, %v8973_v1  ;;  %v9004_v62 = vadd.f32 %v8988_v31, %v8975_v11  ;;  %5034 = vmatprep.mubr.bf16.mxu1 %v8032_v33  ;;  %v7734_v7 = vpop.f32.mrf.mxu1  ;;  %v896_v1 = vpop.permute.xlu1 %895  ;;  %v8036_v13 = vld [vmem:[#allocation3 + $0xd8] ss:$36 sps:$4 sm:$0xff]   ;;  %v9011_v17 = vadd.f32 %v8988_v31, %v8979_v8 }
 0x143   : > { %1231 = vst [vmem:[#allocation3 + $0x168] sm:$0xf] %v7198_v12  ;;  %1478 = vst [vmem:[#allocation3 + $0x16c] sm:$0xf] %v7239_v63  ;;  %v1273_v36 = vld [vmem:[#allocation2 + $0x5e] sm:$0xff]  ;;  %v7199_v50 = vpack.c.bf16 %v1026_v47, %v1026_v47  ;;  %v651_v6 = vmax.f32 %v518_v32, 0.0  ;;  %v9013_v10 = vpop.f32.mrf.mxu0  ;;  %5035 = vmatmul.mubr.bf16.gmra.mxu1 %v8036_v13  ;;  %v901_v33 = vpop.permute.xlu0 %900 }
 0x144   : > { %1725 = vst [vmem:[#allocation3 + $0x170] sm:$0xf] %v7280_v37  ;;  %1970 = vst [vmem:[#allocation3 + $0x12c] sm:$0xf] %v7280_v37  ;;  %v1520_v40 = vld [vmem:[#allocation2 + $0x5f] sm:$0xff]  ;;  %v7240_v56 = vpack.c.bf16 %v1273_v36, %v1273_v36  ;;  %v673_v11 = vmax.f32 %v606_v38, 0.0  ;;  %v9015_v18 = vpop.f32.mrf.mxu1 }
 0x145   : > { %2240 = vst [vmem:[#allocation3 + $0x46c] sm:$0xf] %v7383_v44  ;;  %2463 = vst [vmem:[#allocation3 + $0x110] sm:$0xf] %v7400_v48  ;;  %v7281_v0 = vpack.c.bf16 %v1520_v40, %v1520_v40  ;;  %v2258_v4 = vld [vmem:[#allocation2 + $0x59] sm:$0xff] }
 0x146   : > { %2708 = vst [vmem:[#allocation3 + $0xcc] sm:$0xf] %v7400_v48  ;;  %2955 = vst [vmem:[#allocation3 + $0xd0] sm:$0xf] %v7480_v43  ;;  %v2750_v5 = vld [vmem:[#allocation2 + $0x5a] sm:$0xff]  ;;  %v7401_v9 = vpack.c.bf16 %v2258_v4, %v2258_v4  ;;  %v944_v48 = vmul.f32 %v8834_v49, %v651_v6  ;;  %v652_v43 = vmax.f32 %v9000_v35, 0.0  ;;  %v7735_v32 = vpop.f32.mrf.mxu1 }
 0x147   : > { %3202 = vst [vmem:[#allocation3 + $0xd4] sm:$0xf] %v7521_v16  ;;  %2219 = vst [vmem:[#allocation3 + $0x178] sm:$0xf] %v7362_v41  ;;  %v2997_v59 = vld [vmem:[#allocation2 + $0x5b] sm:$0xff]  ;;  %v7481_v12 = vpack.c.bf16 %v2750_v5, %v2750_v5  ;;  %v1048_v14 = vld [vmem:[#allocation2 + $0x10d] sm:$0xff] }
 0x148   : > { %1253 = vst [vmem:[#allocation3 + $0x480] sm:$0xf] %v7220_v20  ;;  %1500 = vst [vmem:[#allocation3 + $0x484] sm:$0xf] %v7261_v21  ;;  %v7522_v63 = vpack.c.bf16 %v2997_v59, %v2997_v59  ;;  %v8034_v37 = vld [vmem:[#allocation3 + $0x9c] ss:$36 sps:$4 sm:$0xff]   ;;  %v7221_v41 = vpack.c.bf16 %v1048_v14, %v1048_v14  ;;  %v945_v23 = vmul.f32 %v8839_v51, %v652_v43 }
 0x149   : > { %1747 = vst [vmem:[#allocation3 + $0x488] sm:$0xf] %v7302_v24  ;;  %1992 = vst [vmem:[#allocation3 + $0x444] sm:$0xf] %v7302_v24  ;;  %v1295_v15 = vld [vmem:[#allocation2 + $0x10e] sm:$0xff]  ;;  %v674_v16 = vmax.f32 %v9004_v62, 0.0  ;;  %v966_v24 = vmul.f32 %v896_v1, %v673_v11  ;;  %5226 = vmatprep.mubr.bf16.mxu0 %v8034_v37  ;;  %v626_v1 = vpop.f32.mrf.mxu1 }
 0x14a   : > { %1006 = vst [vmem:[#allocation2 + $0x118] sm:$0xff] %v965_v22  ;;  %2485 = vst [vmem:[#allocation3 + $0x428] sm:$0xf] %v7422_v28  ;;  %v1542_v44 = vld [vmem:[#allocation2 + $0x10f] sm:$0xff]  ;;  %v7262_v42 = vpack.c.bf16 %v1295_v15, %v1295_v15  ;;  %v1027_v45 = vld [vmem:[#allocation2 + $0x65] sm:$0xff]  ;;  %v653_v62 = vmax.f32 %v9011_v17, 0.0 }
 0x14b   : > { %2730 = vst [vmem:[#allocation3 + $0x3e4] sm:$0xf] %v7422_v28  ;;  %2977 = vst [vmem:[#allocation3 + $0x3e8] sm:$0xf] %v7502_v29  ;;  %v7303_v19 = vpack.c.bf16 %v1542_v44, %v1542_v44  ;;  %v2280_v49 = vld [vmem:[#allocation2 + $0x109] sm:$0xff]  ;;  %v7363_v29 = vpack.c.bf16 %v944_v48, %v944_v48  ;;  %v7200_v47 = vpack.c.bf16 %v1027_v45, %v1027_v45 }
 0x14c   : > { %3224 = vst [vmem:[#allocation3 + $0x3ec] sm:$0xf] %v7543_v30  ;;  %2241 = vst [vmem:[#allocation3 + $0x490] sm:$0xf] %v7384_v39  ;;  %v2772_v20 = vld [vmem:[#allocation2 + $0x10a] sm:$0xff]  ;;  %v7423_v25 = vpack.c.bf16 %v2280_v49, %v2280_v49  ;;  %v7691_v30 = vpop.f32.mrf.mxu0  ;;  %v2259_v39 = vld [vmem:[#allocation2 + $0x61] sm:$0xff]  ;;  %v967_v14 = vmul.f32 %v901_v33, %v674_v16  ;;  %v614_v16 = vadd.f32 %v8988_v31, %v8981_v46 }
 0x14d   : > { %1232 = vst [vmem:[#allocation3 + $0x18c] sm:$0xf] %v7199_v50  ;;  %1479 = vst [vmem:[#allocation3 + $0x190] sm:$0xf] %v7240_v56  ;;  %v3019_v21 = vld [vmem:[#allocation2 + $0x10b] sm:$0xff]  ;;  %v7503_v26 = vpack.c.bf16 %v2772_v20, %v2772_v20  ;;  %v2751_v38 = vld [vmem:[#allocation2 + $0x62] sm:$0xff]  ;;  %v7385_v50 = vpack.c.bf16 %v966_v24, %v966_v24  ;;  %v7402_v56 = vpack.c.bf16 %v2259_v39, %v2259_v39 }
 0x14e   : > { %1726 = vst [vmem:[#allocation3 + $0x194] sm:$0xf] %v7281_v0  ;;  %1971 = vst [vmem:[#allocation3 + $0x150] sm:$0xf] %v7281_v0  ;;  %v7544_v8 = vpack.c.bf16 %v3019_v21, %v3019_v21  ;;  %v1274_v22 = vld [vmem:[#allocation2 + $0x66] sm:$0xff]  ;;  %v7482_v0 = vpack.c.bf16 %v2751_v38, %v2751_v38  ;;  %v538_v7 = vpop.f32.mrf.mxu0  ;;  %v9025_v20 = vadd.f32 %v8988_v31, %v8992_v34 }
 0x14f   : > { %2464 = vst [vmem:[#allocation3 + $0x134] sm:$0xf] %v7401_v9  ;;  %2709 = vst [vmem:[#allocation3 + $0xf0] sm:$0xf] %v7401_v9  ;;  %v1521_v28 = vld [vmem:[#allocation2 + $0x67] sm:$0xff]  ;;  %v7241_v36 = vpack.c.bf16 %v1274_v22, %v1274_v22  ;;  %v9033_v46 = vadd.f32 %v8988_v31, %v9013_v10  ;;  %v9037_v34 = vadd.f32 %v8988_v31, %v9015_v18 }
 0x150   : > { %2956 = vst [vmem:[#allocation3 + $0xf4] sm:$0xf] %v7481_v12  ;;  %3203 = vst [vmem:[#allocation3 + $0xf8] sm:$0xf] %v7522_v63  ;;  %v7282_v40 = vpack.c.bf16 %v1521_v28, %v1521_v28  ;;  %v2998_v35 = vld [vmem:[#allocation2 + $0x63] sm:$0xff]  ;;  %v946_v28 = vmul.f32 %v8842_v52, %v653_v62  ;;  %v654_v10 = vmax.f32 %v9025_v20, 0.0  ;;  %v9049_v18 = vadd.f32 %v8988_v31, %v626_v1 }
 0x151   : > { %985 = vst [vmem:[#allocation2 + $0x70] sm:$0xff] %v944_v48  ;;  %1254 = vst [vmem:[#allocation3 + $0x4a4] sm:$0xf] %v7221_v41  ;;  %v7523_v4 = vpack.c.bf16 %v2998_v35, %v2998_v35  ;;  %v1049_v5 = vld [vmem:[#allocation2 + $0x115] sm:$0xff]  ;;  %v7364_v48 = vpack.c.bf16 %v945_v23, %v945_v23  ;;  %v7694_v41 = vpop.f32.mrf.mxu0 }
 0x152   : > { %1501 = vst [vmem:[#allocation3 + $0x4a8] sm:$0xf] %v7262_v42  ;;  %1748 = vst [vmem:[#allocation3 + $0x4ac] sm:$0xf] %v7303_v19  ;;  %v1296_v59 = vld [vmem:[#allocation2 + $0x116] sm:$0xff]  ;;  %v7222_v9 = vpack.c.bf16 %v1049_v5, %v1049_v5  ;;  %v7738_v42 = vpop.f32.mrf.mxu1 }
 0x153   : > { %1993 = vst [vmem:[#allocation3 + $0x468] sm:$0xf] %v7303_v19  ;;  %1007 = vst [vmem:[#allocation2 + $0x120] sm:$0xff] %v966_v24  ;;  %v1543_v6 = vld [vmem:[#allocation2 + $0x117] sm:$0xff]  ;;  %v7263_v12 = vpack.c.bf16 %v1296_v59, %v1296_v59  ;;  %v7386_v19 = vpack.c.bf16 %v967_v14, %v967_v14  ;;  %v9029_v24 = vadd.f32 %v8988_v31, %v8994_v27 }
 0x154   : > { %2486 = vst [vmem:[#allocation3 + $0x44c] sm:$0xf] %v7423_v25  ;;  %2731 = vst [vmem:[#allocation3 + $0x408] sm:$0xf] %v7423_v25  ;;  %v7304_v63 = vpack.c.bf16 %v1543_v6, %v1543_v6  ;;  %v2281_v11 = vld [vmem:[#allocation2 + $0x111] sm:$0xff]  ;;  %v9040_v25 = vadd.f32 %v8988_v31, %v538_v7 }
 0x155   : > { %2978 = vst [vmem:[#allocation3 + $0x40c] sm:$0xf] %v7503_v26  ;;  %3225 = vst [vmem:[#allocation3 + $0x410] sm:$0xf] %v7544_v8  ;;  %v2773_v37 = vld [vmem:[#allocation2 + $0x112] sm:$0xff]  ;;  %v7424_v51 = vpack.c.bf16 %v2281_v11, %v2281_v11  ;;  %v9042_v26 = vpop.f32.mrf.mxu0  ;;  %v9044_v8 = vpop.f32.mrf.mxu1  ;;  %v676_v39 = vmax.f32 %v9029_v24, 0.0 }
 0x156   : > { %2220 = vst [vmem:[#allocation3 + $0x19c] sm:$0xf] %v7363_v29  ;;  %1233 = vst [vmem:[#allocation3 + $0x1b0] sm:$0xf] %v7200_v47  ;;  %v3020_v13 = vld [vmem:[#allocation2 + $0x113] sm:$0xff]  ;;  %v7504_v15 = vpack.c.bf16 %v2773_v37, %v2773_v37  ;;  %v675_v29 = vmax.f32 %v614_v16, 0.0 }
 0x157   : > { %1480 = vst [vmem:[#allocation3 + $0x1b4] sm:$0xf] %v7241_v36  ;;  %1727 = vst [vmem:[#allocation3 + $0x1b8] sm:$0xf] %v7282_v40  ;;  %v7545_v44 = vpack.c.bf16 %v3020_v13, %v3020_v13  ;;  %v8037_v43 = vld [vmem:[#allocation3 + $0x98] ss:$36 sps:$4 sm:$0xff]   ;;  %v7695_v52 = vpop.f32.mrf.mxu0  ;;  %v7739_v35 = vpop.f32.mrf.mxu1 }
 0x158   : > { %1972 = vst [vmem:[#allocation3 + $0x174] sm:$0xf] %v7282_v40  ;;  %2242 = vst [vmem:[#allocation3 + $0x4b4] sm:$0xf] %v7385_v50  ;;  %v8038_v49 = vld [vmem:[#allocation3 + $0x124] ss:$36 sps:$4 sm:$0xff]   ;;  %5227 = vmatmul.mubr.bf16.gmra.mxu0 %v8037_v43  ;;  %v906_v50 = vpop.permute.xlu1 %905 }
 0x159   : > { %2465 = vst [vmem:[#allocation3 + $0x158] sm:$0xf] %v7402_v56  ;;  %2710 = vst [vmem:[#allocation3 + $0x114] sm:$0xf] %v7402_v56  ;;  %v8040_v21 = vld [vmem:[#allocation3 + $0xe4] ss:$36 sps:$4 sm:$0xff]   ;;  %5042 = vmatprep.mubr.bf16.mxu1 %v8038_v49  ;;  %v968_v37 = vmul.f32 %v906_v50, %v675_v29  ;;  %v9054_v13 = vpop.f32.mrf.mxu0 }
 0x15a   : > { %2957 = vst [vmem:[#allocation3 + $0x118] sm:$0xf] %v7482_v0  ;;  %3204 = vst [vmem:[#allocation3 + $0x11c] sm:$0xf] %v7523_v4  ;;  %v8042_v17 = vld [vmem:[#allocation3 + $0x120] ss:$36 sps:$4 sm:$0xff]   ;;  %5234 = vmatprep.mubr.bf16.mxu0 %v8040_v21 }
 0x15b   : > { %986 = vst [vmem:[#allocation2 + $0x78] sm:$0xff] %v945_v23  ;;  %1255 = vst [vmem:[#allocation3 + $0x4c8] sm:$0xf] %v7222_v9  ;;  %v1028_v45 = vld [vmem:[#allocation2 + $0x6d] sm:$0xff]  ;;  %5043 = vmatmul.mubr.bf16.gmra.mxu1 %v8042_v17  ;;  %v9052_v38 = vld [vmem:[#allocation3 + $0xe0] ss:$36 sps:$4 sm:$0xff]   ;;  %v7365_v23 = vpack.c.bf16 %v946_v28, %v946_v28 }
 0x15c   : > { %1502 = vst [vmem:[#allocation3 + $0x4cc] sm:$0xf] %v7263_v12  ;;  %1749 = vst [vmem:[#allocation3 + $0x4d0] sm:$0xf] %v7304_v63  ;;  %v1275_v22 = vld [vmem:[#allocation2 + $0x6e] sm:$0xff]  ;;  %v7201_v30 = vpack.c.bf16 %v1028_v45, %v1028_v45  ;;  %v1050_v5 = vld [vmem:[#allocation2 + $0x11d] sm:$0xff]  ;;  %v7387_v45 = vpack.c.bf16 %v968_v37, %v968_v37 }
 0x15d   : > { %1994 = vst [vmem:[#allocation3 + $0x48c] sm:$0xf] %v7304_v63  ;;  %1008 = vst [vmem:[#allocation2 + $0x128] sm:$0xff] %v967_v14  ;;  %v1522_v27 = vld [vmem:[#allocation2 + $0x6f] sm:$0xff]  ;;  %v7242_v32 = vpack.c.bf16 %v1275_v22, %v1275_v22  ;;  %v1297_v59 = vld [vmem:[#allocation2 + $0x11e] sm:$0xff]  ;;  %v7223_v7 = vpack.c.bf16 %v1050_v5, %v1050_v5  ;;  %v9056_v14 = vpop.f32.mrf.mxu1  ;;  %v7698_v22 = vpop.f32.mrf.mxu0 }
 0x15e   : > { %2487 = vst [vmem:[#allocation3 + $0x470] sm:$0xf] %v7424_v51  ;;  %2732 = vst [vmem:[#allocation3 + $0x42c] sm:$0xf] %v7424_v51  ;;  %v7283_v33 = vpack.c.bf16 %v1522_v27, %v1522_v27  ;;  %v2260_v47 = vld [vmem:[#allocation2 + $0x69] sm:$0xff]  ;;  %v1544_v6 = vld [vmem:[#allocation2 + $0x11f] sm:$0xff]  ;;  %v7264_v1 = vpack.c.bf16 %v1297_v59, %v1297_v59  ;;  %v911_v51 = vpop.permute.xlu0 %910 }
 0x15f   : > { %2979 = vst [vmem:[#allocation3 + $0x430] sm:$0xf] %v7504_v15  ;;  %3226 = vst [vmem:[#allocation3 + $0x434] sm:$0xf] %v7545_v44  ;;  %v2752_v36 = vld [vmem:[#allocation2 + $0x6a] sm:$0xff]  ;;  %v7403_v56 = vpack.c.bf16 %v2260_v47, %v2260_v47  ;;  %v7305_v9 = vpack.c.bf16 %v1544_v6, %v1544_v6  ;;  %v2282_v12 = vld [vmem:[#allocation2 + $0x119] sm:$0xff]  ;;  %v7742_v27 = vpop.f32.mrf.mxu1 }
 0x160   : > { %2221 = vst [vmem:[#allocation3 + $0x1c0] sm:$0xf] %v7364_v48  ;;  %2243 = vst [vmem:[#allocation3 + $0x4d8] sm:$0xf] %v7386_v19  ;;  %v2999_v40 = vld [vmem:[#allocation2 + $0x6b] sm:$0xff]  ;;  %v7483_v0 = vpack.c.bf16 %v2752_v36, %v2752_v36  ;;  %v2774_v63 = vld [vmem:[#allocation2 + $0x11a] sm:$0xff]  ;;  %v7425_v15 = vpack.c.bf16 %v2282_v12, %v2282_v12  ;;  %v947_v19 = vmul.f32 %v8844_v53, %v654_v10  ;;  %5235 = vmatmul.mubr.bf16.gmra.mxu0 %v9052_v38 }
 0x161   : > { %v7524_v4 = vpack.c.bf16 %v2999_v40, %v2999_v40  ;;  %987 = vst [vmem:[#allocation2 + $0x80] sm:$0xff] %v946_v28  ;;  %1234 = vst [vmem:[#allocation3 + $0x1d4] sm:$0xf] %v7201_v30  ;;  %v3021_v11 = vld [vmem:[#allocation2 + $0x11b] sm:$0xff]  ;;  %v7505_v44 = vpack.c.bf16 %v2774_v63, %v2774_v63  ;;  %v656_v12 = vmax.f32 %v9040_v25, 0.0  ;;  %v678_v63 = vmax.f32 %v9049_v18, 0.0 }
 0x162   : > { %1481 = vst [vmem:[#allocation3 + $0x1d8] sm:$0xf] %v7242_v32  ;;  %1728 = vst [vmem:[#allocation3 + $0x1dc] sm:$0xf] %v7283_v33  ;;  %v7546_v48 = vpack.c.bf16 %v3021_v11, %v3021_v11  ;;  %v1029_v43 = vld [vmem:[#allocation2 + $0x75] sm:$0xff]  ;;  %v9074_v27 = vadd.f32 %v8988_v31, %v9042_v26 }
 0x163   : > { %1973 = vst [vmem:[#allocation3 + $0x198] sm:$0xf] %v7283_v33  ;;  %2466 = vst [vmem:[#allocation3 + $0x17c] sm:$0xf] %v7403_v56  ;;  %v1276_v41 = vld [vmem:[#allocation2 + $0x76] sm:$0xff]  ;;  %v7202_v62 = vpack.c.bf16 %v1029_v43, %v1029_v43  ;;  %v7366_v33 = vpack.c.bf16 %v947_v19, %v947_v19 }
 0x164   : > { %2711 = vst [vmem:[#allocation3 + $0x138] sm:$0xf] %v7403_v56  ;;  %2958 = vst [vmem:[#allocation3 + $0x13c] sm:$0xf] %v7483_v0  ;;  %v1523_v42 = vld [vmem:[#allocation2 + $0x77] sm:$0xff]  ;;  %v7243_v16 = vpack.c.bf16 %v1276_v41, %v1276_v41  ;;  %v1051_v10 = vld [vmem:[#allocation2 + $0x125] sm:$0xff]  ;;  %v969_v56 = vmul.f32 %v911_v51, %v676_v39  ;;  %v9062_v0 = vpop.f32.mrf.mxu0  ;;  %v916_v51 = vpop.permute.xlu1 %915 }
 0x165   : > { %3205 = vst [vmem:[#allocation3 + $0x140] sm:$0xf] %v7524_v4  ;;  %2222 = vst [vmem:[#allocation3 + $0x1e4] sm:$0xf] %v7365_v23  ;;  %v7284_v49 = vpack.c.bf16 %v1523_v42, %v1523_v42  ;;  %v2261_v20 = vld [vmem:[#allocation2 + $0x71] sm:$0xff]  ;;  %v1298_v30 = vld [vmem:[#allocation2 + $0x126] sm:$0xff]  ;;  %v7224_v47 = vpack.c.bf16 %v1051_v10, %v1051_v10  ;;  %v637_v4 = vpop.f32.mrf.mxu1 }
 0x166   : > { %1256 = vst [vmem:[#allocation3 + $0x4ec] sm:$0xf] %v7223_v7  ;;  %1503 = vst [vmem:[#allocation3 + $0x4f0] sm:$0xf] %v7264_v1  ;;  %v2753_v21 = vld [vmem:[#allocation2 + $0x72] sm:$0xff]  ;;  %v7404_v28 = vpack.c.bf16 %v2261_v20, %v2261_v20  ;;  %v1545_v32 = vld [vmem:[#allocation2 + $0x127] sm:$0xff]  ;;  %v7265_v36 = vpack.c.bf16 %v1298_v30, %v1298_v30  ;;  %v7388_v1 = vpack.c.bf16 %v969_v56, %v969_v56  ;;  %v7699_v11 = vpop.f32.mrf.mxu0 }
 0x167   : > { %1750 = vst [vmem:[#allocation3 + $0x4f4] sm:$0xf] %v7305_v9  ;;  %1995 = vst [vmem:[#allocation3 + $0x4b0] sm:$0xf] %v7305_v9  ;;  %v3000_v17 = vld [vmem:[#allocation2 + $0x73] sm:$0xff]  ;;  %v7484_v53 = vpack.c.bf16 %v2753_v21, %v2753_v21  ;;  %v7306_v40 = vpack.c.bf16 %v1545_v32, %v1545_v32  ;;  %v2283_v52 = vld [vmem:[#allocation2 + $0x121] sm:$0xff] }
 0x168   : > { %1009 = vst [vmem:[#allocation2 + $0x130] sm:$0xff] %v968_v37  ;;  %2488 = vst [vmem:[#allocation3 + $0x494] sm:$0xf] %v7425_v15  ;;  %v7525_v29 = vpack.c.bf16 %v3000_v17, %v3000_v17  ;;  %v2775_v35 = vld [vmem:[#allocation2 + $0x122] sm:$0xff]  ;;  %v7426_v5 = vpack.c.bf16 %v2283_v52, %v2283_v52  ;;  %v655_v23 = vmax.f32 %v9033_v46, 0.0  ;;  %v677_v9 = vmax.f32 %v9037_v34, 0.0  ;;  %v7743_v37 = vpop.f32.mrf.mxu1  ;;  %v921_v34 = vpop.permute.xlu0 %920 }
 0x169   : > { %2733 = vst [vmem:[#allocation3 + $0x450] sm:$0xf] %v7425_v15  ;;  %2980 = vst [vmem:[#allocation3 + $0x454] sm:$0xf] %v7505_v44  ;;  %v3022_v50 = vld [vmem:[#allocation2 + $0x123] sm:$0xff]  ;;  %v7506_v59 = vpack.c.bf16 %v2775_v35, %v2775_v35  ;;  %v2754_v43 = vld [vmem:[#allocation2 + $0x7a] sm:$0xff]  ;;  %v971_v22 = vmul.f32 %v921_v34, %v678_v63 }
 0x16a   : > { %3227 = vst [vmem:[#allocation3 + $0x458] sm:$0xf] %v7546_v48  ;;  %988 = vst [vmem:[#allocation2 + $0x88] sm:$0xff] %v947_v19  ;;  %v7547_v6 = vpack.c.bf16 %v3022_v50, %v3022_v50  ;;  %v8045_v7 = vld [vmem:[#allocation3 + $0x16c] ss:$36 sps:$4 sm:$0xff]   ;;  %v2262_v48 = vld [vmem:[#allocation2 + $0x79] sm:$0xff]  ;;  %v948_v42 = vmul.f32 %v8846_v54, %v655_v23  ;;  %v7485_v19 = vpack.c.bf16 %v2754_v43, %v2754_v43 }
 0x16b   : > { %1235 = vst [vmem:[#allocation3 + $0x1f8] sm:$0xf] %v7202_v62  ;;  %1482 = vst [vmem:[#allocation3 + $0x1fc] sm:$0xf] %v7243_v16  ;;  %v1030_v24 = vld [vmem:[#allocation2 + $0x7d] sm:$0xff]  ;;  %5050 = vmatprep.mubr.bf16.mxu1 %v8045_v7  ;;  %v7405_v25 = vpack.c.bf16 %v2262_v48, %v2262_v48  ;;  %v970_v62 = vmul.f32 %v916_v51, %v677_v9  ;;  %v949_v54 = vmul.f32 %v8848_v55, %v656_v12 }
 0x16c   : > { %1729 = vst [vmem:[#allocation3 + $0x200] sm:$0xf] %v7284_v49  ;;  %1974 = vst [vmem:[#allocation3 + $0x1bc] sm:$0xf] %v7284_v49  ;;  %v1277_v39 = vld [vmem:[#allocation2 + $0x7e] sm:$0xff]  ;;  %v7203_v46 = vpack.c.bf16 %v1030_v24, %v1030_v24  ;;  %v9069_v49 = vpop.f32.mrf.mxu0  ;;  %v7390_v7 = vpack.c.bf16 %v971_v22, %v971_v22  ;;  %v657_v11 = vmax.f32 %v9074_v27, 0.0  ;;  %v630_v43 = vadd.f32 %v8988_v31, %v9044_v8 }
 0x16d   : > { %2244 = vst [vmem:[#allocation3 + $0x4fc] sm:$0xf] %v7387_v45  ;;  %2467 = vst [vmem:[#allocation3 + $0x1a0] sm:$0xf] %v7404_v28  ;;  %v1524_v38 = vld [vmem:[#allocation2 + $0x7f] sm:$0xff]  ;;  %v7244_v15 = vpack.c.bf16 %v1277_v39, %v1277_v39  ;;  %v7367_v45 = vpack.c.bf16 %v948_v42, %v948_v42  ;;  %v7368_v50 = vpack.c.bf16 %v949_v54, %v949_v54 }
 0x16e   : > { %2712 = vst [vmem:[#allocation3 + $0x15c] sm:$0xf] %v7404_v28  ;;  %2959 = vst [vmem:[#allocation3 + $0x160] sm:$0xf] %v7484_v53  ;;  %v7285_v44 = vpack.c.bf16 %v1524_v38, %v1524_v38  ;;  %v3001_v41 = vld [vmem:[#allocation2 + $0x7b] sm:$0xff]  ;;  %v679_v8 = vmax.f32 %v630_v43, 0.0 }
 0x16f   : > { %3206 = vst [vmem:[#allocation3 + $0x164] sm:$0xf] %v7525_v29  ;;  %2223 = vst [vmem:[#allocation3 + $0x208] sm:$0xf] %v7366_v33  ;;  %v7526_v18 = vpack.c.bf16 %v3001_v41, %v3001_v41  ;;  %v8047_v16 = vld [vmem:[#allocation3 + $0x12c] ss:$36 sps:$4 sm:$0xff]   ;;  %v7389_v33 = vpack.c.bf16 %v970_v62, %v970_v62 }
 0x170   : > { %1257 = vst [vmem:[#allocation3 + $0x510] sm:$0xf] %v7224_v47  ;;  %1504 = vst [vmem:[#allocation3 + $0x514] sm:$0xf] %v7265_v36  ;;  %v1052_v20 = vld [vmem:[#allocation2 + $0x12d] sm:$0xff]  ;;  %5242 = vmatprep.mubr.bf16.mxu0 %v8047_v16  ;;  %v7702_v47 = vpop.f32.mrf.mxu0 }
 0x171   : > { %1751 = vst [vmem:[#allocation3 + $0x518] sm:$0xf] %v7306_v40  ;;  %1996 = vst [vmem:[#allocation3 + $0x4d4] sm:$0xf] %v7306_v40  ;;  %v1299_v21 = vld [vmem:[#allocation2 + $0x12e] sm:$0xff]  ;;  %v7225_v28 = vpack.c.bf16 %v1052_v20, %v1052_v20  ;;  %v1031_v52 = vld [vmem:[#allocation2 + $0x85] sm:$0xff] }
 0x172   : > { %1010 = vst [vmem:[#allocation2 + $0x138] sm:$0xff] %v969_v56  ;;  %2489 = vst [vmem:[#allocation3 + $0x4b8] sm:$0xf] %v7426_v5  ;;  %v1546_v17 = vld [vmem:[#allocation2 + $0x12f] sm:$0xff]  ;;  %v7266_v53 = vpack.c.bf16 %v1299_v21, %v1299_v21  ;;  %v1278_v26 = vld [vmem:[#allocation2 + $0x86] sm:$0xff]  ;;  %v7204_v56 = vpack.c.bf16 %v1031_v52, %v1031_v52  ;;  %v9076_v24 = vpop.f32.mrf.mxu0 }
 0x173   : > { %2734 = vst [vmem:[#allocation3 + $0x474] sm:$0xf] %v7426_v5  ;;  %2981 = vst [vmem:[#allocation3 + $0x478] sm:$0xf] %v7506_v59  ;;  %v7307_v29 = vpack.c.bf16 %v1546_v17, %v1546_v17  ;;  %v2284_v10 = vld [vmem:[#allocation2 + $0x129] sm:$0xff]  ;;  %v7245_v4 = vpack.c.bf16 %v1278_v26, %v1278_v26  ;;  %v2263_v59 = vld [vmem:[#allocation2 + $0x81] sm:$0xff]  ;;  %v9084_v17 = vadd.f32 %v8988_v31, %v9054_v13  ;;  %v926_v13 = vpop.permute.xlu1 %925 }
 0x174   : > { %3228 = vst [vmem:[#allocation3 + $0x47c] sm:$0xf] %v7547_v6  ;;  %2245 = vst [vmem:[#allocation3 + $0x520] sm:$0xf] %v7388_v1  ;;  %v2776_v30 = vld [vmem:[#allocation2 + $0x12a] sm:$0xff]  ;;  %v7427_v55 = vpack.c.bf16 %v2284_v10, %v2284_v10  ;;  %v2755_v6 = vld [vmem:[#allocation2 + $0x82] sm:$0xff]  ;;  %v7406_v39 = vpack.c.bf16 %v2263_v59, %v2263_v59  ;;  %v7703_v41 = vpop.f32.mrf.mxu0 }
 0x175   : > { %1236 = vst [vmem:[#allocation3 + $0x21c] sm:$0xf] %v7203_v46  ;;  %1483 = vst [vmem:[#allocation3 + $0x220] sm:$0xf] %v7244_v15  ;;  %v3023_v32 = vld [vmem:[#allocation2 + $0x12b] sm:$0xff]  ;;  %v7507_v36 = vpack.c.bf16 %v2776_v30, %v2776_v30  ;;  %v3002_v23 = vld [vmem:[#allocation2 + $0x83] sm:$0xff]  ;;  %v7486_v38 = vpack.c.bf16 %v2755_v6, %v2755_v6 }
 0x176   : > { %1730 = vst [vmem:[#allocation3 + $0x224] sm:$0xf] %v7285_v44  ;;  %1975 = vst [vmem:[#allocation3 + $0x1e0] sm:$0xf] %v7285_v44  ;;  %v7548_v40 = vpack.c.bf16 %v3023_v32, %v3023_v32  ;;  %v1525_v35 = vld [vmem:[#allocation2 + $0x87] sm:$0xff]  ;;  %v7527_v1 = vpack.c.bf16 %v3002_v23, %v3002_v23  ;;  %v658_v23 = vmax.f32 %v9084_v17, 0.0 }
 0x177   : > { %989 = vst [vmem:[#allocation2 + $0x90] sm:$0xff] %v948_v42  ;;  %2468 = vst [vmem:[#allocation3 + $0x1c4] sm:$0xf] %v7405_v25  ;;  %v7286_v5 = vpack.c.bf16 %v1525_v35, %v1525_v35  ;;  %v972_v35 = vmul.f32 %v926_v13, %v679_v8 }
 0x178   : > { %2713 = vst [vmem:[#allocation3 + $0x180] sm:$0xf] %v7405_v25  ;;  %2960 = vst [vmem:[#allocation3 + $0x184] sm:$0xf] %v7485_v19  ;;  %v8049_v19 = vld [vmem:[#allocation3 + $0x168] ss:$36 sps:$4 sm:$0xff]  }
 0x179   : > { %3207 = vst [vmem:[#allocation3 + $0x188] sm:$0xf] %v7526_v18  ;;  %1011 = vst [vmem:[#allocation2 + $0x140] sm:$0xff] %v970_v62  ;;  %v1053_v9 = vld [vmem:[#allocation2 + $0x135] sm:$0xff]  ;;  %v8050_v18 = vld [vmem:[#allocation3 + $0x128] ss:$36 sps:$4 sm:$0xff]   ;;  %v950_v62 = vmul.f32 %v8854_v57, %v657_v11  ;;  %5051 = vmatmul.mubr.bf16.gmra.mxu1 %v8049_v19 }
 0x17a   : > { %2224 = vst [vmem:[#allocation3 + $0x22c] sm:$0xf] %v7367_v45  ;;  %990 = vst [vmem:[#allocation2 + $0x98] sm:$0xff] %v949_v54  ;;  %v1300_v12 = vld [vmem:[#allocation2 + $0x136] sm:$0xff]  ;;  %v7226_v37 = vpack.c.bf16 %v1053_v9, %v1053_v9  ;;  %v9088_v45 = vadd.f32 %v8988_v31, %v9056_v14  ;;  %v9092_v54 = vadd.f32 %v8988_v31, %v9062_v0  ;;  %5243 = vmatmul.mubr.bf16.gmra.mxu0 %v8050_v18 }
 0x17b   : > { %1012 = vst [vmem:[#allocation2 + $0x148] sm:$0xff] %v971_v22  ;;  %1258 = vst [vmem:[#allocation3 + $0x534] sm:$0xf] %v7225_v28  ;;  %v1547_v63 = vld [vmem:[#allocation2 + $0x137] sm:$0xff]  ;;  %v7267_v51 = vpack.c.bf16 %v1300_v12, %v1300_v12 }
 0x17c   : > { %1505 = vst [vmem:[#allocation3 + $0x538] sm:$0xf] %v7266_v53  ;;  %1752 = vst [vmem:[#allocation3 + $0x53c] sm:$0xf] %v7307_v29  ;;  %v7308_v46 = vpack.c.bf16 %v1547_v63, %v1547_v63  ;;  %v2285_v15 = vld [vmem:[#allocation2 + $0x131] sm:$0xff]  ;;  %v7391_v63 = vpack.c.bf16 %v972_v35, %v972_v35  ;;  %v680_v18 = vmax.f32 %v9088_v45, 0.0 }
 0x17d   : > { %1997 = vst [vmem:[#allocation3 + $0x4f8] sm:$0xf] %v7307_v29  ;;  %2246 = vst [vmem:[#allocation3 + $0x544] sm:$0xf] %v7389_v33  ;;  %v2777_v44 = vld [vmem:[#allocation2 + $0x132] sm:$0xff]  ;;  %v7428_v42 = vpack.c.bf16 %v2285_v15, %v2285_v15  ;;  %v7369_v33 = vpack.c.bf16 %v950_v62, %v950_v62 }
 0x17e   : > { %2490 = vst [vmem:[#allocation3 + $0x4dc] sm:$0xf] %v7427_v55  ;;  %2735 = vst [vmem:[#allocation3 + $0x498] sm:$0xf] %v7427_v55  ;;  %v3024_v48 = vld [vmem:[#allocation2 + $0x133] sm:$0xff]  ;;  %v7508_v34 = vpack.c.bf16 %v2777_v44, %v2777_v44  ;;  %v2264_v28 = vld [vmem:[#allocation2 + $0x89] sm:$0xff] }
 0x17f   : > { %2982 = vst [vmem:[#allocation3 + $0x49c] sm:$0xf] %v7507_v36  ;;  %3229 = vst [vmem:[#allocation3 + $0x4a0] sm:$0xf] %v7548_v40  ;;  %v7549_v25 = vpack.c.bf16 %v3024_v48, %v3024_v48  ;;  %v1032_v16 = vld [vmem:[#allocation2 + $0x8d] sm:$0xff]  ;;  %v7407_v14 = vpack.c.bf16 %v2264_v28, %v2264_v28  ;;  %v951_v48 = vmul.f32 %v8856_v58, %v658_v23 }
 0x180   : > { %2225 = vst [vmem:[#allocation3 + $0x250] sm:$0xf] %v7368_v50  ;;  %1237 = vst [vmem:[#allocation3 + $0x240] sm:$0xf] %v7204_v56  ;;  %v1279_v20 = vld [vmem:[#allocation2 + $0x8e] sm:$0xff]  ;;  %v7205_v57 = vpack.c.bf16 %v1032_v16, %v1032_v16  ;;  %v1054_v32 = vld [vmem:[#allocation2 + $0x13d] sm:$0xff] }
 0x181   : > { %1484 = vst [vmem:[#allocation3 + $0x244] sm:$0xf] %v7245_v4  ;;  %1731 = vst [vmem:[#allocation3 + $0x248] sm:$0xf] %v7286_v5  ;;  %v1526_v21 = vld [vmem:[#allocation2 + $0x8f] sm:$0xff]  ;;  %v7246_v22 = vpack.c.bf16 %v1279_v20, %v1279_v20  ;;  %v1301_v31 = vld [vmem:[#allocation2 + $0x13e] sm:$0xff]  ;;  %v7227_v47 = vpack.c.bf16 %v1054_v32, %v1054_v32 }
 0x182   : > { %1976 = vst [vmem:[#allocation3 + $0x204] sm:$0xf] %v7286_v5  ;;  %2247 = vst [vmem:[#allocation3 + $0x568] sm:$0xf] %v7390_v7  ;;  %v7287_v27 = vpack.c.bf16 %v1526_v21, %v1526_v21  ;;  %v2756_v53 = vld [vmem:[#allocation2 + $0x8a] sm:$0xff]  ;;  %v1548_v0 = vld [vmem:[#allocation2 + $0x13f] sm:$0xff]  ;;  %v7268_v55 = vpack.c.bf16 %v1301_v31, %v1301_v31 }
 0x183   : > { %2469 = vst [vmem:[#allocation3 + $0x1e8] sm:$0xf] %v7406_v39  ;;  %2714 = vst [vmem:[#allocation3 + $0x1a4] sm:$0xf] %v7406_v39  ;;  %v3003_v29 = vld [vmem:[#allocation2 + $0x8b] sm:$0xff]  ;;  %v7487_v10 = vpack.c.bf16 %v2756_v53, %v2756_v53  ;;  %v7309_v36 = vpack.c.bf16 %v1548_v0, %v1548_v0  ;;  %v2286_v40 = vld [vmem:[#allocation2 + $0x139] sm:$0xff] }
 0x184   : > { %2961 = vst [vmem:[#allocation3 + $0x1a8] sm:$0xf] %v7486_v38  ;;  %3208 = vst [vmem:[#allocation3 + $0x1ac] sm:$0xf] %v7527_v1  ;;  %v7528_v30 = vpack.c.bf16 %v3003_v29, %v3003_v29  ;;  %v2778_v52 = vld [vmem:[#allocation2 + $0x13a] sm:$0xff]  ;;  %v7429_v50 = vpack.c.bf16 %v2286_v40, %v2286_v40  ;;  %v2265_v1 = vld [vmem:[#allocation2 + $0x91] sm:$0xff] }
 0x185   : > { %1259 = vst [vmem:[#allocation3 + $0x558] sm:$0xf] %v7226_v37  ;;  %1506 = vst [vmem:[#allocation3 + $0x55c] sm:$0xf] %v7267_v51  ;;  %v3025_v26 = vld [vmem:[#allocation2 + $0x13b] sm:$0xff]  ;;  %v7509_v56 = vpack.c.bf16 %v2778_v52, %v2778_v52  ;;  %v2757_v9 = vld [vmem:[#allocation2 + $0x92] sm:$0xff]  ;;  %v7408_v11 = vpack.c.bf16 %v2265_v1, %v2265_v1 }
 0x186   : > { %1753 = vst [vmem:[#allocation3 + $0x560] sm:$0xf] %v7308_v46  ;;  %1998 = vst [vmem:[#allocation3 + $0x51c] sm:$0xf] %v7308_v46  ;;  %v7550_v4 = vpack.c.bf16 %v3025_v26, %v3025_v26  ;;  %v1033_v5 = vld [vmem:[#allocation2 + $0x95] sm:$0xff]  ;;  %v7488_v37 = vpack.c.bf16 %v2757_v9, %v2757_v9  ;;  %v2779_v19 = vld [vmem:[#allocation2 + $0x142] sm:$0xff] }
 0x187   : > { %2491 = vst [vmem:[#allocation3 + $0x500] sm:$0xf] %v7428_v42  ;;  %2736 = vst [vmem:[#allocation3 + $0x4bc] sm:$0xf] %v7428_v42  ;;  %v1280_v59 = vld [vmem:[#allocation2 + $0x96] sm:$0xff]  ;;  %v7206_v7 = vpack.c.bf16 %v1033_v5, %v1033_v5  ;;  %v7510_v20 = vpack.c.bf16 %v2779_v19, %v2779_v19  ;;  %v3026_v21 = vld [vmem:[#allocation2 + $0x143] sm:$0xff] }
 0x188   : > { %2983 = vst [vmem:[#allocation3 + $0x4c0] sm:$0xf] %v7508_v34  ;;  %3230 = vst [vmem:[#allocation3 + $0x4c4] sm:$0xf] %v7549_v25  ;;  %v1527_v6 = vld [vmem:[#allocation2 + $0x97] sm:$0xff]  ;;  %v7247_v39 = vpack.c.bf16 %v1280_v59, %v1280_v59  ;;  %v1794_v34 = vld [vmem:[#allocation2 + $0x147] sm:$0xff] }
 0x189   : > { %991 = vst [vmem:[#allocation2 + $0xa0] sm:$0xff] %v950_v62  ;;  %1238 = vst [vmem:[#allocation3 + $0x264] sm:$0xf] %v7205_v57  ;;  %v7288_v38 = vpack.c.bf16 %v1527_v6, %v1527_v6  ;;  %v3004_v12 = vld [vmem:[#allocation2 + $0x93] sm:$0xff]  ;;  %v1055_v46 = vld [vmem:[#allocation2 + $0x145] sm:$0xf]  ;;  %v931_v62 = vpop.permute.xlu0 %930  ;;  %v7349_v16 = vpack.c.bf16 %v1794_v34, %v1794_v34  ;;  %v7370_v57 = vpack.c.bf16 %v951_v48, %v951_v48 }
 0x18a   : > { %1485 = vst [vmem:[#allocation3 + $0x268] sm:$0xf] %v7246_v22  ;;  %1732 = vst [vmem:[#allocation3 + $0x26c] sm:$0xf] %v7287_v27  ;;  %v7529_v51 = vpack.c.bf16 %v3004_v12, %v3004_v12  ;;  %v1302_v15 = vld [vmem:[#allocation2 + $0x146] sm:$0xf]  ;;  %v7228_v43 = vpack.c.bf16 %v1055_v46, %v1055_v46  ;;  %v7551_v22 = vpack.c.bf16 %v3026_v21, %v3026_v21 }
 0x18b   : > { %1977 = vst [vmem:[#allocation3 + $0x228] sm:$0xf] %v7287_v27  ;;  %2470 = vst [vmem:[#allocation3 + $0x20c] sm:$0xf] %v7407_v14  ;;  %v1549_v44 = vld [vmem:[#allocation2 + $0x147] sm:$0xf]  ;;  %v7269_v41 = vpack.c.bf16 %v1302_v15, %v1302_v15  ;;  %v973_v13 = vmul.f32 %v931_v62, %v680_v18 }
 0x18c   : > { %2715 = vst [vmem:[#allocation3 + $0x1c8] sm:$0xf] %v7407_v14  ;;  %2962 = vst [vmem:[#allocation3 + $0x1cc] sm:$0xf] %v7487_v10  ;;  %v7310_v42 = vpack.c.bf16 %v1549_v44, %v1549_v44  ;;  %v2287_v25 = vld [vmem:[#allocation2 + $0x141] sm:$0xff]  ;;  %v659_v0 = vmax.f32 %v9092_v54, 0.0 }
 0x18d   : > { %3209 = vst [vmem:[#allocation3 + $0x1d0] sm:$0xf] %v7528_v30  ;;  %2226 = vst [vmem:[#allocation3 + $0x274] sm:$0xf] %v7369_v33  ;;  %v7430_v58 = vpack.c.bf16 %v2287_v25, %v2287_v25  ;;  %v8052_v31 = vld [vmem:[#allocation3 + $0x1b4] ss:$36 sps:$4 sm:$0xff]  }
 0x18e   : > { %1260 = vst [vmem:[#allocation3 + $0x57c] sm:$0xf] %v7227_v47  ;;  %1507 = vst [vmem:[#allocation3 + $0x580] sm:$0xf] %v7268_v55  ;;  %v8054_v47 = vld [vmem:[#allocation3 + $0x174] ss:$36 sps:$4 sm:$0xff]   ;;  %5058 = vmatprep.mubr.bf16.mxu1 %v8052_v31 }
 0x18f   : > { %1754 = vst [vmem:[#allocation3 + $0x584] sm:$0xf] %v7309_v36  ;;  %1999 = vst [vmem:[#allocation3 + $0x540] sm:$0xf] %v7309_v36  ;;  %v8332_v55 = vld [vmem:[%s9786_s4] ss:$0 sm:$0xff]  ;;  %5250 = vmatprep.mubr.bf16.mxu0 %v8054_v47 }
 0x190   : > { %1013 = vst [vmem:[#allocation2 + $0x150] sm:$0xff] %v972_v35  ;;  %2492 = vst [vmem:[#allocation3 + $0x524] sm:$0xf] %v7429_v50  ;;  %v1034_v8 = vld [vmem:[#allocation2 + $0x9d] sm:$0xff]  ;;  %v555_v36 = vadd.f32 %v8332_v55, %v9069_v49  ;;  %v558_v40 = vadd.f32 %v8332_v55, %v9076_v24  ;;  %v952_v35 = vmul.f32 %v8861_v60, %v659_v0  ;;  %v8056_v49 = vld [vmem:[#allocation3 + $0x1b0] ss:$36 sps:$4 sm:$0xff]  }
 0x191   : > { %2737 = vst [vmem:[#allocation3 + $0x4e0] sm:$0xf] %v7429_v50  ;;  %2984 = vst [vmem:[#allocation3 + $0x4e4] sm:$0xf] %v7509_v56  ;;  %v1281_v17 = vld [vmem:[#allocation2 + $0x9e] sm:$0xff]  ;;  %v7207_v27 = vpack.c.bf16 %v1034_v8, %v1034_v8  ;;  %5059 = vmatmul.mubr.bf16.gmra.mxu1 %v8056_v49 }
 0x192   : > { %3231 = vst [vmem:[#allocation3 + $0x4e8] sm:$0xf] %v7550_v4  ;;  %1239 = vst [vmem:[#allocation3 + $0x288] sm:$0xf] %v7206_v7  ;;  %v7248_v28 = vpack.c.bf16 %v1281_v17, %v1281_v17  ;;  %v1528_v45 = vld [vmem:[#allocation2 + $0x9f] sm:$0xff]  ;;  %v660_v24 = vmax.f32 %v555_v36, 0.0  ;;  %v7371_v23 = vpack.c.bf16 %v952_v35, %v952_v35 }
 0x193   : > { %1486 = vst [vmem:[#allocation3 + $0x28c] sm:$0xf] %v7247_v39  ;;  %1733 = vst [vmem:[#allocation3 + $0x290] sm:$0xf] %v7288_v38  ;;  %v2266_v53 = vld [vmem:[#allocation2 + $0x99] sm:$0xff]  ;;  %v7289_v14 = vpack.c.bf16 %v1528_v45, %v1528_v45  ;;  %v661_v39 = vmax.f32 %v558_v40, 0.0 }
 0x194   : > { %1978 = vst [vmem:[#allocation3 + $0x24c] sm:$0xf] %v7288_v38  ;;  %2248 = vst [vmem:[#allocation3 + $0x58c] sm:$0xf] %v7391_v63  ;;  %v2758_v29 = vld [vmem:[#allocation2 + $0x9a] sm:$0xff]  ;;  %v7409_v10 = vpack.c.bf16 %v2266_v53, %v2266_v53  ;;  %v953_v9 = vmul.f32 %v8864_v61, %v660_v24 }
 0x195   : > { %2471 = vst [vmem:[#allocation3 + $0x230] sm:$0xf] %v7408_v11  ;;  %2716 = vst [vmem:[#allocation3 + $0x1ec] sm:$0xf] %v7408_v11  ;;  %v7489_v30 = vpack.c.bf16 %v2758_v29, %v2758_v29  ;;  %v3005_v32 = vld [vmem:[#allocation2 + $0x9b] sm:$0xff]  ;;  %v954_v15 = vmul.f32 %v8871_v2, %v661_v39 }
 0x196   : > { %2963 = vst [vmem:[#allocation3 + $0x1f0] sm:$0xf] %v7488_v37  ;;  %3210 = vst [vmem:[#allocation3 + $0x1f4] sm:$0xf] %v7529_v51  ;;  %v7530_v33 = vpack.c.bf16 %v3005_v32, %v3005_v32  ;;  %v8057_v59 = vld [vmem:[#allocation3 + $0x170] ss:$36 sps:$4 sm:$0xff]  }
 0x197   : > { %992 = vst [vmem:[#allocation2 + $0xa8] sm:$0xff] %v951_v48  ;;  %1261 = vst [vmem:[#allocation3 + $0x5a0] sm:$0x3] %v7228_v43  ;;  %v1795_v54 = vld [vmem:[#allocation2 + $0x14f] sm:$0xff]  ;;  %5251 = vmatmul.mubr.bf16.gmra.mxu0 %v8057_v59  ;;  %v7373_v19 = vpack.c.bf16 %v954_v15, %v954_v15 }
 0x198   : > { %1508 = vst [vmem:[#allocation3 + $0x5a4] sm:$0x3] %v7269_v41  ;;  %1755 = vst [vmem:[#allocation3 + $0x5a8] sm:$0x3] %v7310_v42  ;;  %v2288_v52 = vld [vmem:[#allocation2 + $0x149] sm:$0xff]  ;;  %v7350_v50 = vpack.c.bf16 %v1795_v54, %v1795_v54  ;;  %v7372_v42 = vpack.c.bf16 %v953_v9, %v953_v9 }
 0x199   : > { %2000 = vst [vmem:[#allocation3 + $0x564] sm:$0xf] %v7349_v16  ;;  %2493 = vst [vmem:[#allocation3 + $0x548] sm:$0xf] %v7430_v58  ;;  %v2780_v26 = vld [vmem:[#allocation2 + $0x14a] sm:$0xff]  ;;  %v7431_v56 = vpack.c.bf16 %v2288_v52, %v2288_v52 }
 0x19a   : > { %2738 = vst [vmem:[#allocation3 + $0x504] sm:$0xf] %v7430_v58  ;;  %2985 = vst [vmem:[#allocation3 + $0x508] sm:$0xf] %v7510_v20  ;;  %v7511_v4 = vpack.c.bf16 %v2780_v26, %v2780_v26  ;;  %v3027_v5 = vld [vmem:[#allocation2 + $0x14b] sm:$0xff] }
 0x19b   : > { %2227 = vst [vmem:[#allocation3 + $0x298] sm:$0xf] %v7370_v57  ;;  %3232 = vst [vmem:[#allocation3 + $0x50c] sm:$0xf] %v7551_v22  ;;  %v7552_v6 = vpack.c.bf16 %v3027_v5, %v3027_v5  ;;  %v8059_v7 = vld [vmem:[#allocation3 + $0x1fc] ss:$36 sps:$4 sm:$0xff]  }
 0x19c   : > { %1240 = vst [vmem:[#allocation3 + $0x2ac] sm:$0xf] %v7207_v27  ;;  %1487 = vst [vmem:[#allocation3 + $0x2b0] sm:$0xf] %v7248_v28  ;;  %5066 = vmatprep.mubr.bf16.mxu1 %v8059_v7  ;;  %v8061_v41 = vld [vmem:[#allocation3 + $0x1bc] ss:$36 sps:$4 sm:$0xff]  }
 0x19d   : > { %1014 = vst [vmem:[#allocation2 + $0x158] sm:$0xf] %v973_v13  ;;  %1734 = vst [vmem:[#allocation3 + $0x2b4] sm:$0xf] %v7289_v14  ;;  %5258 = vmatprep.mubr.bf16.mxu0 %v8061_v41  ;;  %v8063_v40 = vld [vmem:[#allocation3 + $0x1f8] ss:$36 sps:$4 sm:$0xff]  }
 0x19e   : > { %1979 = vst [vmem:[#allocation3 + $0x270] sm:$0xf] %v7289_v14  ;;  %2472 = vst [vmem:[#allocation3 + $0x254] sm:$0xf] %v7409_v10  ;;  %v1035_v38 = vld [vmem:[#allocation2 + $0xa5] sm:$0xff]  ;;  %5067 = vmatmul.mubr.bf16.gmra.mxu1 %v8063_v40  ;;  %v8127_v40 = vld [vmem:[%s9784_s2 + $0x158] sm:$0xff]  }
 0x19f   : > { %2717 = vst [vmem:[#allocation3 + $0x210] sm:$0xf] %v7409_v10  ;;  %2964 = vst [vmem:[#allocation3 + $0x214] sm:$0xf] %v7489_v30  ;;  %v1282_v60 = vld [vmem:[#allocation2 + $0xa6] sm:$0xff]  ;;  %v7208_v12 = vpack.c.bf16 %v1035_v38, %v1035_v38 }
 0x1a0   : > { %3211 = vst [vmem:[#allocation3 + $0x218] sm:$0xf] %v7530_v33  ;;  %993 = vst [vmem:[#allocation2 + $0xb0] sm:$0xff] %v952_v35  ;;  %v1529_v1 = vld [vmem:[#allocation2 + $0xa7] sm:$0xff]  ;;  %v7249_v63 = vpack.c.bf16 %v1282_v60, %v1282_v60  ;;  %v8064_v54 = vld [vmem:[#allocation3 + $0x1b8] ss:$36 sps:$4 sm:$0xff]  }
 0x1a1   : > { %2001 = vst [vmem:[#allocation3 + $0x588] sm:$0xf] %v7350_v50  ;;  %2494 = vst [vmem:[#allocation3 + $0x56c] sm:$0xf] %v7431_v56  ;;  %v7290_v11 = vpack.c.bf16 %v1529_v1, %v1529_v1  ;;  %v2267_v37 = vld [vmem:[#allocation2 + $0xa1] sm:$0xff]  ;;  %5259 = vmatmul.mubr.bf16.gmra.mxu0 %v8064_v54 }
 0x1a2   : > { %2739 = vst [vmem:[#allocation3 + $0x528] sm:$0xf] %v7431_v56  ;;  %2986 = vst [vmem:[#allocation3 + $0x52c] sm:$0xf] %v7511_v4  ;;  %v2759_v51 = vld [vmem:[#allocation2 + $0xa2] sm:$0xff]  ;;  %v7410_v44 = vpack.c.bf16 %v2267_v37, %v2267_v37  ;;  %v9106_v37 = vpop.f32.mrf.mxu1 }
 0x1a3   : > { %3233 = vst [vmem:[#allocation3 + $0x530] sm:$0xf] %v7552_v6  ;;  %v3006_v46 = vld [vmem:[#allocation2 + $0xa3] sm:$0xff]  ;;  %2228 = vst [vmem:[#allocation3 + $0x2bc] sm:$0xf] %v7371_v23  ;;  %v7490_v48 = vpack.c.bf16 %v2759_v51, %v2759_v51 }
 0x1a4   : > { %v7531_v43 = vpack.c.bf16 %v3006_v46, %v3006_v46  ;;  %994 = vst [vmem:[#allocation2 + $0xb8] sm:$0xff] %v953_v9  ;;  %1241 = vst [vmem:[#allocation3 + $0x2d0] sm:$0xf] %v7208_v12  ;;  %v1796_v61 = vld [vmem:[#allocation2 + $0x157] sm:$0xf]  ;;  %v3029_v27 = vld [vmem:[#allocation2 + $0x15b] sm:$0xff] }
 0x1a5   : > { %1488 = vst [vmem:[#allocation3 + $0x2d4] sm:$0xf] %v7249_v63  ;;  %1735 = vst [vmem:[#allocation3 + $0x2d8] sm:$0xf] %v7290_v11  ;;  %v2043_v34 = vld [vmem:[#allocation2 + $0x158] sm:$0xf]  ;;  %v7351_v2 = vpack.c.bf16 %v1796_v61, %v1796_v61  ;;  %v7554_v53 = vpack.c.bf16 %v3029_v27, %v3029_v27 }
 0x1a6   : > { %1980 = vst [vmem:[#allocation3 + $0x294] sm:$0xf] %v7290_v11  ;;  %v2289_v25 = vld [vmem:[#allocation2 + $0x151] sm:$0xff]  ;;  %995 = vst [vmem:[#allocation2 + $0xc0] sm:$0xff] %v954_v15  ;;  %v7392_v18 = vpack.c.bf16 %v2043_v34, %v2043_v34  ;;  %v2290_v62 = vld [vmem:[#allocation2 + $0x159] sm:$0xf] }
 0x1a7   : > { %2473 = vst [vmem:[#allocation3 + $0x278] sm:$0xf] %v7410_v44  ;;  %2718 = vst [vmem:[#allocation3 + $0x234] sm:$0xf] %v7410_v44  ;;  %v7432_v16 = vpack.c.bf16 %v2289_v25, %v2289_v25  ;;  %v2535_v58 = vld [vmem:[#allocation2 + $0x159] sm:$0xff]  ;;  %v7433_v21 = vpack.c.bf16 %v2290_v62, %v2290_v62  ;;  %v1036_v29 = vld [vmem:[#allocation2 + $0xad] sm:$0xff] }
 0x1a8   : > { %2965 = vst [vmem:[#allocation3 + $0x238] sm:$0xf] %v7490_v48  ;;  %3212 = vst [vmem:[#allocation3 + $0x23c] sm:$0xf] %v7531_v43  ;;  %v2781_v20 = vld [vmem:[#allocation2 + $0x152] sm:$0xff]  ;;  %v7472_v8 = vpack.c.bf16 %v2535_v58, %v2535_v58  ;;  %v2782_v17 = vld [vmem:[#allocation2 + $0x15a] sm:$0xff]  ;;  %v7209_v10 = vpack.c.bf16 %v1036_v29, %v1036_v29 }
 0x1a9   : > { %2229 = vst [vmem:[#allocation3 + $0x2e0] sm:$0xf] %v7372_v42  ;;  %v7512_v57 = vpack.c.bf16 %v2781_v20, %v2781_v20  ;;  %v3028_v22 = vld [vmem:[#allocation2 + $0x153] sm:$0xff]  ;;  %2230 = vst [vmem:[#allocation3 + $0x304] sm:$0xf] %v7373_v19  ;;  %v7513_v28 = vpack.c.bf16 %v2782_v17, %v2782_v17  ;;  %v2268_v31 = vld [vmem:[#allocation2 + $0xa9] sm:$0xff] }
 0x1aa   : > { %2002 = vst [vmem:[#allocation3 + $0x5ac] sm:$0x3] %v7351_v2  ;;  %2249 = vst [vmem:[#allocation3 + $0x5b0] sm:$0x3] %v7392_v18  ;;  %v7553_v45 = vpack.c.bf16 %v3028_v22, %v3028_v22  ;;  %v1283_v13 = vld [vmem:[#allocation2 + $0xae] sm:$0xff]  ;;  %v7411_v47 = vpack.c.bf16 %v2268_v31, %v2268_v31  ;;  %v5014_v2 = vpop.f32.mrf.mxu1  ;;  %v8116_v31 = vld [vmem:[%s9784_s2 + $0x1b8] sm:$0xff]  }
 0x1ab   : > { %2495 = vst [vmem:[#allocation3 + $0x590] sm:$0xf] %v7432_v16  ;;  %2740 = vst [vmem:[#allocation3 + $0x54c] sm:$0xf] %v7432_v16  ;;  %v1530_v14 = vld [vmem:[#allocation2 + $0xaf] sm:$0xff]  ;;  %v7250_v30 = vpack.c.bf16 %v1283_v13, %v1283_v13  ;;  %v1531_v35 = vld [vmem:[#allocation2 + $0xb7] sm:$0xff]  ;;  %5579 = vmatpush1.bf16.msra.mxu0 %v8116_v31 }
 0x1ac   : > { %2496 = vst [vmem:[#allocation3 + $0x5b4] sm:$0x3] %v7433_v21  ;;  %2741 = vst [vmem:[#allocation3 + $0x570] sm:$0xf] %v7472_v8  ;;  %v7291_v32 = vpack.c.bf16 %v1530_v14, %v1530_v14  ;;  %v2760_v0 = vld [vmem:[#allocation2 + $0xaa] sm:$0xff]  ;;  %v1037_v52 = vld [vmem:[#allocation2 + $0xb5] sm:$0xff]  ;;  %v7292_v4 = vpack.c.bf16 %v1531_v35, %v1531_v35  ;;  %v9108_v8 = vpop.f32.mrf.mxu1  ;;  %5580 = vmatprep.subr.bf16.mxu0 %v8345_v3 }
 0x1ad   : > { %2987 = vst [vmem:[#allocation3 + $0x550] sm:$0xf] %v7512_v57  ;;  %v3007_v33 = vld [vmem:[#allocation2 + $0xab] sm:$0xff]  ;;  %2988 = vst [vmem:[#allocation3 + $0x574] sm:$0xf] %v7513_v28  ;;  %v7491_v55 = vpack.c.bf16 %v2760_v0, %v2760_v0  ;;  %v1284_v26 = vld [vmem:[#allocation2 + $0xb6] sm:$0xff]  ;;  %v7210_v50 = vpack.c.bf16 %v1037_v52, %v1037_v52 }
 0x1ae   : > { %3234 = vst [vmem:[#allocation3 + $0x554] sm:$0xf] %v7553_v45  ;;  %3235 = vst [vmem:[#allocation3 + $0x578] sm:$0xf] %v7554_v53  ;;  %v7532_v36 = vpack.c.bf16 %v3007_v33, %v3007_v33  ;;  %v7251_v56 = vpack.c.bf16 %v1284_v26, %v1284_v26  ;;  %v2269_v5 = vld [vmem:[#allocation2 + $0xb1] sm:$0xff]  ;;  %v1038_v7 = vld [vmem:[#allocation2 + $0xbd] sm:$0xff]  ;;  %v5017_v22 = vpop.f32.mrf.mxu1 }
 0x1af   : > { %1242 = vst [vmem:[#allocation3 + $0x2f4] sm:$0xf] %v7209_v10  ;;  %1489 = vst [vmem:[#allocation3 + $0x2f8] sm:$0xf] %v7250_v30  ;;  %v2761_v49 = vld [vmem:[#allocation2 + $0xb2] sm:$0xff]  ;;  %v7412_v24 = vpack.c.bf16 %v2269_v5, %v2269_v5  ;;  %v1039_v39 = vld [vmem:[#allocation2 + $0xc5] sm:$0xff]  ;;  %v7211_v60 = vpack.c.bf16 %v1038_v7, %v1038_v7 }
 0x1b0   : > { %1736 = vst [vmem:[#allocation3 + $0x2fc] sm:$0xf] %v7291_v32  ;;  %1981 = vst [vmem:[#allocation3 + $0x2b8] sm:$0xf] %v7291_v32  ;;  %v3008_v59 = vld [vmem:[#allocation2 + $0xb3] sm:$0xff]  ;;  %v7492_v6 = vpack.c.bf16 %v2761_v49, %v2761_v49  ;;  %v1285_v38 = vld [vmem:[#allocation2 + $0xbe] sm:$0xff]  ;;  %v7212_v1 = vpack.c.bf16 %v1039_v39, %v1039_v39 }
 0x1b1   : > { %2474 = vst [vmem:[#allocation3 + $0x29c] sm:$0xf] %v7411_v47  ;;  %2719 = vst [vmem:[#allocation3 + $0x258] sm:$0xf] %v7411_v47  ;;  %v7533_v23 = vpack.c.bf16 %v3008_v59, %v3008_v59  ;;  %v1286_v9 = vld [vmem:[#allocation2 + $0xc6] sm:$0xff]  ;;  %v7252_v12 = vpack.c.bf16 %v1285_v38, %v1285_v38  ;;  %v2270_v44 = vld [vmem:[#allocation2 + $0xb9] sm:$0xff] }
 0x1b2   : > { %2966 = vst [vmem:[#allocation3 + $0x25c] sm:$0xf] %v7491_v55  ;;  %3213 = vst [vmem:[#allocation3 + $0x260] sm:$0xf] %v7532_v36  ;;  %v1532_v63 = vld [vmem:[#allocation2 + $0xbf] sm:$0xff]  ;;  %v1533_v11 = vld [vmem:[#allocation2 + $0xc7] sm:$0xff]  ;;  %v7253_v51 = vpack.c.bf16 %v1286_v9, %v1286_v9  ;;  %v7413_v41 = vpack.c.bf16 %v2270_v44, %v2270_v44 }
 0x1b3   : > { %1243 = vst [vmem:[#allocation3 + $0x318] sm:$0xf] %v7210_v50  ;;  %1490 = vst [vmem:[#allocation3 + $0x31c] sm:$0xf] %v7251_v56  ;;  %v7293_v46 = vpack.c.bf16 %v1532_v63, %v1532_v63  ;;  %v7294_v15 = vpack.c.bf16 %v1533_v11, %v1533_v11  ;;  %v2271_v48 = vld [vmem:[#allocation2 + $0xc1] sm:$0xff]  ;;  %v8118_v33 = vld [vmem:[%s9784_s2 + $0x1b0] sm:$0xff]  }
 0x1b4   : > { %1737 = vst [vmem:[#allocation3 + $0x320] sm:$0xf] %v7292_v4  ;;  %1982 = vst [vmem:[#allocation3 + $0x2dc] sm:$0xf] %v7292_v4  ;;  %v2762_v43 = vld [vmem:[#allocation2 + $0xba] sm:$0xff]  ;;  %v7414_v42 = vpack.c.bf16 %v2271_v48, %v2271_v48  ;;  %v2763_v61 = vld [vmem:[#allocation2 + $0xc2] sm:$0xff]  ;;  %5581 = vmatpush1.bf16.msra.mxu0 %v8118_v33 }
 0x1b5   : > { %2475 = vst [vmem:[#allocation3 + $0x2c0] sm:$0xf] %v7412_v24  ;;  %2720 = vst [vmem:[#allocation3 + $0x27c] sm:$0xf] %v7412_v24  ;;  %v7493_v34 = vpack.c.bf16 %v2762_v43, %v2762_v43  ;;  %v3009_v25 = vld [vmem:[#allocation2 + $0xbb] sm:$0xff]  ;;  %v3010_v19 = vld [vmem:[#allocation2 + $0xc3] sm:$0xff]  ;;  %v7494_v18 = vpack.c.bf16 %v2763_v61, %v2763_v61  ;;  %5582 = vmatprep.subr.bf16.mxu0 %v8345_v3 }
 0x1b6   : > { %2967 = vst [vmem:[#allocation3 + $0x280] sm:$0xf] %v7492_v6  ;;  %3214 = vst [vmem:[#allocation3 + $0x284] sm:$0xf] %v7533_v23  ;;  %v7534_v62 = vpack.c.bf16 %v3009_v25, %v3009_v25  ;;  %v7535_v16 = vpack.c.bf16 %v3010_v19, %v3010_v19  ;;  %v8065_v58 = vld [vmem:[#allocation3 + $0x244] ss:$36 sps:$4 sm:$0xff]  }
 0x1b7   : > { %1244 = vst [vmem:[#allocation3 + $0x33c] sm:$0xf] %v7211_v60  ;;  %1245 = vst [vmem:[#allocation3 + $0x360] sm:$0xf] %v7212_v1  ;;  %v8067_v20 = vld [vmem:[#allocation3 + $0x204] ss:$36 sps:$4 sm:$0xff]   ;;  %5074 = vmatprep.mubr.bf16.mxu1 %v8065_v58 }
 0x1b8   : > { %1491 = vst [vmem:[#allocation3 + $0x340] sm:$0xf] %v7252_v12  ;;  %1492 = vst [vmem:[#allocation3 + $0x364] sm:$0xf] %v7253_v51  ;;  %v8070_v21 = vld [vmem:[#allocation3 + $0x240] ss:$36 sps:$4 sm:$0xff]   ;;  %5266 = vmatprep.mubr.bf16.mxu0 %v8067_v20 }
 0x1b9   : > { %1738 = vst [vmem:[#allocation3 + $0x344] sm:$0xf] %v7293_v46  ;;  %1739 = vst [vmem:[#allocation3 + $0x368] sm:$0xf] %v7294_v15  ;;  %v8071_v17 = vld [vmem:[#allocation3 + $0x200] ss:$36 sps:$4 sm:$0xff]   ;;  %5075 = vmatmul.mubr.bf16.gmra.mxu1 %v8070_v21 }
 0x1ba   : > { %1983 = vst [vmem:[#allocation3 + $0x300] sm:$0xf] %v7293_v46  ;;  %1984 = vst [vmem:[#allocation3 + $0x324] sm:$0xf] %v7294_v15  ;;  %v8072_v57 = vld [vmem:[#allocation3 + $0x28c] ss:$36 sps:$4 sm:$0xff]   ;;  %5267 = vmatmul.mubr.bf16.gmra.mxu0 %v8071_v17 }
 0x1bb   : > { %2476 = vst [vmem:[#allocation3 + $0x2e4] sm:$0xf] %v7413_v41  ;;  %2477 = vst [vmem:[#allocation3 + $0x308] sm:$0xf] %v7414_v42  ;;  %v8074_v27 = vld [vmem:[#allocation3 + $0x24c] ss:$36 sps:$4 sm:$0xff]   ;;  %5082 = vmatprep.mubr.bf16.mxu1 %v8072_v57 }
 0x1bc   : > { %2721 = vst [vmem:[#allocation3 + $0x2a0] sm:$0xf] %v7413_v41  ;;  %2722 = vst [vmem:[#allocation3 + $0x2c4] sm:$0xf] %v7414_v42  ;;  %5274 = vmatprep.mubr.bf16.mxu0 %v8074_v27  ;;  %v8076_v28 = vld [vmem:[#allocation3 + $0x288] ss:$36 sps:$4 sm:$0xff]  }
 0x1bd   : > { %2968 = vst [vmem:[#allocation3 + $0x2a4] sm:$0xf] %v7493_v34  ;;  %2969 = vst [vmem:[#allocation3 + $0x2c8] sm:$0xf] %v7494_v18  ;;  %v8077_v45 = vld [vmem:[#allocation3 + $0x248] ss:$36 sps:$4 sm:$0xff]  }
 0x1be   : > { %3215 = vst [vmem:[#allocation3 + $0x2a8] sm:$0xf] %v7534_v62  ;;  %3216 = vst [vmem:[#allocation3 + $0x2cc] sm:$0xf] %v7535_v16  ;;  %v8079_v53 = vld [vmem:[#allocation3 + $0x2d4] ss:$36 sps:$4 sm:$0xff]  }
 0x1bf   : > { %v8081_v29 = vld [vmem:[#allocation3 + $0x294] ss:$36 sps:$4 sm:$0xff]   ;;  %v8086_v10 = vld [vmem:[#allocation3 + $0x31c] ss:$36 sps:$4 sm:$0xff]   ;;  %v8117_v0 = vld [vmem:[%s9784_s2 + $0x160] sm:$0xff]  }
 0x1c0   : > { %v8083_v13 = vld [vmem:[#allocation3 + $0x2d0] ss:$36 sps:$4 sm:$0xff]   ;;  %v8090_v47 = vld [vmem:[#allocation3 + $0x318] ss:$36 sps:$4 sm:$0xff]   ;;  %v8092_v36 = vld [vmem:[#allocation3 + $0x364] ss:$36 sps:$4 sm:$0xff]  }
 0x1c1   : > { %5083 = vmatmul.mubr.bf16.gmra.mxu1 %v8076_v28  ;;  %v8084_v14 = vld [vmem:[#allocation3 + $0x290] ss:$36 sps:$4 sm:$0xff]   ;;  %v8088_v30 = vld [vmem:[#allocation3 + $0x2dc] ss:$36 sps:$4 sm:$0xff]   ;;  %v8094_v52 = vld [vmem:[#allocation3 + $0x324] ss:$36 sps:$4 sm:$0xff]  }
 0x1c2   : > { %5275 = vmatmul.mubr.bf16.gmra.mxu0 %v8077_v45  ;;  %5090 = vmatprep.mubr.bf16.mxu1 %v8079_v53  ;;  %v8109_v32 = vld [vmem:[%s9784_s2 + $0x168] sm:$0xff]   ;;  %v8091_v55 = vld [vmem:[#allocation3 + $0x2d8] ss:$36 sps:$4 sm:$0xff]   ;;  %v8126_v26 = vld [vmem:[%s9784_s2 + $0x1a0] sm:$0xff]  }
 0x1c3   : > { %5282 = vmatprep.mubr.bf16.mxu0 %v8081_v29  ;;  %5399 = vmatpush2.bf16.msra.mxu1 %v8109_v32  ;;  %v8125_v54 = vld [vmem:[%s9784_s2 + $0x1a8] sm:$0xff]   ;;  %v8097_v35 = vld [vmem:[#allocation3 + $0x360] ss:$36 sps:$4 sm:$0xff]   ;;  %v8144_v56 = vld [vmem:[%s9784_s2 + $0x150] sm:$0xff]  }
 0x1c4   : > { %5400 = vmatprep.subr.bf16.mxu1 %v8345_v3  ;;  %5583 = vmatpush1.bf16.msra.mxu0 %v8125_v54  ;;  %v8098_v50 = vld [vmem:[#allocation3 + $0x320] ss:$36 sps:$4 sm:$0xff]   ;;  %v8099_v4 = vld [vmem:[#allocation3 + $0x3ac] ss:$36 sps:$4 sm:$0xff]   ;;  %v8135_v24 = vld [vmem:[%s9784_s2 + $0x190] sm:$0xff]  }
 0x1c5   : > { %5584 = vmatprep.subr.bf16.mxu0 %v8345_v3  ;;  %v8134_v5 = vld [vmem:[%s9784_s2 + $0x198] sm:$0xff]   ;;  %v8101_v49 = vld [vmem:[#allocation3 + $0x36c] ss:$36 sps:$4 sm:$0xff]   ;;  %v8105_v39 = vld [vmem:[#allocation3 + $0x3f4] ss:$36 sps:$4 sm:$0xff]  }
 0x1c6   : > { %v8154_v59 = vld [vmem:[%s9784_s2 + $0x148] sm:$0xff]   ;;  %v8163_v6 = vld [vmem:[%s9784_s2 + $0x140] sm:$0xff]   ;;  %v8112_v11 = vld [vmem:[#allocation3 + $0x43c] ss:$36 sps:$4 sm:$0xff]  }
 0x1c7   : > { %5401 = vmatpush2.bf16.msra.mxu1 %v8117_v0  ;;  %v8103_v23 = vld [vmem:[#allocation3 + $0x3a8] ss:$36 sps:$4 sm:$0xff]   ;;  %v8145_v38 = vld [vmem:[%s9784_s2 + $0x188] sm:$0xff]   ;;  %v8153_v51 = vld [vmem:[%s9784_s2 + $0x1f8] sm:$0xff]  }
 0x1c8   : > { %5402 = vmatprep.subr.bf16.mxu1 %v8345_v3  ;;  %5585 = vmatpush1.bf16.msra.mxu0 %v8126_v26  ;;  %v8104_v7 = vld [vmem:[#allocation3 + $0x368] ss:$36 sps:$4 sm:$0xff]   ;;  %v8107_v60 = vld [vmem:[#allocation3 + $0x3b4] ss:$36 sps:$4 sm:$0xff]   ;;  %v8114_v46 = vld [vmem:[#allocation3 + $0x3fc] ss:$36 sps:$4 sm:$0xff]  }
 0x1c9   : > { %5091 = vmatmul.mubr.bf16.gmra.mxu1 %v8083_v13  ;;  %5586 = vmatprep.subr.bf16.mxu0 %v8345_v3  ;;  %v9160_v1 = vld [vmem:[#allocation2] sm:$0xff]  ;;  %v8110_v12 = vld [vmem:[#allocation3 + $0x3f0] ss:$36 sps:$4 sm:$0xff]   ;;  %v8155_v15 = vld [vmem:[%s9784_s2 + $0x1f0] sm:$0xff]  }
 0x1ca   : > { %5283 = vmatmul.mubr.bf16.gmra.mxu0 %v8084_v14  ;;  %5098 = vmatprep.mubr.bf16.mxu1 %v8086_v10  ;;  %v8146_v9 = vld [vmem:[%s9784_s2 + $0x180] sm:$0xff]   ;;  %v8111_v63 = vld [vmem:[#allocation3 + $0x3b0] ss:$36 sps:$4 sm:$0xff]   ;;  %v8119_v44 = vld [vmem:[#allocation3 + $0x438] ss:$36 sps:$4 sm:$0xff]  }
 0x1cb   : > { %5290 = vmatprep.mubr.bf16.mxu0 %v8088_v30  ;;  %5403 = vmatpush2.bf16.msra.mxu1 %v8127_v40  ;;  %v8120_v48 = vld [vmem:[#allocation3 + $0x3f8] ss:$36 sps:$4 sm:$0xff]   ;;  %v8121_v43 = vld [vmem:[#allocation3 + $0x484] ss:$36 sps:$4 sm:$0xff]   ;;  %v8161_v41 = vld [vmem:[%s9784_s2 + $0x1e8] sm:$0xff]  }
 0x1cc   : > { %5404 = vmatprep.subr.bf16.mxu1 %v8345_v3  ;;  %5587 = vmatpush1.bf16.msra.mxu0 %v8134_v5  ;;  %v8123_v42 = vld [vmem:[#allocation3 + $0x444] ss:$36 sps:$4 sm:$0xff]   ;;  %v8130_v19 = vld [vmem:[#allocation3 + $0x4cc] ss:$36 sps:$4 sm:$0xff]   ;;  %v8170_v62 = vld [vmem:[%s9784_s2 + $0x1d0] sm:$0xff]  }
 0x1cd   : > { %5588 = vmatprep.subr.bf16.mxu0 %v8345_v3  ;;  %v8162_v61 = vld [vmem:[%s9784_s2 + $0x1e0] sm:$0xff]   ;;  %v8128_v34 = vld [vmem:[#allocation3 + $0x480] ss:$36 sps:$4 sm:$0xff]   ;;  %v8140_v20 = vld [vmem:[#allocation3 + $0x514] ss:$36 sps:$4 sm:$0xff]  }
 0x1ce   : > { %v8129_v25 = vld [vmem:[#allocation3 + $0x440] ss:$36 sps:$4 sm:$0xff]   ;;  %v8132_v18 = vld [vmem:[#allocation3 + $0x48c] ss:$36 sps:$4 sm:$0xff]   ;;  %v8143_v17 = vld [vmem:[#allocation3 + $0x4d4] ss:$36 sps:$4 sm:$0xff]  }
 0x1cf   : > { %5405 = vmatpush2.bf16.msra.mxu1 %v8144_v56  ;;  %v8169_v2 = vld [vmem:[%s9784_s2 + $0x1d8] sm:$0xff]   ;;  %v8136_v16 = vld [vmem:[#allocation3 + $0x4c8] ss:$36 sps:$4 sm:$0xff]   ;;  %v8175_v21 = vld [vmem:[%s9784_s2 + $0x1c8] sm:$0xff]  }
 0x1d0   : > { %5406 = vmatprep.subr.bf16.mxu1 %v8345_v3  ;;  %5589 = vmatpush1.bf16.msra.mxu0 %v8135_v24  ;;  %v8137_v58 = vld [vmem:[#allocation3 + $0x488] ss:$36 sps:$4 sm:$0xff]   ;;  %v8138_v22 = vld [vmem:[#allocation3 + $0x510] ss:$36 sps:$4 sm:$0xff]   ;;  %v8149_v28 = vld [vmem:[#allocation3 + $0x55c] ss:$36 sps:$4 sm:$0xff]  }
 0x1d1   : > { %5099 = vmatmul.mubr.bf16.gmra.mxu1 %v8090_v47  ;;  %5590 = vmatprep.subr.bf16.mxu0 %v8345_v3  ;;  %v8179_v57 = vld [vmem:[%s9784_s2 + $0x1c0] sm:$0xff]   ;;  %v8141_v27 = vld [vmem:[#allocation3 + $0x4d0] ss:$36 sps:$4 sm:$0xff]   ;;  %v8152_v45 = vld [vmem:[#allocation3 + $0x51c] ss:$36 sps:$4 sm:$0xff]  }
 0x1d2   : > { %5291 = vmatmul.mubr.bf16.gmra.mxu0 %v8091_v55  ;;  %5106 = vmatprep.mubr.bf16.mxu1 %v8092_v36  ;;  %v3438_v53 = vld [vmem:[#allocation3 + $0x5a0] sm:$0x33]  ;;  %v8147_v29 = vld [vmem:[#allocation3 + $0x558] ss:$36 sps:$4 sm:$0xff]   ;;  %v2536_v30 = vld [vmem:[#allocation2 + $0x161] sm:$0xff] }
 0x1d3   : > { %5298 = vmatprep.mubr.bf16.mxu0 %v8094_v52  ;;  %5407 = vmatpush2.bf16.msra.mxu1 %v8154_v59  ;;  %v8150_v13 = vld [vmem:[#allocation3 + $0x518] ss:$36 sps:$4 sm:$0xff]   ;;  %v7097_v14 = vcombine.high %v3438_v53, %v3438_v53  ;;  %v8160_v10 = vld [vmem:[#allocation3 + $0x564] ss:$36 sps:$4 sm:$0xff]   ;;  %v7473_v32 = vpack.c.bf16 %v2536_v30, %v2536_v30  ;;  %v7096_v0 = vcombine.low %v3438_v53, %v3438_v53  ;;  %v8166_v54 = vld [vmem:[#allocation3 + $0x10] ss:$36 sps:$4 sm:$0xff]  }
 0x1d4   : > { %5408 = vmatprep.subr.bf16.mxu1 %v8345_v3  ;;  %5591 = vmatpush1.bf16.msra.mxu0 %v8145_v38  ;;  %v2783_v31 = vld [vmem:[#allocation2 + $0x162] sm:$0xff]  ;;  %v8158_v33 = vld [vmem:[#allocation3 + $0x560] ss:$36 sps:$4 sm:$0xff]   ;;  %v8168_v55 = vld [vmem:[#allocation3 + $0x14] ss:$36 sps:$4 sm:$0xff]  }
 0x1d5   : > { %5592 = vmatprep.subr.bf16.mxu0 %v8345_v3  ;;  %v7514_v47 = vpack.c.bf16 %v2783_v31, %v2783_v31  ;;  %2742 = vst [vmem:[#allocation3 + $0x594] sm:$0xf] %v7473_v32  ;;  %v8171_v40 = vld [vmem:[%s9784_s2 + $0x238] sm:$0xff]   ;;  %v9209_v56 = vld [vmem:[%s9787_s5] ss:$0 sm:$0xff]  ;;  %v8211_v24 = vld [vmem:[%s9784_s2 + $0x228] sm:$0xff]  }
 0x1d6   : > { %v8174_v26 = vld [vmem:[#allocation3 + $0x5c] ss:$36 sps:$4 sm:$0xff]   ;;  %v8198_v53 = vld [vmem:[#allocation3 + $0xf4] ss:$36 sps:$4 sm:$0xff]  }
 0x1d7   : > { %5409 = vmatpush2.bf16.msra.mxu1 %v8163_v6  ;;  %2989 = vst [vmem:[#allocation3 + $0x598] sm:$0xf] %v7514_v47  ;;  %v8176_v5 = vld [vmem:[#allocation3 + $0x18] ss:$36 sps:$4 sm:$0xff]   ;;  %v8182_v6 = vld [vmem:[#allocation3 + $0xa4] ss:$36 sps:$4 sm:$0xff]  }
 0x1d8   : > { %7744 = vmatprep.subr.bf16.mxu1 %v9160_v1  ;;  %5593 = vmatpush1.bf16.msra.mxu0 %v8146_v9  ;;  %v8204_v32 = vld [vmem:[#allocation3 + $0x13c] ss:$36 sps:$4 sm:$0xff]  }
 0x1d9   : > { %5107 = vmatmul.mubr.bf16.gmra.mxu1 %v8097_v35  ;;  %5594 = vmatprep.subr.bf16.mxu0 %v8345_v3  ;;  %v8178_v35 = vld [vmem:[#allocation3 + $0x1c] ss:$36 sps:$4 sm:$0xff]  }
 0x1da   : > { %5299 = vmatmul.mubr.bf16.gmra.mxu0 %v8098_v50  ;;  %5114 = vmatprep.mubr.bf16.mxu1 %v8099_v4  ;;  %v8192_v50 = vld [vmem:[%s9784_s2 + $0x230] sm:$0xff]  }
 0x1db   : > { %5306 = vmatprep.mubr.bf16.mxu0 %v8101_v49  ;;  %v8172_v4 = vld [vmem:[#allocation3 + $0x58] ss:$36 sps:$4 sm:$0xff]   ;;  %v5013_v49 = vadd.f32 %v9209_v56, %v9106_v37  ;;  %v5016_v37 = vadd.f32 %v9209_v56, %v9108_v8  ;;  %v8243_v8 = vld [vmem:[%s9784_s2 + $0x218] sm:$0xff]  }
 0x1dc   : > { %5595 = vmatpush2.bf16.msra.mxu0 %v8153_v51 }
 0x1dd   : > { %5596 = vmatprep.subr.bf16.mxu0 %v8345_v3 }
 0x1de   : > { %v5020_v59 = vpop.f32.mrf.mxu1 }
 0x1e0   : > { %5597 = vmatpush2.bf16.msra.mxu0 %v8155_v15  ;;  %v5022_v38 = vpop.f32.mrf.mxu1 }
 0x1e1   : > { %5115 = vmatmul.mubr.bf16.gmra.mxu1 %v8103_v23  ;;  %5598 = vmatprep.subr.bf16.mxu0 %v8345_v3  ;;  %v5212_v23 = vpop.f32.mrf.mxu0 }
 0x1e2   : > { %5307 = vmatmul.mubr.bf16.gmra.mxu0 %v8104_v7  ;;  %5122 = vmatprep.mubr.bf16.mxu1 %v8105_v39  ;;  %v8185_v7 = vld [vmem:[#allocation3 + $0x64] ss:$36 sps:$4 sm:$0xff]   ;;  %v9218_v39 = vadd.f32 %v5212_v23, %v5013_v49  ;;  %v5023_v9 = vpop.f32.mrf.mxu1  ;;  %v2784_v49 = vld [vmem:[#allocation2 + $0x16a] sm:$0xf] }
 0x1e3   : > { %5314 = vmatprep.mubr.bf16.mxu0 %v8107_v60  ;;  %v5214_v60 = vpop.f32.mrf.mxu0  ;;  %v7515_v23 = vpack.c.bf16 %v2784_v49, %v2784_v49  ;;  %v8231_v49 = vld [vmem:[#allocation3 + $0x2e0] ss:$36 sps:$4 sm:$0xff]  }
 0x1e4   : > { %5599 = vmatpush2.bf16.msra.mxu0 %v8161_v41  ;;  %v5025_v15 = vpop.f32.mrf.mxu1  ;;  %v8188_v41 = vld [vmem:[#allocation3 + $0xec] ss:$36 sps:$4 sm:$0xff]  }
 0x1e5   : > { %5600 = vmatprep.subr.bf16.mxu0 %v8345_v3  ;;  %2990 = vst [vmem:[#allocation3 + $0x5bc] sm:$0x3] %v7515_v23  ;;  %v8208_v15 = vld [vmem:[#allocation3 + $0x180] ss:$36 sps:$4 sm:$0xff]   ;;  %v8239_v23 = vld [vmem:[#allocation3 + $0x32c] ss:$36 sps:$4 sm:$0xff]  }
 0x1e8   : > { %5601 = vmatpush2.bf16.msra.mxu0 %v8162_v61  ;;  %v8191_v61 = vld [vmem:[#allocation3 + $0xac] ss:$36 sps:$4 sm:$0xff]  }
 0x1e9   : > { %5123 = vmatmul.mubr.bf16.gmra.mxu1 %v8110_v12  ;;  %5602 = vmatprep.subr.bf16.mxu0 %v8345_v3  ;;  %v8224_v12 = vld [vmem:[%s9784_s2 + $0x220] sm:$0xff]  }
 0x1ea   : > { %5315 = vmatmul.mubr.bf16.gmra.mxu0 %v8111_v63  ;;  %5130 = vmatprep.mubr.bf16.mxu1 %v8112_v11  ;;  %v3030_v63 = vld [vmem:[#allocation2 + $0x163] sm:$0xff]  ;;  %v5215_v11 = vpop.f32.mrf.mxu0 }
 0x1eb   : > { %5322 = vmatprep.mubr.bf16.mxu0 %v8114_v46  ;;  %v7555_v51 = vpack.c.bf16 %v3030_v63, %v3030_v63  ;;  %v9226_v46 = vadd.f32 %v5215_v11, %v5016_v37  ;;  %v8205_v11 = vld [vmem:[#allocation3 + $0x1c0] ss:$36 sps:$4 sm:$0xff]  }
 0x1ec   : > { %5603 = vmatpush2.bf16.msra.mxu0 %v8169_v2 }
 0x1ed   : > { %5604 = vmatprep.subr.bf16.mxu0 %v8345_v3  ;;  %3236 = vst [vmem:[#allocation3 + $0x59c] sm:$0xf] %v7555_v51 }
 0x1f0   : > { %5605 = vmatpush2.bf16.msra.mxu0 %v8170_v62  ;;  %v8262_v62 = vld [vmem:[%s9784_s2 + $0x210] sm:$0xff]  }
 0x1f1   : > { %5131 = vmatmul.mubr.bf16.gmra.mxu1 %v8119_v44  ;;  %5606 = vmatprep.subr.bf16.mxu0 %v8345_v3  ;;  %v5217_v44 = vpop.f32.mrf.mxu0 }
 0x1f2   : > { %5323 = vmatmul.mubr.bf16.gmra.mxu0 %v8120_v48  ;;  %5138 = vmatprep.mubr.bf16.mxu1 %v8121_v43  ;;  %v8180_v48 = vld [vmem:[#allocation3 + $0xa0] ss:$36 sps:$4 sm:$0xff]   ;;  %v8214_v44 = vld [vmem:[#allocation3 + $0x20c] ss:$36 sps:$4 sm:$0xff]  }
 0x1f3   : > { %5330 = vmatprep.mubr.bf16.mxu0 %v8123_v42  ;;  %v8183_v43 = vld [vmem:[#allocation3 + $0x60] ss:$36 sps:$4 sm:$0xff]   ;;  %v5021_v42 = vadd.f32 %v9209_v56, %v5020_v59 }
 0x1f4   : > { %5607 = vmatpush2.bf16.msra.mxu0 %v8175_v21  ;;  %v8210_v59 = vld [vmem:[#allocation3 + $0x184] ss:$36 sps:$4 sm:$0xff]  }
 0x1f5   : > { %5608 = vmatprep.subr.bf16.mxu0 %v8345_v3  ;;  %v3439_v3 = vld [vmem:[#allocation3 + $0x5a8] sm:$0x33] }
 0x1f6   : > { %v7099_v36 = vcombine.high %v3439_v3, %v3439_v3  ;;  %v7098_v52 = vcombine.low %v3439_v3, %v3439_v3  ;;  %v8201_v3 = vld [vmem:[#allocation3 + $0x17c] ss:$36 sps:$4 sm:$0xff]  }
 0x1f8   : > { %5609 = vmatpush2.bf16.msra.mxu0 %v8179_v57 }
 0x1f9   : > { %5139 = vmatmul.mubr.bf16.gmra.mxu1 %v8128_v34  ;;  %7844 = vmatprep.subr.bf16.mxu0 %v9160_v1  ;;  %v5028_v34 = vpop.f32.mrf.mxu1 }
 0x1fa   : > { %5331 = vmatmul.mubr.bf16.gmra.mxu0 %v8129_v25  ;;  %5146 = vmatprep.mubr.bf16.mxu1 %v8130_v19  ;;  %v5220_v25 = vpop.f32.mrf.mxu0 }
 0x1fb   : > { %5338 = vmatprep.mubr.bf16.mxu0 %v8132_v18  ;;  %v9233_v19 = vadd.f32 %v5220_v25, %v5021_v42  ;;  %v5030_v2 = vpop.f32.mrf.mxu1  ;;  %v8212_v42 = vld [vmem:[#allocation3 + $0x208] ss:$36 sps:$4 sm:$0xff]   ;;  %v8220_v25 = vld [vmem:[#allocation3 + $0x254] ss:$36 sps:$4 sm:$0xff]  }
 0x1fc   : > { %v5222_v18 = vpop.f32.mrf.mxu0  ;;  %v8223_v2 = vld [vmem:[#allocation3 + $0x214] ss:$36 sps:$4 sm:$0xff]  }
 0x201   : > { %5147 = vmatmul.mubr.bf16.gmra.mxu1 %v8136_v16  ;;  %v5024_v16 = vadd.f32 %v9209_v56, %v5023_v9 }
 0x202   : > { %5339 = vmatmul.mubr.bf16.gmra.mxu0 %v8137_v58  ;;  %5154 = vmatprep.mubr.bf16.mxu1 %v8140_v20  ;;  %v5031_v58 = vpop.f32.mrf.mxu1  ;;  %v5223_v20 = vpop.f32.mrf.mxu0 }
 0x203   : > { %5346 = vmatprep.mubr.bf16.mxu0 %v8143_v17  ;;  %v9240_v21 = vadd.f32 %v5223_v20, %v5024_v16  ;;  %v8186_v17 = vld [vmem:[#allocation3 + $0xe8] ss:$36 sps:$4 sm:$0xff]  }
 0x204   : > { %v5033_v57 = vpop.f32.mrf.mxu1 }
 0x209   : > { %5155 = vmatmul.mubr.bf16.gmra.mxu1 %v8138_v22  ;;  %v5225_v22 = vpop.f32.mrf.mxu0 }
 0x20a   : > { %5347 = vmatmul.mubr.bf16.gmra.mxu0 %v8141_v27  ;;  %5162 = vmatprep.mubr.bf16.mxu1 %v8149_v28  ;;  %v8275_v27 = vld [vmem:[%s9784_s2 + $0x208] sm:$0xff]   ;;  %v8189_v28 = vld [vmem:[#allocation3 + $0xa8] ss:$36 sps:$4 sm:$0xff]  }
 0x20b   : > { %5354 = vmatprep.mubr.bf16.mxu0 %v8152_v45  ;;  %v8195_v45 = vld [vmem:[#allocation3 + $0x134] ss:$36 sps:$4 sm:$0xff]  }
 0x211   : > { %5163 = vmatmul.mubr.bf16.gmra.mxu1 %v8147_v29  ;;  %v8294_v29 = vld [vmem:[%s9784_s2 + $0x200] sm:$0xff]  }
 0x212   : > { %5355 = vmatmul.mubr.bf16.gmra.mxu0 %v8150_v13  ;;  %5170 = vmatprep.mubr.bf16.mxu1 %v7097_v14  ;;  %v5036_v13 = vpop.f32.mrf.mxu1  ;;  %v8193_v14 = vld [vmem:[#allocation3 + $0x130] ss:$36 sps:$4 sm:$0xff]  }
 0x213   : > { %5362 = vmatprep.mubr.bf16.mxu0 %v8160_v10  ;;  %v8196_v10 = vld [vmem:[#allocation3 + $0xf0] ss:$36 sps:$4 sm:$0xff]   ;;  %v5037_v60 = vadd.f32 %v9209_v56, %v5036_v13  ;;  %v8227_v13 = vld [vmem:[#allocation3 + $0x29c] ss:$36 sps:$4 sm:$0xff]  }
 0x214   : > { %v5038_v30 = vpop.f32.mrf.mxu1 }
 0x216   : > { %v5039_v31 = vpop.f32.mrf.mxu1 }
 0x217   : > { %v5040_v51 = vadd.f32 %v9209_v56, %v5039_v31  ;;  %v8228_v31 = vld [vmem:[#allocation3 + $0x258] ss:$36 sps:$4 sm:$0xff]  }
 0x218   : > { %v5041_v47 = vpop.f32.mrf.mxu1 }
 0x219   : > { %5171 = vmatmul.mubr.bf16.gmra.mxu1 %v7096_v0  ;;  %v5029_v0 = vadd.f32 %v9209_v56, %v5028_v34  ;;  %v8236_v47 = vld [vmem:[#allocation3 + $0x2a4] ss:$36 sps:$4 sm:$0xff]  }
 0x21a   : > { %5363 = vmatmul.mubr.bf16.gmra.mxu0 %v8158_v33  ;;  %5410 = vmatprep.mubr.bf16.mxu1 %v8168_v55  ;;  %v5228_v33 = vpop.f32.mrf.mxu0 }
 0x21b   : > { %5370 = vmatprep.mubr.bf16.mxu0 %v7099_v36  ;;  %v9251_v55 = vadd.f32 %v5228_v33, %v5029_v0  ;;  %v8233_v33 = vld [vmem:[#allocation3 + $0x2e4] ss:$36 sps:$4 sm:$0xff]  }
 0x21c   : > { %v5230_v36 = vpop.f32.mrf.mxu0 }
 0x221   : > { %5411 = vmatmul.mubr.bf16.vlgmr.msra.gmra.mxu1 %v8166_v54  ;;  %v8199_v54 = vld [vmem:[#allocation3 + $0x178] ss:$36 sps:$4 sm:$0xff]  }
 0x222   : > { %5371 = vmatmul.mubr.bf16.gmra.mxu0 %v7098_v52  ;;  %7745 = vmatpush3.bf16.msra.mxu1 %v8171_v40  ;;  %v5044_v40 = vpop.f32.mrf.mxu1  ;;  %v8202_v52 = vld [vmem:[#allocation3 + $0x138] ss:$36 sps:$4 sm:$0xff]  }
 0x223   : > { %5418 = vmatprep.mubr.bf16.mxu1 %v8174_v26  ;;  %5610 = vmatprep.mubr.bf16.mxu0 %v8178_v35  ;;  %v5032_v26 = vadd.f32 %v9209_v56, %v5031_v58  ;;  %v8207_v35 = vld [vmem:[#allocation3 + $0x1c4] ss:$36 sps:$4 sm:$0xff]   ;;  %v5045_v34 = vadd.f32 %v9209_v56, %v5044_v40 }
 0x224   : > { %7746 = vmatprep.subr.bf16.mxu1 %v9160_v1 }
 0x226   : > { %7747 = vmatpush3.bf16.msra.mxu1 %v8192_v50  ;;  %v5231_v50 = vpop.f32.mrf.mxu0 }
 0x227   : > { %7748 = vmatprep.subr.bf16.mxu1 %v9160_v1 }
 0x229   : > { %5419 = vmatmul.mubr.bf16.gmra.mxu1 %v8172_v4  ;;  %v5046_v4 = vpop.f32.mrf.mxu1 }
 0x22a   : > { %5611 = vmatmul.mubr.bf16.vlgmr.msra.gmra.mxu0 %v8176_v5  ;;  %5426 = vmatprep.mubr.bf16.mxu1 %v8182_v6  ;;  %v2537_v5 = vld [vmem:[#allocation2 + $0x169] sm:$0xf] }
 0x22b   : > { %5618 = vmatprep.mubr.bf16.mxu0 %v8185_v7  ;;  %7749 = vmatpush3.bf16.msra.mxu1 %v8211_v24  ;;  %v9254_v24 = vadd.f32 %v5231_v50, %v5032_v26  ;;  %v7474_v6 = vpack.c.bf16 %v2537_v5, %v2537_v5  ;;  %v5233_v7 = vpop.f32.mrf.mxu0  ;;  %v5047_v38 = vpop.f32.mrf.mxu1  ;;  %v8307_v50 = vld [vmem:[%s9785_s3 + $0x38] sm:$0xff]  }
 0x22c   : > { %7750 = vmatprep.subr.bf16.mxu1 %v9160_v1  ;;  %7845 = vmatpush3.bf16.msra.mxu0 %v8307_v50 }
 0x22d   : > { %2743 = vst [vmem:[#allocation3 + $0x5b8] sm:$0x3] %v7474_v6  ;;  %v5236_v37 = vpop.f32.mrf.mxu0  ;;  %v5049_v9 = vpop.f32.mrf.mxu1  ;;  %7846 = vmatprep.subr.bf16.mxu0 %v9160_v1  ;;  %v8234_v6 = vld [vmem:[#allocation3 + $0x2a0] ss:$36 sps:$4 sm:$0xff]  }
 0x22f   : > { %7751 = vmatpush3.bf16.msra.mxu1 %v8224_v12  ;;  %v9257_v12 = vadd.f32 %v5236_v37, %v5037_v60  ;;  %v5238_v63 = vpop.f32.mrf.mxu0  ;;  %v8242_v60 = vld [vmem:[#allocation3 + $0x2ec] ss:$36 sps:$4 sm:$0xff]  }
 0x230   : > { %7752 = vmatprep.subr.bf16.mxu1 %v9160_v1 }
 0x231   : > { %5427 = vmatmul.mubr.bf16.gmra.mxu1 %v8180_v48  ;;  %v5239_v48 = vpop.f32.mrf.mxu0 }
 0x232   : > { %5619 = vmatmul.mubr.bf16.gmra.mxu0 %v8183_v43  ;;  %5434 = vmatprep.mubr.bf16.mxu1 %v8188_v41  ;;  %v9260_v43 = vadd.f32 %v5239_v48, %v5040_v51  ;;  %v8237_v48 = vld [vmem:[#allocation3 + $0x328] ss:$36 sps:$4 sm:$0xff]  }
 0x233   : > { %5626 = vmatprep.mubr.bf16.mxu0 %v8191_v61  ;;  %7753 = vmatpush3.bf16.msra.mxu1 %v8243_v8  ;;  %v8217_v8 = vld [vmem:[#allocation3 + $0x1cc] ss:$36 sps:$4 sm:$0xff]   ;;  %v5241_v41 = vpop.f32.mrf.mxu0 }
 0x234   : > { %7754 = vmatprep.subr.bf16.mxu1 %v9160_v1  ;;  %v8215_v61 = vld [vmem:[#allocation3 + $0x1c8] ss:$36 sps:$4 sm:$0xff]  }
 0x237   : > { %7755 = vmatpush3.bf16.msra.mxu1 %v8262_v62 }
 0x238   : > { %7756 = vmatprep.subr.bf16.mxu1 %v9160_v1 }
 0x239   : > { %5435 = vmatmul.mubr.bf16.gmra.mxu1 %v8186_v17  ;;  %v5052_v18 = vpop.f32.mrf.mxu1  ;;  %v5048_v17 = vadd.f32 %v9209_v56, %v5047_v38 }
 0x23a   : > { %5627 = vmatmul.mubr.bf16.gmra.mxu0 %v8189_v28  ;;  %5442 = vmatprep.mubr.bf16.mxu1 %v8195_v45  ;;  %v5244_v62 = vpop.f32.mrf.mxu0  ;;  %v8218_v28 = vld [vmem:[#allocation3 + $0x250] ss:$36 sps:$4 sm:$0xff]  }
 0x23b   : > { %5634 = vmatprep.mubr.bf16.mxu0 %v8198_v53  ;;  %7757 = vmatpush3.bf16.msra.mxu1 %v8275_v27  ;;  %v9263_v16 = vadd.f32 %v5244_v62, %v5045_v34  ;;  %v5054_v58 = vpop.f32.mrf.mxu1 }
 0x23c   : > { %7758 = vmatprep.subr.bf16.mxu1 %v9160_v1  ;;  %v5246_v20 = vpop.f32.mrf.mxu0 }
 0x23d   : > { %v5055_v57 = vpop.f32.mrf.mxu1 }
 0x23e   : > { %v5247_v22 = vpop.f32.mrf.mxu0 }
 0x23f   : > { %7759 = vmatpush3.bf16.msra.mxu1 %v8294_v29  ;;  %v9266_v27 = vadd.f32 %v5247_v22, %v5048_v17  ;;  %v5057_v45 = vpop.f32.mrf.mxu1  ;;  %v8221_v29 = vld [vmem:[#allocation3 + $0x210] ss:$36 sps:$4 sm:$0xff]  }
 0x240   : > { %v5249_v53 = vpop.f32.mrf.mxu0 }
 0x241   : > { %5443 = vmatmul.mubr.bf16.gmra.mxu1 %v8193_v14  ;;  %v8230_v14 = vld [vmem:[#allocation3 + $0x25c] ss:$36 sps:$4 sm:$0xff]  }
 0x242   : > { %5635 = vmatmul.mubr.bf16.gmra.mxu0 %v8196_v10  ;;  %5450 = vmatprep.mubr.bf16.mxu1 %v8201_v3  ;;  %v5053_v10 = vadd.f32 %v9209_v56, %v5052_v18  ;;  %v8225_v3 = vld [vmem:[#allocation3 + $0x298] ss:$36 sps:$4 sm:$0xff]  }
 0x243   : > { %5642 = vmatprep.mubr.bf16.mxu0 %v8204_v32 }
 0x249   : > { %5451 = vmatmul.mubr.bf16.gmra.mxu1 %v8199_v54  ;;  %v5056_v54 = vadd.f32 %v9209_v56, %v5055_v57 }
 0x24a   : > { %5643 = vmatmul.mubr.bf16.gmra.mxu0 %v8202_v52  ;;  %5458 = vmatprep.mubr.bf16.mxu1 %v8207_v35 }
 0x24b   : > { %5650 = vmatprep.mubr.bf16.mxu0 %v8210_v59 }
 0x251   : > { %5459 = vmatmul.mubr.bf16.gmra.mxu1 %v8205_v11  ;;  %v5060_v30 = vpop.f32.mrf.mxu1 }
 0x252   : > { %5651 = vmatmul.mubr.bf16.gmra.mxu0 %v8208_v15  ;;  %5466 = vmatprep.mubr.bf16.mxu1 %v8214_v44  ;;  %v5061_v59 = vadd.f32 %v9209_v56, %v5060_v30  ;;  %v8255_v30 = vld [vmem:[#allocation3 + $0x37c] ss:$36 sps:$4 sm:$0xff]  }
 0x253   : > { %5658 = vmatprep.mubr.bf16.mxu0 %v8217_v8  ;;  %v5062_v36 = vpop.f32.mrf.mxu1 }
 0x255   : > { %v5063_v52 = vpop.f32.mrf.mxu1 }
 0x256   : > { %v5064_v11 = vadd.f32 %v9209_v56, %v5063_v52 }
 0x257   : > { %v5252_v32 = vpop.f32.mrf.mxu0  ;;  %v5065_v4 = vpop.f32.mrf.mxu1 }
 0x258   : > { %v9269_v0 = vadd.f32 %v5252_v32, %v5053_v10 }
 0x259   : > { %5467 = vmatmul.mubr.bf16.gmra.mxu1 %v8212_v42  ;;  %v5254_v40 = vpop.f32.mrf.mxu0  ;;  %v8240_v42 = vld [vmem:[#allocation3 + $0x2e8] ss:$36 sps:$4 sm:$0xff]  }
 0x25a   : > { %5659 = vmatmul.mubr.bf16.gmra.mxu0 %v8215_v61  ;;  %5474 = vmatprep.mubr.bf16.mxu1 %v8220_v25  ;;  %v8246_v61 = vld [vmem:[#allocation3 + $0x374] ss:$36 sps:$4 sm:$0xff]  }
 0x25b   : > { %5666 = vmatprep.mubr.bf16.mxu0 %v8223_v2  ;;  %v5255_v26 = vpop.f32.mrf.mxu0  ;;  %v8249_v2 = vld [vmem:[#allocation3 + $0x334] ss:$36 sps:$4 sm:$0xff]  }
 0x25c   : > { %v9272_v35 = vadd.f32 %v5255_v26, %v5056_v54  ;;  %v8250_v26 = vld [vmem:[#allocation3 + $0x3b8] ss:$36 sps:$4 sm:$0xff]  }
 0x25d   : > { %v5257_v5 = vpop.f32.mrf.mxu0 }
 0x25e   : > { %v5068_v7 = vpop.f32.mrf.mxu1  ;;  %v8253_v5 = vld [vmem:[#allocation3 + $0x378] ss:$36 sps:$4 sm:$0xff]  }
 0x25f   : > { %v5069_v34 = vadd.f32 %v9209_v56, %v5068_v7  ;;  %v8261_v7 = vld [vmem:[#allocation3 + $0x3c4] ss:$36 sps:$4 sm:$0xff]  }
 0x260   : > { %v5070_v9 = vpop.f32.mrf.mxu1 }
 0x261   : > { %5475 = vmatmul.mubr.bf16.gmra.mxu1 %v8218_v28  ;;  %v5260_v38 = vpop.f32.mrf.mxu0  ;;  %v8244_v28 = vld [vmem:[#allocation3 + $0x370] ss:$36 sps:$4 sm:$0xff]  }
 0x262   : > { %5667 = vmatmul.mubr.bf16.gmra.mxu0 %v8221_v29  ;;  %5482 = vmatprep.mubr.bf16.mxu1 %v8227_v13  ;;  %v9279_v37 = vadd.f32 %v5260_v38, %v5061_v59  ;;  %v5071_v51 = vpop.f32.mrf.mxu1  ;;  %v8247_v29 = vld [vmem:[#allocation3 + $0x330] ss:$36 sps:$4 sm:$0xff]   ;;  %v8258_v59 = vld [vmem:[#allocation3 + $0x404] ss:$36 sps:$4 sm:$0xff]  }
 0x263   : > { %5674 = vmatprep.mubr.bf16.mxu0 %v8230_v14  ;;  %v5262_v63 = vpop.f32.mrf.mxu0  ;;  %v5072_v17 = vadd.f32 %v9209_v56, %v5071_v51  ;;  %v8252_v14 = vld [vmem:[#allocation3 + $0x3bc] ss:$36 sps:$4 sm:$0xff]  }
 0x264   : > { %v5073_v8 = vpop.f32.mrf.mxu1 }
 0x265   : > { %v5263_v15 = vpop.f32.mrf.mxu0 }
 0x266   : > { %v9282_v44 = vadd.f32 %v5263_v15, %v5064_v11  ;;  %v8256_v15 = vld [vmem:[#allocation3 + $0x400] ss:$36 sps:$4 sm:$0xff]  }
 0x267   : > { %v5265_v41 = vpop.f32.mrf.mxu0 }
 0x268   : > { %v8259_v41 = vld [vmem:[#allocation3 + $0x3c0] ss:$36 sps:$4 sm:$0xff]  }
 0x269   : > { %5483 = vmatmul.mubr.bf16.gmra.mxu1 %v8225_v3 }
 0x26a   : > { %5675 = vmatmul.mubr.bf16.gmra.mxu0 %v8228_v31  ;;  %5490 = vmatprep.mubr.bf16.mxu1 %v8233_v33 }
 0x26b   : > { %5682 = vmatprep.mubr.bf16.mxu0 %v8236_v47  ;;  %v8311_v47 = vld [vmem:[%s9785_s3 + $0x30] sm:$0xff]  }
 0x26c   : > { %7847 = vmatpush3.bf16.msra.mxu0 %v8311_v47  ;;  %v8274_v47 = vld [vmem:[#allocation3 + $0x454] ss:$36 sps:$4 sm:$0xff]  }
 0x26d   : > { %7848 = vmatprep.subr.bf16.mxu0 %v9160_v1 }
 0x271   : > { %5491 = vmatmul.mubr.bf16.gmra.mxu1 %v8231_v49 }
 0x272   : > { %5683 = vmatmul.mubr.bf16.gmra.mxu0 %v8234_v6  ;;  %5498 = vmatprep.mubr.bf16.mxu1 %v8239_v23 }
 0x273   : > { %5690 = vmatprep.mubr.bf16.mxu0 %v8242_v60 }
 0x279   : > { %v5076_v25 = vpop.f32.mrf.mxu1  ;;  %5499 = vmatmul.mubr.bf16.gmra.mxu1 %v8237_v48 }
 0x27a   : > { %v5268_v18 = vpop.f32.mrf.mxu0  ;;  %5691 = vmatmul.mubr.bf16.gmra.mxu0 %v8240_v42  ;;  %5506 = vmatprep.mubr.bf16.mxu1 %v8246_v61  ;;  %v5077_v10 = vadd.f32 %v9209_v56, %v5076_v25  ;;  %v8265_v61 = vld [vmem:[#allocation3 + $0x44c] ss:$36 sps:$4 sm:$0xff]  }
 0x27b   : > { %v9285_v62 = vadd.f32 %v5268_v18, %v5069_v34  ;;  %5698 = vmatprep.mubr.bf16.mxu0 %v8249_v2  ;;  %v5078_v58 = vpop.f32.mrf.mxu1  ;;  %v8268_v2 = vld [vmem:[#allocation3 + $0x40c] ss:$36 sps:$4 sm:$0xff]  }
 0x27c   : > { %v5270_v20 = vpop.f32.mrf.mxu0 }
 0x27d   : > { %v5079_v57 = vpop.f32.mrf.mxu1 }
 0x27e   : > { %v5271_v22 = vpop.f32.mrf.mxu0  ;;  %v5080_v40 = vadd.f32 %v9209_v56, %v5079_v57 }
 0x27f   : > { %v9288_v45 = vadd.f32 %v5271_v22, %v5072_v17  ;;  %v5081_v53 = vpop.f32.mrf.mxu1 }
 0x280   : > { %v5273_v13 = vpop.f32.mrf.mxu0  ;;  %v8263_v53 = vld [vmem:[#allocation3 + $0x448] ss:$36 sps:$4 sm:$0xff]  }
 0x281   : > { %v5084_v3 = vpop.f32.mrf.mxu1  ;;  %5507 = vmatmul.mubr.bf16.gmra.mxu1 %v8244_v28 }
 0x282   : > { %v5276_v32 = vpop.f32.mrf.mxu0  ;;  %5699 = vmatmul.mubr.bf16.gmra.mxu0 %v8247_v29  ;;  %5514 = vmatprep.mubr.bf16.mxu1 %v8252_v14  ;;  %v5085_v6 = vadd.f32 %v9209_v56, %v5084_v3  ;;  %v8314_v14 = vld [vmem:[%s9785_s3 + $0x28] sm:$0xff]  }
 0x283   : > { %v9291_v31 = vadd.f32 %v5276_v32, %v5077_v10  ;;  %5706 = vmatprep.mubr.bf16.mxu0 %v8255_v30  ;;  %v5086_v33 = vpop.f32.mrf.mxu1  ;;  %v8266_v10 = vld [vmem:[#allocation3 + $0x408] ss:$36 sps:$4 sm:$0xff]   ;;  %v8271_v30 = vld [vmem:[#allocation3 + $0x494] ss:$36 sps:$4 sm:$0xff]   ;;  %7849 = vmatpush3.bf16.msra.mxu0 %v8314_v14 }
 0x284   : > { %v5278_v36 = vpop.f32.mrf.mxu0 }
 0x285   : > { %v5087_v54 = vpop.f32.mrf.mxu1 }
 0x286   : > { %v5279_v52 = vpop.f32.mrf.mxu0  ;;  %v5088_v63 = vadd.f32 %v9209_v56, %v5087_v54 }
 0x287   : > { %v9298_v50 = vadd.f32 %v5279_v52, %v5080_v40  ;;  %v5089_v4 = vpop.f32.mrf.mxu1  ;;  %v9318_v52 = vld [vmem:[#allocation2] sm:$0xff] }
 0x288   : > { %v5281_v49 = vpop.f32.mrf.mxu0  ;;  %7850 = vmatprep.subr.bf16.mxu0 %v9318_v52 }
 0x289   : > { %v5092_v23 = vpop.f32.mrf.mxu1  ;;  %5515 = vmatmul.mubr.bf16.gmra.mxu1 %v8250_v26 }
 0x28a   : > { %v5284_v38 = vpop.f32.mrf.mxu0  ;;  %5707 = vmatmul.mubr.bf16.gmra.mxu0 %v8253_v5  ;;  %5522 = vmatprep.mubr.bf16.mxu1 %v8258_v59  ;;  %v5093_v34 = vadd.f32 %v9209_v56, %v5092_v23  ;;  %v8269_v59 = vld [vmem:[#allocation3 + $0x490] ss:$36 sps:$4 sm:$0xff]  }
 0x28b   : > { %v9301_v60 = vadd.f32 %v5284_v38, %v5085_v6  ;;  %5714 = vmatprep.mubr.bf16.mxu0 %v8261_v7  ;;  %v5094_v9 = vpop.f32.mrf.mxu1  ;;  %v8272_v7 = vld [vmem:[#allocation3 + $0x450] ss:$36 sps:$4 sm:$0xff]  }
 0x28c   : > { %v5286_v1 = vpop.f32.mrf.mxu0  ;;  %v8278_v9 = vld [vmem:[#allocation3 + $0x4dc] ss:$36 sps:$4 sm:$0xff]  }
 0x28d   : > { %v5095_v11 = vpop.f32.mrf.mxu1 }
 0x28e   : > { %v5287_v51 = vpop.f32.mrf.mxu0  ;;  %v5096_v57 = vadd.f32 %v9209_v56, %v5095_v11  ;;  %v8281_v11 = vld [vmem:[#allocation3 + $0x49c] ss:$36 sps:$4 sm:$0xff]  }
 0x28f   : > { %v9304_v48 = vadd.f32 %v5287_v51, %v5088_v63  ;;  %v5097_v8 = vpop.f32.mrf.mxu1 }
 0x290   : > { %v5289_v42 = vpop.f32.mrf.mxu0 }
 0x291   : > { %v5100_v25 = vpop.f32.mrf.mxu1  ;;  %5523 = vmatmul.mubr.bf16.gmra.mxu1 %v8256_v15 }
 0x292   : > { %v5292_v18 = vpop.f32.mrf.mxu0  ;;  %5715 = vmatmul.mubr.bf16.gmra.mxu0 %v8259_v41  ;;  %5530 = vmatprep.mubr.bf16.mxu1 %v8265_v61  ;;  %v5101_v32 = vadd.f32 %v9209_v56, %v5100_v25  ;;  %v8276_v25 = vld [vmem:[#allocation3 + $0x4d8] ss:$36 sps:$4 sm:$0xff]  }
 0x293   : > { %v9307_v58 = vadd.f32 %v5292_v18, %v5093_v34  ;;  %5722 = vmatprep.mubr.bf16.mxu0 %v8268_v2  ;;  %v5102_v20 = vpop.f32.mrf.mxu1 }
 0x294   : > { %v5294_v17 = vpop.f32.mrf.mxu0  ;;  %v8279_v20 = vld [vmem:[#allocation3 + $0x498] ss:$36 sps:$4 sm:$0xff]  }
 0x295   : > { %v5103_v22 = vpop.f32.mrf.mxu1 }
 0x296   : > { %v5295_v28 = vpop.f32.mrf.mxu0  ;;  %v5104_v4 = vadd.f32 %v9209_v56, %v5103_v22 }
 0x297   : > { %v9310_v29 = vadd.f32 %v5295_v28, %v5096_v57  ;;  %v5105_v13 = vpop.f32.mrf.mxu1  ;;  %v8284_v57 = vld [vmem:[#allocation3 + $0x524] ss:$36 sps:$4 sm:$0xff]  }
 0x298   : > { %v5297_v3 = vpop.f32.mrf.mxu0 }
 0x299   : > { %v5108_v33 = vpop.f32.mrf.mxu1  ;;  %5531 = vmatmul.mubr.bf16.gmra.mxu1 %v8263_v53  ;;  %v8287_v53 = vld [vmem:[#allocation3 + $0x4e4] ss:$36 sps:$4 sm:$0xff]  }
 0x29a   : > { %v5300_v36 = vpop.f32.mrf.mxu0  ;;  %5723 = vmatmul.mubr.bf16.gmra.mxu0 %v8266_v10  ;;  %5538 = vmatprep.mubr.bf16.mxu1 %v8271_v30  ;;  %v5109_v1 = vadd.f32 %v9209_v56, %v5108_v33  ;;  %v8318_v30 = vld [vmem:[%s9785_s3 + $0x20] sm:$0xff]  }
 0x29b   : > { %v9316_v40 = vadd.f32 %v5300_v36, %v5101_v32  ;;  %5730 = vmatprep.mubr.bf16.mxu0 %v8274_v47  ;;  %v5110_v54 = vpop.f32.mrf.mxu1  ;;  %7851 = vmatpush3.bf16.msra.mxu0 %v8318_v30  ;;  %v8282_v36 = vld [vmem:[#allocation3 + $0x520] ss:$36 sps:$4 sm:$0xff]  }
 0x29c   : > { %v5302_v26 = vpop.f32.mrf.mxu0  ;;  %7852 = vmatprep.subr.bf16.mxu0 %v9318_v52 }
 0x29d   : > { %v5111_v5 = vpop.f32.mrf.mxu1 }
 0x29e   : > { %v5303_v49 = vpop.f32.mrf.mxu0  ;;  %v5112_v42 = vadd.f32 %v9209_v56, %v5111_v5 }
 0x29f   : > { %v9322_v6 = vadd.f32 %v5303_v49, %v5104_v4  ;;  %v5113_v23 = vpop.f32.mrf.mxu1  ;;  %v8285_v4 = vld [vmem:[#allocation3 + $0x4e0] ss:$36 sps:$4 sm:$0xff]   ;;  %v8290_v49 = vld [vmem:[#allocation3 + $0x56c] ss:$36 sps:$4 sm:$0xff]  }
 0x2a0   : > { %v5305_v38 = vpop.f32.mrf.mxu0 }
 0x2a1   : > { %v5116_v63 = vpop.f32.mrf.mxu1  ;;  %5539 = vmatmul.mubr.bf16.gmra.mxu1 %v8269_v59 }
 0x2a2   : > { %v5308_v51 = vpop.f32.mrf.mxu0  ;;  %5731 = vmatmul.mubr.bf16.gmra.mxu0 %v8272_v7  ;;  %5546 = vmatprep.mubr.bf16.mxu1 %v8278_v9  ;;  %v5117_v22 = vadd.f32 %v9209_v56, %v5116_v63  ;;  %v8293_v7 = vld [vmem:[#allocation3 + $0x52c] ss:$36 sps:$4 sm:$0xff]  }
 0x2a3   : > { %v9325_v15 = vadd.f32 %v5308_v51, %v5109_v1  ;;  %5738 = vmatprep.mubr.bf16.mxu0 %v8281_v11  ;;  %v5118_v8 = vpop.f32.mrf.mxu1 }
 0x2a4   : > { %v5310_v41 = vpop.f32.mrf.mxu0  ;;  %v3440_v8 = vld [vmem:[#allocation3 + $0x5b0] sm:$0x33] }
 0x2a5   : > { %v5119_v61 = vpop.f32.mrf.mxu1 }
 0x2a6   : > { %v5311_v34 = vpop.f32.mrf.mxu0  ;;  %v5120_v32 = vadd.f32 %v9209_v56, %v5119_v61 }
 0x2a7   : > { %v9328_v2 = vadd.f32 %v5311_v34, %v5112_v42  ;;  %v5121_v18 = vpop.f32.mrf.mxu1  ;;  %v8288_v42 = vld [vmem:[#allocation3 + $0x568] ss:$36 sps:$4 sm:$0xff]  }
 0x2a8   : > { %v5313_v17 = vpop.f32.mrf.mxu0 }
 0x2a9   : > { %v5124_v28 = vpop.f32.mrf.mxu1  ;;  %5547 = vmatmul.mubr.bf16.gmra.mxu1 %v8276_v25  ;;  %v8291_v25 = vld [vmem:[#allocation3 + $0x528] ss:$36 sps:$4 sm:$0xff]  }
 0x2aa   : > { %v5316_v13 = vpop.f32.mrf.mxu0  ;;  %5739 = vmatmul.mubr.bf16.gmra.mxu0 %v8279_v20  ;;  %5554 = vmatprep.mubr.bf16.mxu1 %v8284_v57  ;;  %v5125_v59 = vadd.f32 %v9209_v56, %v5124_v28  ;;  %v7101_v20 = vcombine.high %v3440_v8, %v3440_v8 }
 0x2ab   : > { %v9331_v14 = vadd.f32 %v5316_v13, %v5117_v22  ;;  %5746 = vmatprep.mubr.bf16.mxu0 %v8287_v53  ;;  %v5126_v10 = vpop.f32.mrf.mxu1  ;;  %v8299_v22 = vld [vmem:[#allocation3 + $0x574] ss:$36 sps:$4 sm:$0xff]  }
 0x2ac   : > { %v5318_v3 = vpop.f32.mrf.mxu0 }
 0x2ad   : > { %v5127_v33 = vpop.f32.mrf.mxu1  ;;  %v3441_v3 = vld [vmem:[#allocation3 + $0x5b8] sm:$0x33] }
 0x2ae   : > { %v5319_v47 = vpop.f32.mrf.mxu0  ;;  %v5128_v11 = vadd.f32 %v9209_v56, %v5127_v33 }
 0x2af   : > { %v9337_v54 = vadd.f32 %v5319_v47, %v5120_v32  ;;  %v5129_v26 = vpop.f32.mrf.mxu1  ;;  %v7100_v47 = vcombine.low %v3440_v8, %v3440_v8 }
 0x2b0   : > { %v5321_v5 = vpop.f32.mrf.mxu0 }
 0x2b1   : > { %v5132_v23 = vpop.f32.mrf.mxu1  ;;  %5555 = vmatmul.mubr.bf16.gmra.mxu1 %v8282_v36  ;;  %v8297_v5 = vld [vmem:[#allocation3 + $0x570] ss:$36 sps:$4 sm:$0xff]  }
 0x2b2   : > { %v5324_v38 = vpop.f32.mrf.mxu0  ;;  %5747 = vmatmul.mubr.bf16.gmra.mxu0 %v8285_v4  ;;  %5562 = vmatprep.mubr.bf16.mxu1 %v8290_v49  ;;  %v5133_v17 = vadd.f32 %v9209_v56, %v5132_v23  ;;  %v7103_v4 = vcombine.high %v3441_v3, %v3441_v3 }
 0x2b3   : > { %v9341_v9 = vadd.f32 %v5324_v38, %v5125_v59  ;;  %5754 = vmatprep.mubr.bf16.mxu0 %v8293_v7  ;;  %v5134_v1 = vpop.f32.mrf.mxu1  ;;  %v8321_v59 = vld [vmem:[%s9785_s3 + $0x18] sm:$0xff]  }
 0x2b4   : > { %v5326_v63 = vpop.f32.mrf.mxu0  ;;  %7853 = vmatpush3.bf16.msra.mxu0 %v8321_v59 }
 0x2b5   : > { %v5135_v51 = vpop.f32.mrf.mxu1  ;;  %7854 = vmatprep.subr.bf16.mxu0 %v9318_v52 }
 0x2b6   : > { %v5327_v41 = vpop.f32.mrf.mxu0  ;;  %v5136_v30 = vadd.f32 %v9209_v56, %v5135_v51 }
 0x2b7   : > { %v9344_v61 = vadd.f32 %v5327_v41, %v5128_v11  ;;  %v5137_v34 = vpop.f32.mrf.mxu1 }
 0x2b8   : > { %v5329_v18 = vpop.f32.mrf.mxu0 }
 0x2b9   : > { %v5140_v57 = vpop.f32.mrf.mxu1  ;;  %5563 = vmatmul.mubr.bf16.gmra.mxu1 %v8288_v42  ;;  %v7102_v42 = vcombine.low %v3441_v3, %v3441_v3  ;;  %v8302_v18 = vld [vmem:[#allocation3 + $0x20] ss:$36 sps:$4 sm:$0xff]  }
 0x2ba   : > { %v5332_v28 = vpop.f32.mrf.mxu0  ;;  %5755 = vmatmul.mubr.bf16.gmra.mxu0 %v8291_v25  ;;  %5570 = vmatprep.mubr.bf16.mxu1 %v7101_v20  ;;  %v5141_v23 = vadd.f32 %v9209_v56, %v5140_v57 }
 0x2bb   : > { %v9347_v53 = vadd.f32 %v5332_v28, %v5133_v17  ;;  %5762 = vmatprep.mubr.bf16.mxu0 %v8299_v22  ;;  %v5142_v13 = vpop.f32.mrf.mxu1 }
 0x2bc   : > { %v5334_v10 = vpop.f32.mrf.mxu0 }
 0x2bd   : > { %v5143_v32 = vpop.f32.mrf.mxu1 }
 0x2be   : > { %v5335_v33 = vpop.f32.mrf.mxu0  ;;  %v5144_v51 = vadd.f32 %v9209_v56, %v5143_v32 }
 0x2bf   : > { %v9350_v36 = vadd.f32 %v5335_v33, %v5136_v30  ;;  %v5145_v26 = vpop.f32.mrf.mxu1 }
 0x2c0   : > { %v5337_v49 = vpop.f32.mrf.mxu0  ;;  %v8303_v26 = vld [vmem:[#allocation3 + $0x68] ss:$36 sps:$4 sm:$0xff]  }
 0x2c1   : > { %v5148_v7 = vpop.f32.mrf.mxu1  ;;  %5571 = vmatmul.mubr.bf16.gmra.mxu1 %v7100_v47 }
 0x2c2   : > { %v5340_v38 = vpop.f32.mrf.mxu0  ;;  %5763 = vmatmul.mubr.bf16.gmra.mxu0 %v8297_v5  ;;  %7760 = vmatprep.mubr.msk.bf16.mxu1 %vm8346_vm0, %v9318_v52  ;;  %v5149_v17 = vadd.f32 %v9209_v56, %v5148_v7 }
 0x2c3   : > { %v9358_v1 = vadd.f32 %v5340_v38, %v5141_v23  ;;  %v5150_v63 = vpop.f32.mrf.mxu1  ;;  %5770 = vmatprep.mubr.bf16.mxu0 %v7103_v4 }
 0x2c4   : > { %v5342_v11 = vpop.f32.mrf.mxu0 }
 0x2c5   : > { %v5151_v8 = vpop.f32.mrf.mxu1 }
 0x2c6   : > { %v5343_v41 = vpop.f32.mrf.mxu0  ;;  %v5152_v3 = vadd.f32 %v9209_v56, %v5151_v8 }
 0x2c7   : > { %v9362_v34 = vadd.f32 %v5343_v41, %v5144_v51  ;;  %v5153_v25 = vpop.f32.mrf.mxu1 }
 0x2c8   : > { %v5345_v20 = vpop.f32.mrf.mxu0  ;;  %v8325_v25 = vld [vmem:[%s9785_s3 + $0x10] sm:$0xff]  }
 0x2c9   : > { %v5156_v57 = vpop.f32.mrf.mxu1  ;;  %7761 = vmatmul.mubr.bf16.vlgmr.msra.gmra.mxu1 %v8302_v18  ;;  %7855 = vmatpush3.bf16.msra.mxu0 %v8325_v25 }
 0x2ca   : > { %v5348_v22 = vpop.f32.mrf.mxu0  ;;  %5771 = vmatmul.mubr.bf16.gmra.mxu0 %v7102_v42  ;;  %7764 = vmatprep.mubr.msk.bf16.mxu1 %vm8346_vm0, %v9318_v52  ;;  %v5157_v5 = vadd.f32 %v9209_v56, %v5156_v57  ;;  %v8304_v42 = vld [vmem:[#allocation3 + $0xb0] ss:$36 sps:$4 sm:$0xff]  }
 0x2cb   : > { %v9367_v28 = vadd.f32 %v5348_v22, %v5149_v17  ;;  %v5158_v13 = vpop.f32.mrf.mxu1  ;;  %7860 = vmatprep.mubr.msk.bf16.mxu0 %vm8346_vm0, %v9318_v52  ;;  %7856 = vmatprep.subr.bf16.mxu0 %v9318_v52 }
 0x2cc   : > { %v5350_v10 = vpop.f32.mrf.mxu0 }
 0x2cd   : > { %v5159_v30 = vpop.f32.mrf.mxu1 }
 0x2ce   : > { %v5351_v32 = vpop.f32.mrf.mxu0  ;;  %v5160_v63 = vadd.f32 %v9209_v56, %v5159_v30 }
 0x2cf   : > { %v9372_v33 = vadd.f32 %v5351_v32, %v5152_v3  ;;  %v5161_v47 = vpop.f32.mrf.mxu1 }
 0x2d0   : > { %v5353_v4 = vpop.f32.mrf.mxu0 }
 0x2d1   : > { %v5164_v49 = vpop.f32.mrf.mxu1  ;;  %7765 = vmatmul.mubr.bf16.gmra.mxu1 %v8303_v26  ;;  %v8305_v4 = vld [vmem:[#allocation3 + $0xf8] ss:$36 sps:$4 sm:$0xff]  }
 0x2d2   : > { %v5356_v59 = vpop.f32.mrf.mxu0  ;;  %7768 = vmatprep.mubr.msk.bf16.mxu1 %vm8346_vm0, %v9318_v52  ;;  %v5165_v20 = vadd.f32 %v9209_v56, %v5164_v49 }
 0x2d3   : > { %v9377_v23 = vadd.f32 %v5356_v59, %v5157_v5  ;;  %v5166_v7 = vpop.f32.mrf.mxu1 }
 0x2d4   : > { %v5358_v38 = vpop.f32.mrf.mxu0 }
 0x2d5   : > { %v5167_v11 = vpop.f32.mrf.mxu1 }
 0x2d6   : > { %v5359_v51 = vpop.f32.mrf.mxu0  ;;  %v5168_v3 = vadd.f32 %v9209_v56, %v5167_v11 }
 0x2d7   : > { %v9380_v8 = vadd.f32 %v5359_v51, %v5160_v63  ;;  %v5169_v41 = vpop.f32.mrf.mxu1 }
 0x2d8   : > { %v5361_v18 = vpop.f32.mrf.mxu0 }
 0x2d9   : > { %v5172_v17 = vpop.f32.mrf.mxu1  ;;  %7769 = vmatmul.mubr.bf16.gmra.mxu1 %v8304_v42 }
 0x2da   : > { %v5364_v57 = vpop.f32.mrf.mxu0  ;;  %7772 = vmatprep.mubr.msk.bf16.mxu1 %vm8346_vm0, %v9318_v52  ;;  %v5173_v49 = vadd.f32 %v9209_v56, %v5172_v17 }
 0x2db   : > { %v9389_v22 = vadd.f32 %v5364_v57, %v5165_v20  ;;  %v5174_v13 = vpop.f32.mrf.mxu1  ;;  %v8306_v20 = vld [vmem:[#allocation3 + $0x140] ss:$36 sps:$4 sm:$0xff]  }
 0x2dc   : > { %v5366_v10 = vpop.f32.mrf.mxu0 }
 0x2dd   : > { %v5175_v30 = vpop.f32.mrf.mxu1 }
 0x2de   : > { %v5367_v32 = vpop.f32.mrf.mxu0  ;;  %v8329_v30 = vld [vmem:[%s9785_s3 + $0x8] sm:$0xff]  }
 0x2df   : > { %v9392_v47 = vadd.f32 %v5367_v32, %v5168_v3  ;;  %v5176_v26 = vpop.f32.mrf.mxu1  ;;  %v3031_v3 = vld [vmem:[#allocation2 + $0x16b] sm:$0xf]  ;;  %7857 = vmatpush3.bf16.msra.mxu0 %v8329_v30 }
 0x2e0   : > { %v5369_v5 = vpop.f32.mrf.mxu0  ;;  %v7556_v32 = vpack.c.bf16 %v3031_v3, %v3031_v3  ;;  %7858 = vmatprep.subr.bf16.mxu0 %v9318_v52 }
 0x2e1   : > { %v5412_v59 = vpop.f32.mrf.mxu1  ;;  %7773 = vmatmul.mubr.bf16.gmra.mxu1 %v8305_v4 }
 0x2e2   : > { %v5372_v7 = vpop.f32.mrf.mxu0  ;;  %v5413_v38 = vadd.f32 %v5412_v59, %v9218_v39  ;;  %7776 = vmatprep.mubr.msk.bf16.mxu1 %vm8346_vm0, %v9318_v52  ;;  %3237 = vst [vmem:[#allocation3 + $0x5c0] sm:$0x3] %v7556_v32  ;;  %v8308_v59 = vld [vmem:[#allocation3 + $0x188] ss:$36 sps:$4 sm:$0xff]  }
 0x2e3   : > { %v9398_v63 = vadd.f32 %v5372_v7, %v5173_v49  ;;  %v5414_v11 = vpop.f32.mrf.mxu1 }
 0x2e4   : > { %v5374_v51 = vpop.f32.mrf.mxu0 }
 0x2e5   : > { %v5415_v41 = vpop.f32.mrf.mxu1 }
 0x2e6   : > { %v5375_v42 = vpop.f32.mrf.mxu0  ;;  %v5416_v25 = vadd.f32 %v5415_v41, %v9226_v46 }
 0x2e7   : > { %v5417_v18 = vpop.f32.mrf.mxu1 }
 0x2e8   : > { %v5376_v57 = vpop.f32.mrf.mxu0 }
 0x2e9   : > { %v5420_v56 = vpop.f32.mrf.mxu1  ;;  %7777 = vmatmul.mubr.bf16.gmra.mxu1 %v8306_v20 }
 0x2ea   : > { %v5421_v17 = vadd.f32 %v5420_v56, %v9233_v19  ;;  %v5612_v13 = vpop.f32.mrf.mxu0  ;;  %7780 = vmatprep.mubr.msk.bf16.mxu1 %vm8346_vm0, %v9318_v52 }
 0x2eb   : > { %v9404_v39 = vadd.f32 %v5612_v13, %v5413_v38  ;;  %v5422_v10 = vpop.f32.mrf.mxu1  ;;  %v8309_v13 = vld [vmem:[#allocation3 + $0x1d0] ss:$36 sps:$4 sm:$0xff]  }
 0x2ec   : > { %v5614_v46 = vpop.f32.mrf.mxu0 }
 0x2ed   : > { %v5423_v26 = vpop.f32.mrf.mxu1 }
 0x2ee   : > { %v5424_v4 = vadd.f32 %v5423_v26, %v9240_v21  ;;  %v5615_v5 = vpop.f32.mrf.mxu0 }
 0x2ef   : > { %v9411_v19 = vadd.f32 %v5615_v5, %v5416_v25  ;;  %v5425_v49 = vpop.f32.mrf.mxu1 }
 0x2f0   : > { %v5617_v7 = vpop.f32.mrf.mxu0 }
 0x2f1   : > { %v5428_v38 = vpop.f32.mrf.mxu1  ;;  %7781 = vmatmul.mubr.bf16.gmra.mxu1 %v8308_v59  ;;  %v8310_v59 = vld [vmem:[#allocation3 + $0x218] ss:$36 sps:$4 sm:$0xff]  }
 0x2f2   : > { %v5429_v11 = vadd.f32 %v5428_v38, %v9251_v55  ;;  %v5620_v51 = vpop.f32.mrf.mxu0  ;;  %7784 = vmatprep.mubr.msk.bf16.mxu1 %vm8346_vm0, %v9318_v52 }
 0x2f3   : > { %v9416_v41 = vadd.f32 %v5620_v51, %v5421_v17  ;;  %v5430_v21 = vpop.f32.mrf.mxu1 }
 0x2f4   : > { %v5622_v42 = vpop.f32.mrf.mxu0 }
 0x2f5   : > { %v5431_v18 = vpop.f32.mrf.mxu1 }
 0x2f6   : > { %v5432_v20 = vadd.f32 %v5431_v18, %v9254_v24  ;;  %v5623_v25 = vpop.f32.mrf.mxu0 }
 0x2f7   : > { %v9419_v57 = vadd.f32 %v5623_v25, %v5424_v4  ;;  %v5433_v56 = vpop.f32.mrf.mxu1 }
 0x2f8   : > { %v5625_v10 = vpop.f32.mrf.mxu0 }
 0x2f9   : > { %v5436_v3 = vpop.f32.mrf.mxu1  ;;  %7785 = vmatmul.mubr.bf16.gmra.mxu1 %v8309_v13  ;;  %v8312_v10 = vld [vmem:[#allocation3 + $0x260] ss:$36 sps:$4 sm:$0xff]  }
 0x2fa   : > { %v5437_v55 = vadd.f32 %v5436_v3, %v9257_v12  ;;  %v5628_v30 = vpop.f32.mrf.mxu0  ;;  %7788 = vmatprep.mubr.msk.bf16.mxu1 %vm8346_vm0, %v9318_v52  ;;  %v8330_v12 = vld [vmem:[%s9785_s3] sm:$0xff]  }
 0x2fb   : > { %v9424_v17 = vadd.f32 %v5628_v30, %v5429_v11  ;;  %v5438_v46 = vpop.f32.mrf.mxu1  ;;  %7859 = vmatpush3.bf16.msra.mxu0 %v8330_v12 }
 0x2fc   : > { %v5630_v32 = vpop.f32.mrf.mxu0 }
 0x2fd   : > { %v5439_v26 = vpop.f32.mrf.mxu1 }
 0x2fe   : > { %v5440_v24 = vadd.f32 %v5439_v26, %v9260_v43  ;;  %v5631_v4 = vpop.f32.mrf.mxu0 }
 0x2ff   : > { %v9427_v5 = vadd.f32 %v5631_v4, %v5432_v20  ;;  %v5441_v49 = vpop.f32.mrf.mxu1 }
 0x300   : > { %v5633_v7 = vpop.f32.mrf.mxu0 }
 0x301   : > { %v5444_v38 = vpop.f32.mrf.mxu1  ;;  %7789 = vmatmul.mubr.bf16.gmra.mxu1 %v8310_v59  ;;  %v8313_v7 = vld [vmem:[#allocation3 + $0x2a8] ss:$36 sps:$4 sm:$0xff]  }
 0x302   : > { %v5445_v11 = vadd.f32 %v5444_v38, %v9263_v16  ;;  %v5636_v51 = vpop.f32.mrf.mxu0  ;;  %7792 = vmatprep.mubr.msk.bf16.mxu1 %vm8346_vm0, %v9318_v52 }
 0x303   : > { %v9435_v43 = vadd.f32 %v5636_v51, %v5437_v55  ;;  %v5446_v21 = vpop.f32.mrf.mxu1 }
 0x304   : > { %v5638_v42 = vpop.f32.mrf.mxu0 }
 0x305   : > { %v5447_v18 = vpop.f32.mrf.mxu1 }
 0x306   : > { %v5448_v20 = vadd.f32 %v5447_v18, %v9266_v27  ;;  %v5639_v25 = vpop.f32.mrf.mxu0 }
 0x307   : > { %v9438_v56 = vadd.f32 %v5639_v25, %v5440_v24  ;;  %v5449_v13 = vpop.f32.mrf.mxu1 }
 0x308   : > { %v5641_v3 = vpop.f32.mrf.mxu0 }
 0x309   : > { %v5452_v30 = vpop.f32.mrf.mxu1  ;;  %7793 = vmatmul.mubr.bf16.gmra.mxu1 %v8312_v10  ;;  %v8315_v10 = vld [vmem:[#allocation3 + $0x2f0] ss:$36 sps:$4 sm:$0xff]  }
 0x30a   : > { %v5453_v16 = vadd.f32 %v5452_v30, %v9269_v0  ;;  %v5644_v46 = vpop.f32.mrf.mxu0  ;;  %7796 = vmatprep.mubr.msk.bf16.mxu1 %vm8346_vm0, %v9318_v52 }
 0x30b   : > { %v9443_v55 = vadd.f32 %v5644_v46, %v5445_v11  ;;  %v5454_v32 = vpop.f32.mrf.mxu1 }
 0x30c   : > { %v5646_v26 = vpop.f32.mrf.mxu0 }
 0x30d   : > { %v5455_v4 = vpop.f32.mrf.mxu1 }
 0x30e   : > { %v5456_v27 = vadd.f32 %v5455_v4, %v9272_v35  ;;  %v5647_v24 = vpop.f32.mrf.mxu0 }
 0x30f   : > { %v9446_v49 = vadd.f32 %v5647_v24, %v5448_v20  ;;  %v5457_v59 = vpop.f32.mrf.mxu1 }
 0x310   : > { %v5649_v12 = vpop.f32.mrf.mxu0 }
 0x311   : > { %v5460_v38 = vpop.f32.mrf.mxu1  ;;  %7797 = vmatmul.mubr.bf16.gmra.mxu1 %v8313_v7  ;;  %v8316_v7 = vld [vmem:[#allocation3 + $0x338] ss:$36 sps:$4 sm:$0xff]  }
 0x312   : > { %v5461_v0 = vadd.f32 %v5460_v38, %v9279_v37  ;;  %v5652_v51 = vpop.f32.mrf.mxu0  ;;  %7800 = vmatprep.mubr.msk.bf16.mxu1 %vm8346_vm0, %v9318_v52 }
 0x313   : > { %v9451_v11 = vadd.f32 %v5652_v51, %v5453_v16  ;;  %v5462_v21 = vpop.f32.mrf.mxu1 }
 0x314   : > { %v5654_v42 = vpop.f32.mrf.mxu0 }
 0x315   : > { %v5463_v18 = vpop.f32.mrf.mxu1 }
 0x316   : > { %v5464_v35 = vadd.f32 %v5463_v18, %v9282_v44  ;;  %v5655_v20 = vpop.f32.mrf.mxu0 }
 0x317   : > { %v9454_v25 = vadd.f32 %v5655_v20, %v5456_v27  ;;  %v5465_v13 = vpop.f32.mrf.mxu1 }
 0x318   : > { %v5657_v3 = vpop.f32.mrf.mxu0 }
 0x319   : > { %v5468_v30 = vpop.f32.mrf.mxu1  ;;  %7801 = vmatmul.mubr.bf16.gmra.mxu1 %v8315_v10  ;;  %v8317_v10 = vld [vmem:[#allocation3 + $0x380] ss:$36 sps:$4 sm:$0xff]  }
 0x31a   : > { %v5469_v37 = vadd.f32 %v5468_v30, %v9285_v62  ;;  %v5660_v46 = vpop.f32.mrf.mxu0  ;;  %7804 = vmatprep.mubr.msk.bf16.mxu1 %vm8346_vm0, %v9318_v52 }
 0x31b   : > { %v9459_v16 = vadd.f32 %v5660_v46, %v5461_v0  ;;  %v5470_v32 = vpop.f32.mrf.mxu1 }
 0x31c   : > { %v5662_v26 = vpop.f32.mrf.mxu0 }
 0x31d   : > { %v5471_v4 = vpop.f32.mrf.mxu1 }
 0x31e   : > { %v5472_v44 = vadd.f32 %v5471_v4, %v9288_v45  ;;  %v5663_v27 = vpop.f32.mrf.mxu0 }
 0x31f   : > { %v9462_v24 = vadd.f32 %v5663_v27, %v5464_v35  ;;  %v5473_v59 = vpop.f32.mrf.mxu1 }
 0x320   : > { %v5665_v12 = vpop.f32.mrf.mxu0 }
 0x321   : > { %v5476_v38 = vpop.f32.mrf.mxu1  ;;  %7805 = vmatmul.mubr.bf16.gmra.mxu1 %v8316_v7  ;;  %v8319_v7 = vld [vmem:[#allocation3 + $0x3c8] ss:$36 sps:$4 sm:$0xff]  }
 0x322   : > { %v5477_v62 = vadd.f32 %v5476_v38, %v9291_v31  ;;  %v5668_v51 = vpop.f32.mrf.mxu0  ;;  %7808 = vmatprep.mubr.msk.bf16.mxu1 %vm8346_vm0, %v9318_v52 }
 0x323   : > { %v9467_v0 = vadd.f32 %v5668_v51, %v5469_v37  ;;  %v5478_v21 = vpop.f32.mrf.mxu1 }
 0x324   : > { %v5670_v42 = vpop.f32.mrf.mxu0 }
 0x325   : > { %v5479_v18 = vpop.f32.mrf.mxu1 }
 0x326   : > { %v5480_v45 = vadd.f32 %v5479_v18, %v9298_v50  ;;  %v5671_v35 = vpop.f32.mrf.mxu0 }
 0x327   : > { %v9470_v20 = vadd.f32 %v5671_v35, %v5472_v44  ;;  %v5481_v13 = vpop.f32.mrf.mxu1 }
 0x328   : > { %v5673_v3 = vpop.f32.mrf.mxu0 }
 0x329   : > { %v5484_v30 = vpop.f32.mrf.mxu1  ;;  %7809 = vmatmul.mubr.bf16.gmra.mxu1 %v8317_v10  ;;  %v8320_v10 = vld [vmem:[#allocation3 + $0x410] ss:$36 sps:$4 sm:$0xff]  }
 0x32a   : > { %v5485_v31 = vadd.f32 %v5484_v30, %v9301_v60  ;;  %v5676_v46 = vpop.f32.mrf.mxu0  ;;  %7812 = vmatprep.mubr.msk.bf16.mxu1 %vm8346_vm0, %v9318_v52 }
 0x32b   : > { %v9475_v37 = vadd.f32 %v5676_v46, %v5477_v62  ;;  %v5486_v32 = vpop.f32.mrf.mxu1 }
 0x32c   : > { %v5678_v26 = vpop.f32.mrf.mxu0 }
 0x32d   : > { %v5487_v4 = vpop.f32.mrf.mxu1 }
 0x32e   : > { %v5488_v50 = vadd.f32 %v5487_v4, %v9304_v48  ;;  %v5679_v44 = vpop.f32.mrf.mxu0 }
 0x32f   : > { %v9478_v27 = vadd.f32 %v5679_v44, %v5480_v45  ;;  %v5489_v59 = vpop.f32.mrf.mxu1 }
 0x330   : > { %v5681_v12 = vpop.f32.mrf.mxu0 }
 0x331   : > { %v5492_v38 = vpop.f32.mrf.mxu1  ;;  %7813 = vmatmul.mubr.bf16.gmra.mxu1 %v8319_v7  ;;  %v8322_v7 = vld [vmem:[#allocation3 + $0x458] ss:$36 sps:$4 sm:$0xff]  }
 0x332   : > { %v5493_v60 = vadd.f32 %v5492_v38, %v9307_v58  ;;  %v5684_v51 = vpop.f32.mrf.mxu0  ;;  %7816 = vmatprep.mubr.msk.bf16.mxu1 %vm8346_vm0, %v9318_v52 }
 0x333   : > { %v9483_v62 = vadd.f32 %v5684_v51, %v5485_v31  ;;  %v5494_v21 = vpop.f32.mrf.mxu1 }
 0x334   : > { %v5686_v42 = vpop.f32.mrf.mxu0 }
 0x335   : > { %v5495_v18 = vpop.f32.mrf.mxu1 }
 0x336   : > { %v5496_v48 = vadd.f32 %v5495_v18, %v9310_v29  ;;  %v5687_v45 = vpop.f32.mrf.mxu0 }
 0x337   : > { %v9486_v35 = vadd.f32 %v5687_v45, %v5488_v50  ;;  %v5497_v13 = vpop.f32.mrf.mxu1 }
 0x338   : > { %v5689_v3 = vpop.f32.mrf.mxu0 }
 0x339   : > { %v5500_v30 = vpop.f32.mrf.mxu1  ;;  %7817 = vmatmul.mubr.bf16.gmra.mxu1 %v8320_v10  ;;  %v8323_v10 = vld [vmem:[#allocation3 + $0x4a0] ss:$36 sps:$4 sm:$0xff]  }
 0x33a   : > { %v5501_v58 = vadd.f32 %v5500_v30, %v9316_v40  ;;  %v5692_v46 = vpop.f32.mrf.mxu0  ;;  %7820 = vmatprep.mubr.msk.bf16.mxu1 %vm8346_vm0, %v9318_v52 }
 0x33b   : > { %v9491_v31 = vadd.f32 %v5692_v46, %v5493_v60  ;;  %v5502_v32 = vpop.f32.mrf.mxu1 }
 0x33c   : > { %v5694_v26 = vpop.f32.mrf.mxu0 }
 0x33d   : > { %v5503_v4 = vpop.f32.mrf.mxu1 }
 0x33e   : > { %v5504_v29 = vadd.f32 %v5503_v4, %v9322_v6  ;;  %v5695_v50 = vpop.f32.mrf.mxu0 }
 0x33f   : > { %v9494_v44 = vadd.f32 %v5695_v50, %v5496_v48  ;;  %v5505_v59 = vpop.f32.mrf.mxu1 }
 0x340   : > { %v5697_v12 = vpop.f32.mrf.mxu0 }
 0x341   : > { %v5508_v38 = vpop.f32.mrf.mxu1  ;;  %7821 = vmatmul.mubr.bf16.gmra.mxu1 %v8322_v7  ;;  %v8324_v7 = vld [vmem:[#allocation3 + $0x4e8] ss:$36 sps:$4 sm:$0xff]  }
 0x342   : > { %v5509_v40 = vadd.f32 %v5508_v38, %v9325_v15  ;;  %v5700_v51 = vpop.f32.mrf.mxu0  ;;  %7824 = vmatprep.mubr.msk.bf16.mxu1 %vm8346_vm0, %v9318_v52 }
 0x343   : > { %v9499_v60 = vadd.f32 %v5700_v51, %v5501_v58  ;;  %v5510_v21 = vpop.f32.mrf.mxu1 }
 0x344   : > { %v5702_v42 = vpop.f32.mrf.mxu0 }
 0x345   : > { %v5511_v18 = vpop.f32.mrf.mxu1 }
 0x346   : > { %v5512_v6 = vadd.f32 %v5511_v18, %v9328_v2  ;;  %v5703_v48 = vpop.f32.mrf.mxu0 }
 0x347   : > { %v9502_v45 = vadd.f32 %v5703_v48, %v5504_v29  ;;  %v5513_v13 = vpop.f32.mrf.mxu1 }
 0x348   : > { %v5705_v3 = vpop.f32.mrf.mxu0 }
 0x349   : > { %v5516_v30 = vpop.f32.mrf.mxu1  ;;  %7825 = vmatmul.mubr.bf16.gmra.mxu1 %v8323_v10  ;;  %v8326_v10 = vld [vmem:[#allocation3 + $0x530] ss:$36 sps:$4 sm:$0xff]  }
 0x34a   : > { %v5517_v15 = vadd.f32 %v5516_v30, %v9331_v14  ;;  %v5708_v46 = vpop.f32.mrf.mxu0  ;;  %7828 = vmatprep.mubr.msk.bf16.mxu1 %vm8346_vm0, %v9318_v52 }
 0x34b   : > { %v9507_v58 = vadd.f32 %v5708_v46, %v5509_v40  ;;  %v5518_v32 = vpop.f32.mrf.mxu1 }
 0x34c   : > { %v5710_v26 = vpop.f32.mrf.mxu0 }
 0x34d   : > { %v5519_v4 = vpop.f32.mrf.mxu1 }
 0x34e   : > { %v5520_v2 = vadd.f32 %v5519_v4, %v9337_v54  ;;  %v5711_v29 = vpop.f32.mrf.mxu0 }
 0x34f   : > { %v9510_v50 = vadd.f32 %v5711_v29, %v5512_v6  ;;  %v5521_v59 = vpop.f32.mrf.mxu1 }
 0x350   : > { %v5713_v12 = vpop.f32.mrf.mxu0 }
 0x351   : > { %v5524_v38 = vpop.f32.mrf.mxu1  ;;  %7829 = vmatmul.mubr.bf16.gmra.mxu1 %v8324_v7  ;;  %v8327_v7 = vld [vmem:[#allocation3 + $0x578] ss:$36 sps:$4 sm:$0xff]  }
 0x352   : > { %v5525_v14 = vadd.f32 %v5524_v38, %v9341_v9  ;;  %v5716_v51 = vpop.f32.mrf.mxu0  ;;  %7832 = vmatprep.mubr.msk.bf16.mxu1 %vm8346_vm0, %v9318_v52 }
 0x353   : > { %v9515_v40 = vadd.f32 %v5716_v51, %v5517_v15  ;;  %v5526_v21 = vpop.f32.mrf.mxu1 }
 0x354   : > { %v5718_v42 = vpop.f32.mrf.mxu0 }
 0x355   : > { %v5527_v18 = vpop.f32.mrf.mxu1 }
 0x356   : > { %v5528_v54 = vadd.f32 %v5527_v18, %v9344_v61  ;;  %v5719_v6 = vpop.f32.mrf.mxu0 }
 0x357   : > { %v9518_v48 = vadd.f32 %v5719_v6, %v5520_v2  ;;  %v5529_v13 = vpop.f32.mrf.mxu1 }
 0x358   : > { %v5721_v3 = vpop.f32.mrf.mxu0 }
 0x359   : > { %v5532_v30 = vpop.f32.mrf.mxu1  ;;  %7833 = vmatmul.mubr.bf16.gmra.mxu1 %v8326_v10 }
 0x35a   : > { %v5533_v9 = vadd.f32 %v5532_v30, %v9347_v53  ;;  %v5724_v46 = vpop.f32.mrf.mxu0  ;;  %7836 = vmatprep.mubr.msk.bf16.mxu1 %vm8346_vm0, %v9318_v52 }
 0x35b   : > { %v9523_v15 = vadd.f32 %v5724_v46, %v5525_v14  ;;  %v5534_v32 = vpop.f32.mrf.mxu1 }
 0x35c   : > { %v5726_v26 = vpop.f32.mrf.mxu0 }
 0x35d   : > { %v5535_v4 = vpop.f32.mrf.mxu1 }
 0x35e   : > { %v5536_v61 = vadd.f32 %v5535_v4, %v9350_v36  ;;  %v5727_v2 = vpop.f32.mrf.mxu0  ;;  %v8328_v36 = vld [vmem:[#allocation3 + $0x5c0] ss:$0 sps:$4 sm:$0x33]  }
 0x35f   : > { %v9526_v29 = vadd.f32 %v5727_v2, %v5528_v54  ;;  %v5537_v59 = vpop.f32.mrf.mxu1 }
 0x360   : > { %v5729_v12 = vpop.f32.mrf.mxu0 }
 0x361   : > { %v5540_v38 = vpop.f32.mrf.mxu1  ;;  %7837 = vmatmul.mubr.bf16.gmra.mxu1 %v8327_v7 }
 0x362   : > { %v5541_v53 = vadd.f32 %v5540_v38, %v9358_v1  ;;  %v5732_v51 = vpop.f32.mrf.mxu0  ;;  %7840 = vmatprep.mubr.msk.bf16.mxu1 %vm8346_vm0, %v9318_v52 }
 0x363   : > { %v9531_v14 = vadd.f32 %v5732_v51, %v5533_v9  ;;  %v5542_v21 = vpop.f32.mrf.mxu1 }
 0x364   : > { %v5734_v42 = vpop.f32.mrf.mxu0 }
 0x365   : > { %v5543_v18 = vpop.f32.mrf.mxu1 }
 0x366   : > { %v5544_v54 = vadd.f32 %v5543_v18, %v9362_v34  ;;  %v5735_v6 = vpop.f32.mrf.mxu0 }
 0x367   : > { %v9534_v13 = vadd.f32 %v5735_v6, %v5536_v61  ;;  %v5545_v10 = vpop.f32.mrf.mxu1 }
 0x368   : > { %v5737_v3 = vpop.f32.mrf.mxu0 }
 0x369   : > { %v5548_v30 = vpop.f32.mrf.mxu1  ;;  %7841 = vmatmul.mubr.bf16.gmra.mxu1 %v8328_v36 }
 0x36a   : > { %v5549_v1 = vadd.f32 %v5548_v30, %v9367_v28  ;;  %v5740_v46 = vpop.f32.mrf.mxu0 }
 0x36b   : > { %v9537_v32 = vadd.f32 %v5740_v46, %v5541_v53  ;;  %v5550_v9 = vpop.f32.mrf.mxu1 }
 0x36c   : > { %v5742_v26 = vpop.f32.mrf.mxu0 }
 0x36d   : > { %v5551_v4 = vpop.f32.mrf.mxu1 }
 0x36e   : > { %v5552_v2 = vadd.f32 %v5551_v4, %v9372_v33  ;;  %v5743_v59 = vpop.f32.mrf.mxu0 }
 0x36f   : > { %v9540_v7 = vadd.f32 %v5743_v59, %v5544_v54  ;;  %v5553_v34 = vpop.f32.mrf.mxu1 }
 0x370   : > { %v5745_v61 = vpop.f32.mrf.mxu0 }
 0x371   : > { %v5556_v12 = vpop.f32.mrf.mxu1 }
 0x372   : > { %v5557_v38 = vadd.f32 %v5556_v12, %v9377_v23  ;;  %v5748_v51 = vpop.f32.mrf.mxu0 }
 0x373   : > { %v9543_v21 = vadd.f32 %v5748_v51, %v5549_v1  ;;  %v5558_v28 = vpop.f32.mrf.mxu1 }
 0x374   : > { %v5750_v42 = vpop.f32.mrf.mxu0 }
 0x375   : > { %v5559_v53 = vpop.f32.mrf.mxu1 }
 0x376   : > { %v5560_v18 = vadd.f32 %v5559_v53, %v9380_v8  ;;  %v5751_v36 = vpop.f32.mrf.mxu0 }
 0x377   : > { %v9546_v6 = vadd.f32 %v5751_v36, %v5552_v2  ;;  %v5561_v33 = vpop.f32.mrf.mxu1 }
 0x378   : > { %v5753_v10 = vpop.f32.mrf.mxu0 }
 0x379   : > { %v5564_v54 = vpop.f32.mrf.mxu1 }
 0x37a   : > { %v5565_v3 = vadd.f32 %v5564_v54, %v9389_v22  ;;  %v5756_v30 = vpop.f32.mrf.mxu0 }
 0x37b   : > { %v9549_v46 = vadd.f32 %v5756_v30, %v5557_v38  ;;  %v5566_v23 = vpop.f32.mrf.mxu1 }
 0x37c   : > { %v5758_v9 = vpop.f32.mrf.mxu0 }
 0x37d   : > { %v5567_v1 = vpop.f32.mrf.mxu1 }
 0x37e   : > { %v5568_v26 = vadd.f32 %v5567_v1, %v9392_v47  ;;  %v5759_v4 = vpop.f32.mrf.mxu0 }
 0x37f   : > { %v9552_v59 = vadd.f32 %v5759_v4, %v5560_v18  ;;  %v5569_v8 = vpop.f32.mrf.mxu1 }
 0x380   : > { %v5761_v34 = vpop.f32.mrf.mxu0 }
 0x381   : > { %v5572_v2 = vpop.f32.mrf.mxu1 }
 0x382   : > { %v5573_v61 = vadd.f32 %v5572_v2, %v9398_v63  ;;  %v5764_v12 = vpop.f32.mrf.mxu0 }
 0x383   : > { %v9555_v51 = vadd.f32 %v5764_v12, %v5565_v3  ;;  %v5574_v22 = vpop.f32.mrf.mxu1 }
 0x384   : > { %v5766_v28 = vpop.f32.mrf.mxu0 }
 0x385   : > { %v5575_v38 = vpop.f32.mrf.mxu1 }
 0x386   : > { %v5767_v42 = vpop.f32.mrf.mxu0 }
 0x387   : > { %v9557_v53 = vadd.f32 %v5767_v42, %v5568_v26  ;;  %v5576_v36 = vpop.f32.mrf.mxu1 }
 0x388   : > { %v5769_v33 = vpop.f32.mrf.mxu0 }
 0x389   : > { %v5812_v47 = vpop.f32.mrf.mxu1 }
 0x38a   : > { %v5772_v10 = vpop.f32.mrf.mxu0  ;;  %v5813_v30 = vadd.f32 %v5812_v47, %v9404_v39 }
 0x38b   : > { %v9559_v18 = vadd.f32 %v5772_v10, %v5573_v61  ;;  %v7762_v54 = vpop.f32.mrf.mxu1 }
 0x38c   : > { %v5774_v23 = vpop.f32.mrf.mxu0  ;;  %v5978_v4 = vmax.f32 %v5813_v30, 0.0 }
 0x38d   : > { %v5815_v63 = vpop.f32.mrf.mxu1 }
 0x38e   : > { %v5816_v3 = vadd.f32 %v5815_v63, %v9411_v19  ;;  %v5775_v9 = vpop.f32.mrf.mxu0 }
 0x38f   : > { %v7763_v1 = vpop.f32.mrf.mxu1 }
 0x390   : > { %v5979_v8 = vmax.f32 %v5816_v3, 0.0  ;;  %v5776_v34 = vpop.f32.mrf.mxu0 }
 0x391   : > { %v5820_v26 = vpop.f32.mrf.mxu1 }
 0x392   : > { %v6019_v2 = vpack.c.bf16 %v5979_v8, %v5978_v4  ;;  %v5821_v22 = vadd.f32 %v5820_v26, %v9416_v41  ;;  %v9572_v4 = vld [vmem:[#allocation2] sm:$0xff] }
 0x393   : > { %v7766_v12 = vpop.f32.mrf.mxu1 }
 0x394   : > { %7861 = vmatmul.mubr.bf16.vlgmr.msra.gmra.mxu0 %v6019_v2  ;;  %v5980_v38 = vmax.f32 %v5821_v22, 0.0 }
 0x395   : > { %v5823_v61 = vpop.f32.mrf.mxu1  ;;  %7864 = vmatprep.mubr.msk.bf16.mxu0 %vm8346_vm0, %v9318_v52 }
 0x396   : > { %v5824_v39 = vadd.f32 %v5823_v61, %v9419_v57 }
 0x397   : > { %v7767_v28 = vpop.f32.mrf.mxu1 }
 0x398   : > { %v5981_v19 = vmax.f32 %v5824_v39, 0.0 }
 0x399   : > { %v5828_v42 = vpop.f32.mrf.mxu1 }
 0x39a   : > { %v6020_v36 = vpack.c.bf16 %v5981_v19, %v5980_v38  ;;  %v5829_v47 = vadd.f32 %v5828_v42, %v9424_v17 }
 0x39b   : > { %v7770_v33 = vpop.f32.mrf.mxu1 }
 0x39c   : > { %7865 = vmatmul.mubr.bf16.gmra.mxu0 %v6020_v36  ;;  %v5982_v30 = vmax.f32 %v5829_v47, 0.0 }
 0x39d   : > { %v5831_v10 = vpop.f32.mrf.mxu1  ;;  %7868 = vmatprep.mubr.msk.bf16.mxu0 %vm8346_vm0, %v9318_v52 }
 0x39e   : > { %v5832_v41 = vadd.f32 %v5831_v10, %v9427_v5 }
 0x39f   : > { %v7771_v54 = vpop.f32.mrf.mxu1 }
 0x3a0   : > { %v5983_v23 = vmax.f32 %v5832_v41, 0.0 }
 0x3a1   : > { %v5836_v63 = vpop.f32.mrf.mxu1 }
 0x3a2   : > { %v6021_v57 = vpack.c.bf16 %v5983_v23, %v5982_v30  ;;  %v5837_v9 = vadd.f32 %v5836_v63, %v9435_v43 }
 0x3a3   : > { %v7774_v3 = vpop.f32.mrf.mxu1 }
 0x3a4   : > { %7869 = vmatmul.mubr.bf16.gmra.mxu0 %v6021_v57  ;;  %v5984_v8 = vmax.f32 %v5837_v9, 0.0 }
 0x3a5   : > { %v5839_v1 = vpop.f32.mrf.mxu1  ;;  %7872 = vmatprep.mubr.msk.bf16.mxu0 %vm8346_vm0, %v9572_v4 }
 0x3a6   : > { %v5840_v17 = vadd.f32 %v5839_v1, %v9438_v56 }
 0x3a7   : > { %v7775_v52 = vpop.f32.mrf.mxu1 }
 0x3a8   : > { %v5985_v5 = vmax.f32 %v5840_v17, 0.0 }
 0x3a9   : > { %v5844_v34 = vpop.f32.mrf.mxu1 }
 0x3aa   : > { %v6022_v26 = vpack.c.bf16 %v5985_v5, %v5984_v8  ;;  %v5845_v12 = vadd.f32 %v5844_v34, %v9443_v55 }
 0x3ab   : > { %v7778_v2 = vpop.f32.mrf.mxu1 }
 0x3ac   : > { %7873 = vmatmul.mubr.bf16.gmra.mxu0 %v6022_v26  ;;  %v5986_v39 = vmax.f32 %v5845_v12, 0.0 }
 0x3ad   : > { %v5847_v22 = vpop.f32.mrf.mxu1  ;;  %7876 = vmatprep.mubr.msk.bf16.mxu0 %vm8346_vm0, %v9572_v4 }
 0x3ae   : > { %v5848_v43 = vadd.f32 %v5847_v22, %v9446_v49 }
 0x3af   : > { %v7779_v61 = vpop.f32.mrf.mxu1 }
 0x3b0   : > { %v5987_v28 = vmax.f32 %v5848_v43, 0.0 }
 0x3b1   : > { %v5852_v38 = vpop.f32.mrf.mxu1 }
 0x3b2   : > { %v6023_v56 = vpack.c.bf16 %v5987_v28, %v5986_v39  ;;  %v5853_v42 = vadd.f32 %v5852_v38, %v9451_v11 }
 0x3b3   : > { %v7782_v19 = vpop.f32.mrf.mxu1 }
 0x3b4   : > { %7877 = vmatmul.mubr.bf16.gmra.mxu0 %v6023_v56  ;;  %v5988_v47 = vmax.f32 %v5853_v42, 0.0 }
 0x3b5   : > { %v5855_v36 = vpop.f32.mrf.mxu1  ;;  %7880 = vmatprep.mubr.msk.bf16.mxu0 %vm8346_vm0, %v9572_v4 }
 0x3b6   : > { %v5856_v55 = vadd.f32 %v5855_v36, %v9454_v25 }
 0x3b7   : > { %v7783_v33 = vpop.f32.mrf.mxu1 }
 0x3b8   : > { %v5989_v10 = vmax.f32 %v5856_v55, 0.0 }
 0x3b9   : > { %v5860_v41 = vpop.f32.mrf.mxu1 }
 0x3ba   : > { %v6024_v49 = vpack.c.bf16 %v5989_v10, %v5988_v47  ;;  %v5861_v30 = vadd.f32 %v5860_v41, %v9459_v16 }
 0x3bb   : > { %v7786_v54 = vpop.f32.mrf.mxu1 }
 0x3bc   : > { %7881 = vmatmul.mubr.bf16.gmra.mxu0 %v6024_v49  ;;  %v5990_v57 = vmax.f32 %v5861_v30, 0.0 }
 0x3bd   : > { %v5863_v23 = vpop.f32.mrf.mxu1  ;;  %7884 = vmatprep.mubr.msk.bf16.mxu0 %vm8346_vm0, %v9572_v4 }
 0x3be   : > { %v5864_v11 = vadd.f32 %v5863_v23, %v9462_v24 }
 0x3bf   : > { %v7787_v63 = vpop.f32.mrf.mxu1 }
 0x3c0   : > { %v5991_v3 = vmax.f32 %v5864_v11, 0.0 }
 0x3c1   : > { %v5868_v9 = vpop.f32.mrf.mxu1 }
 0x3c2   : > { %v6025_v25 = vpack.c.bf16 %v5991_v3, %v5990_v57  ;;  %v5869_v17 = vadd.f32 %v5868_v9, %v9467_v0 }
 0x3c3   : > { %v7790_v1 = vpop.f32.mrf.mxu1 }
 0x3c4   : > { %7885 = vmatmul.mubr.bf16.gmra.mxu0 %v6025_v25  ;;  %v5992_v5 = vmax.f32 %v5869_v17, 0.0 }
 0x3c5   : > { %v5871_v52 = vpop.f32.mrf.mxu1  ;;  %7888 = vmatprep.mubr.msk.bf16.mxu0 %vm8346_vm0, %v9572_v4 }
 0x3c6   : > { %v5872_v16 = vadd.f32 %v5871_v52, %v9470_v20 }
 0x3c7   : > { %v7791_v8 = vpop.f32.mrf.mxu1 }
 0x3c8   : > { %v5993_v34 = vmax.f32 %v5872_v16, 0.0 }
 0x3c9   : > { %v5876_v26 = vpop.f32.mrf.mxu1 }
 0x3ca   : > { %v6026_v24 = vpack.c.bf16 %v5993_v34, %v5992_v5  ;;  %v5877_v12 = vadd.f32 %v5876_v26, %v9475_v37 }
 0x3cb   : > { %v7794_v2 = vpop.f32.mrf.mxu1 }
 0x3cc   : > { %7889 = vmatmul.mubr.bf16.gmra.mxu0 %v6026_v24  ;;  %v5994_v61 = vmax.f32 %v5877_v12, 0.0 }
 0x3cd   : > { %v5879_v22 = vpop.f32.mrf.mxu1  ;;  %7892 = vmatprep.mubr.msk.bf16.mxu0 %vm8346_vm0, %v9572_v4 }
 0x3ce   : > { %v5880_v0 = vadd.f32 %v5879_v22, %v9478_v27 }
 0x3cf   : > { %v7795_v43 = vpop.f32.mrf.mxu1 }
 0x3d0   : > { %v5995_v39 = vmax.f32 %v5880_v0, 0.0 }
 0x3d1   : > { %v5884_v28 = vpop.f32.mrf.mxu1 }
 0x3d2   : > { %v6027_v20 = vpack.c.bf16 %v5995_v39, %v5994_v61  ;;  %v5885_v56 = vadd.f32 %v5884_v28, %v9483_v62 }
 0x3d3   : > { %v7798_v38 = vpop.f32.mrf.mxu1 }
 0x3d4   : > { %7893 = vmatmul.mubr.bf16.gmra.mxu0 %v6027_v20  ;;  %v5996_v36 = vmax.f32 %v5885_v56, 0.0 }
 0x3d5   : > { %v5887_v19 = vpop.f32.mrf.mxu1  ;;  %7896 = vmatprep.mubr.msk.bf16.mxu0 %vm8346_vm0, %v9572_v4 }
 0x3d6   : > { %v5888_v37 = vadd.f32 %v5887_v19, %v9486_v35 }
 0x3d7   : > { %v7799_v42 = vpop.f32.mrf.mxu1 }
 0x3d8   : > { %v5997_v55 = vmax.f32 %v5888_v37, 0.0 }
 0x3d9   : > { %v5892_v33 = vpop.f32.mrf.mxu1 }
 0x3da   : > { %v6028_v27 = vpack.c.bf16 %v5997_v55, %v5996_v36  ;;  %v5893_v10 = vadd.f32 %v5892_v33, %v9491_v31 }
 0x3db   : > { %v7802_v47 = vpop.f32.mrf.mxu1 }
 0x3dc   : > { %7897 = vmatmul.mubr.bf16.gmra.mxu0 %v6028_v27  ;;  %v5998_v54 = vmax.f32 %v5893_v10, 0.0 }
 0x3dd   : > { %v5895_v41 = vpop.f32.mrf.mxu1  ;;  %7900 = vmatprep.mubr.msk.bf16.mxu0 %vm8346_vm0, %v9572_v4 }
 0x3de   : > { %v5896_v62 = vadd.f32 %v5895_v41, %v9494_v44 }
 0x3df   : > { %v7803_v49 = vpop.f32.mrf.mxu1 }
 0x3e0   : > { %v5999_v30 = vmax.f32 %v5896_v62, 0.0 }
 0x3e1   : > { %v5900_v23 = vpop.f32.mrf.mxu1 }
 0x3e2   : > { %v6029_v35 = vpack.c.bf16 %v5999_v30, %v5998_v54  ;;  %v5901_v63 = vadd.f32 %v5900_v23, %v9499_v60 }
 0x3e3   : > { %v7806_v11 = vpop.f32.mrf.mxu1 }
 0x3e4   : > { %7901 = vmatmul.mubr.bf16.gmra.mxu0 %v6029_v35  ;;  %v6000_v9 = vmax.f32 %v5901_v63, 0.0 }
 0x3e5   : > { %v5903_v57 = vpop.f32.mrf.mxu1  ;;  %7904 = vmatprep.mubr.msk.bf16.mxu0 %vm8346_vm0, %v9572_v4 }
 0x3e6   : > { %v5904_v31 = vadd.f32 %v5903_v57, %v9502_v45 }
 0x3e7   : > { %v7807_v3 = vpop.f32.mrf.mxu1 }
 0x3e8   : > { %v6001_v25 = vmax.f32 %v5904_v31, 0.0 }
 0x3e9   : > { %v5908_v1 = vpop.f32.mrf.mxu1 }
 0x3ea   : > { %v6030_v44 = vpack.c.bf16 %v6001_v25, %v6000_v9  ;;  %v5909_v52 = vadd.f32 %v5908_v1, %v9507_v58 }
 0x3eb   : > { %v7810_v17 = vpop.f32.mrf.mxu1 }
 0x3ec   : > { %7905 = vmatmul.mubr.bf16.gmra.mxu0 %v6030_v44  ;;  %v6002_v5 = vmax.f32 %v5909_v52, 0.0 }
 0x3ed   : > { %v5911_v16 = vpop.f32.mrf.mxu1  ;;  %7908 = vmatprep.mubr.msk.bf16.mxu0 %vm8346_vm0, %v9572_v4 }
 0x3ee   : > { %v5912_v60 = vadd.f32 %v5911_v16, %v9510_v50 }
 0x3ef   : > { %v7811_v8 = vpop.f32.mrf.mxu1 }
 0x3f0   : > { %v6003_v34 = vmax.f32 %v5912_v60, 0.0 }
 0x3f1   : > { %v5916_v26 = vpop.f32.mrf.mxu1 }
 0x3f2   : > { %v6031_v45 = vpack.c.bf16 %v6003_v34, %v6002_v5  ;;  %v5917_v2 = vadd.f32 %v5916_v26, %v9515_v40 }
 0x3f3   : > { %v7814_v24 = vpop.f32.mrf.mxu1 }
 0x3f4   : > { %7909 = vmatmul.mubr.bf16.gmra.mxu0 %v6031_v45  ;;  %v6004_v0 = vmax.f32 %v5917_v2, 0.0 }
 0x3f5   : > { %v5919_v12 = vpop.f32.mrf.mxu1  ;;  %7912 = vmatprep.mubr.msk.bf16.mxu0 %vm8346_vm0, %v9572_v4 }
 0x3f6   : > { %v5920_v58 = vadd.f32 %v5919_v12, %v9518_v48 }
 0x3f7   : > { %v7815_v22 = vpop.f32.mrf.mxu1 }
 0x3f8   : > { %v6005_v43 = vmax.f32 %v5920_v58, 0.0 }
 0x3f9   : > { %v5924_v61 = vpop.f32.mrf.mxu1 }
 0x3fa   : > { %v6032_v50 = vpack.c.bf16 %v6005_v43, %v6004_v0  ;;  %v5925_v28 = vadd.f32 %v5924_v61, %v9523_v15 }
 0x3fb   : > { %v7818_v39 = vpop.f32.mrf.mxu1 }
 0x3fc   : > { %7913 = vmatmul.mubr.bf16.gmra.mxu0 %v6032_v50  ;;  %v6006_v56 = vmax.f32 %v5925_v28, 0.0  ;;  %v6311_v39 = vld [vmem:[%s8484_s22] sm:$0xff] }
 0x3fd   : > { %v5927_v20 = vpop.f32.mrf.mxu1  ;;  %7916 = vmatprep.mubr.msk.bf16.mxu0 %vm8346_vm0, %v9572_v4 }
 0x3fe   : > { %v5928_v40 = vadd.f32 %v5927_v20, %v9526_v29 }
 0x3ff   : > { %v7819_v38 = vpop.f32.mrf.mxu1 }
 0x400   : > { %v6007_v19 = vmax.f32 %v5928_v40, 0.0  ;;  %v6312_v40 = vld [vmem:[%s8484_s22 + $0x8] sm:$0xff] }
 0x401   : > { %v5932_v37 = vpop.f32.mrf.mxu1 }
 0x402   : > { %v6033_v48 = vpack.c.bf16 %v6007_v19, %v6006_v56  ;;  %v5933_v36 = vadd.f32 %v5932_v37, %v9531_v14 }
 0x403   : > { %v7822_v42 = vpop.f32.mrf.mxu1 }
 0x404   : > { %7917 = vmatmul.mubr.bf16.gmra.mxu0 %v6033_v48  ;;  %v6008_v27 = vmax.f32 %v5933_v36, 0.0  ;;  %v6313_v42 = vld [vmem:[%s8484_s22 + $0x10] sm:$0xff] }
 0x405   : > { %v5935_v55 = vpop.f32.mrf.mxu1  ;;  %7920 = vmatprep.mubr.msk.bf16.mxu0 %vm8346_vm0, %v9572_v4 }
 0x406   : > { %v5936_v15 = vadd.f32 %v5935_v55, %v9534_v13 }
 0x407   : > { %v7823_v33 = vpop.f32.mrf.mxu1 }
 0x408   : > { %v6009_v47 = vmax.f32 %v5936_v15, 0.0 }
 0x409   : > { %v5940_v10 = vpop.f32.mrf.mxu1 }
 0x40a   : > { %v6034_v29 = vpack.c.bf16 %v6009_v47, %v6008_v27  ;;  %v5941_v62 = vadd.f32 %v5940_v10, %v9537_v32  ;;  %v6314_v47 = vld [vmem:[%s8484_s22 + $0x18] sm:$0xff] }
 0x40b   : > { %v7826_v41 = vpop.f32.mrf.mxu1 }
 0x40c   : > { %7921 = vmatmul.mubr.bf16.gmra.mxu0 %v6034_v29  ;;  %v6010_v30 = vmax.f32 %v5941_v62, 0.0 }
 0x40d   : > { %v5943_v49 = vpop.f32.mrf.mxu1  ;;  %7924 = vmatprep.mubr.msk.bf16.mxu0 %vm8346_vm0, %v9572_v4 }
 0x40e   : > { %v5944_v14 = vadd.f32 %v5943_v49, %v9540_v7 }
 0x40f   : > { %v7827_v54 = vpop.f32.mrf.mxu1 }
 0x410   : > { %v6011_v23 = vmax.f32 %v5944_v14, 0.0  ;;  %v6315_v14 = vld [vmem:[%s8484_s22 + $0x20] sm:$0xff] }
 0x411   : > { %v5948_v35 = vpop.f32.mrf.mxu1 }
 0x412   : > { %v6035_v13 = vpack.c.bf16 %v6011_v23, %v6010_v30  ;;  %v5949_v63 = vadd.f32 %v5948_v35, %v9543_v21 }
 0x413   : > { %v7830_v11 = vpop.f32.mrf.mxu1 }
 0x414   : > { %7925 = vmatmul.mubr.bf16.gmra.mxu0 %v6035_v13  ;;  %v6012_v3 = vmax.f32 %v5949_v63, 0.0  ;;  %v6316_v11 = vld [vmem:[%s8484_s22 + $0x28] sm:$0xff] }
 0x415   : > { %v5951_v57 = vpop.f32.mrf.mxu1  ;;  %7928 = vmatprep.mubr.msk.bf16.mxu0 %vm8346_vm0, %v9572_v4 }
 0x416   : > { %v5952_v32 = vadd.f32 %v5951_v57, %v9546_v6 }
 0x417   : > { %v7831_v31 = vpop.f32.mrf.mxu1 }
 0x418   : > { %v6013_v9 = vmax.f32 %v5952_v32, 0.0 }
 0x419   : > { %v5956_v25 = vpop.f32.mrf.mxu1 }
 0x41a   : > { %v6036_v7 = vpack.c.bf16 %v6013_v9, %v6012_v3  ;;  %v5957_v44 = vadd.f32 %v5956_v25, %v9549_v46  ;;  %v6317_v9 = vld [vmem:[%s8484_s22 + $0x30] sm:$0xff] }
 0x41b   : > { %v7834_v1 = vpop.f32.mrf.mxu1 }
 0x41c   : > { %7929 = vmatmul.mubr.bf16.gmra.mxu0 %v6036_v7  ;;  %v6014_v16 = vmax.f32 %v5957_v44, 0.0 }
 0x41d   : > { %v5959_v17 = vpop.f32.mrf.mxu1  ;;  %7932 = vmatprep.mubr.msk.bf16.mxu0 %vm8346_vm0, %v9572_v4 }
 0x41e   : > { %v5960_v21 = vadd.f32 %v5959_v17, %v9552_v59 }
 0x41f   : > { %v7835_v52 = vpop.f32.mrf.mxu1 }
 0x420   : > { %v6015_v60 = vmax.f32 %v5960_v21, 0.0  ;;  %v6318_v21 = vld [vmem:[%s8484_s22 + $0x38] sm:$0xff] }
 0x421   : > { %v5964_v8 = vpop.f32.mrf.mxu1 }
 0x422   : > { %v6037_v6 = vpack.c.bf16 %v6015_v60, %v6014_v16  ;;  %v5965_v34 = vadd.f32 %v5964_v8, %v9555_v51 }
 0x423   : > { %v7838_v5 = vpop.f32.mrf.mxu1 }
 0x424   : > { %7933 = vmatmul.mubr.bf16.gmra.mxu0 %v6037_v6  ;;  %v6016_v24 = vmax.f32 %v5965_v34, 0.0  ;;  %v6319_v5 = vld [vmem:[%s8484_s22 + $0x40] sm:$0xff] }
 0x425   : > { %v5967_v26 = vpop.f32.mrf.mxu1  ;;  %7936 = vmatprep.mubr.msk.bf16.mxu0 %vm8346_vm0, %v9572_v4 }
 0x426   : > { %v5968_v46 = vadd.f32 %v5967_v26, %v9557_v53  ;;  %v9647_v53 = vld [vmem:[%s9788_s6] ss:$0 sm:$0xff] }
 0x427   : > { %v7839_v45 = vpop.f32.mrf.mxu1 }
 0x428   : > { %v6017_v2 = vmax.f32 %v5968_v46, 0.0 }
 0x429   : > { %v5972_v59 = vpop.f32.mrf.mxu1 }
 0x42a   : > { %v6038_v12 = vpack.c.bf16 %v6017_v2, %v6016_v24  ;;  %v5973_v58 = vadd.f32 %v5972_v59, %v9559_v18  ;;  %v6320_v2 = vld [vmem:[%s8484_s22 + $0x48] sm:$0xff] }
 0x42b   : > { %v7842_v22 = vpop.f32.mrf.mxu1 }
 0x42c   : > { %7937 = vmatmul.mubr.bf16.gmra.mxu0 %v6038_v12  ;;  %v6018_v0 = vmax.f32 %v5973_v58, 0.0 }
 0x42d   : > { %v5975_v51 = vpop.f32.mrf.mxu1  ;;  %7940 = vmatprep.mubr.msk.bf16.mxu0 %vm8346_vm0, %v9572_v4 }
 0x42e   : > { %v6039_v61 = vpack.c.bf16 %v6018_v0, %v6018_v0  ;;  %v6321_v0 = vld [vmem:[%s8484_s22 + $0x50] sm:$0xff] }
 0x42f   : > { %v7843_v43 = vpop.f32.mrf.mxu1 }
 0x434   : > { %7941 = vmatmul.mubr.bf16.gmra.mxu0 %v6039_v61 }
 0x454   : > { %v6145_v50 = vpop.f32.mrf.mxu0 }
 0x455   : > { %v6146_v18 = vadd.f32 %v9647_v53, %v6145_v50 }
 0x456   : > { %v7862_v28 = vpop.f32.mrf.mxu0 }
 0x457   : > { %v6352_v20 = vadd.f32 %v6311_v39, %v6146_v18  ;;  %v6322_v28 = vld [vmem:[%s8484_s22 + $0x58] sm:$0xff] }
 0x458   : > { %v6148_v4 = vpop.f32.mrf.mxu0 }
 0x459   : > { %v6393_v38 = vmax.f32 %v6352_v20, 0.0  ;;  %v6149_v56 = vadd.f32 %v9647_v53, %v6148_v4 }
 0x45a   : > { %v7863_v19 = vpop.f32.mrf.mxu0 }
 0x45b   : > { %6434 = vst [vmem:[%s9656_s29] sm:$0xff] %v6393_v38  ;;  %v6353_v37 = vadd.f32 %v6312_v40, %v6149_v56  ;;  %v6323_v19 = vld [vmem:[%s8484_s22 + $0x60] sm:$0xff] }
 0x45c   : > { %v6153_v48 = vpop.f32.mrf.mxu0 }
 0x45d   : > { %v6394_v36 = vmax.f32 %v6353_v37, 0.0  ;;  %v6154_v55 = vadd.f32 %v9647_v53, %v6153_v48 }
 0x45e   : > { %v7866_v15 = vpop.f32.mrf.mxu0 }
 0x45f   : > { %6435 = vst [vmem:[%s9656_s29 + $0x8] sm:$0xff] %v6394_v36  ;;  %v6354_v33 = vadd.f32 %v6313_v42, %v6154_v55  ;;  %v6324_v15 = vld [vmem:[%s8484_s22 + $0x68] sm:$0xff] }
 0x460   : > { %v6156_v27 = vpop.f32.mrf.mxu0 }
 0x461   : > { %v6395_v10 = vmax.f32 %v6354_v33, 0.0  ;;  %v6157_v29 = vadd.f32 %v9647_v53, %v6156_v27 }
 0x462   : > { %v7867_v41 = vpop.f32.mrf.mxu0 }
 0x463   : > { %6436 = vst [vmem:[%s9656_s29 + $0x10] sm:$0xff] %v6395_v10  ;;  %v6355_v62 = vadd.f32 %v6314_v47, %v6157_v29  ;;  %v6325_v41 = vld [vmem:[%s8484_s22 + $0x70] sm:$0xff] }
 0x464   : > { %v6161_v49 = vpop.f32.mrf.mxu0 }
 0x465   : > { %v6396_v54 = vmax.f32 %v6355_v62, 0.0  ;;  %v6162_v30 = vadd.f32 %v9647_v53, %v6161_v49 }
 0x466   : > { %v7870_v23 = vpop.f32.mrf.mxu0 }
 0x467   : > { %6437 = vst [vmem:[%s9656_s29 + $0x18] sm:$0xff] %v6396_v54  ;;  %v6356_v35 = vadd.f32 %v6315_v14, %v6162_v30  ;;  %v6326_v23 = vld [vmem:[%s8484_s22 + $0x78] sm:$0xff] }
 0x468   : > { %v6164_v13 = vpop.f32.mrf.mxu0 }
 0x469   : > { %v6397_v63 = vmax.f32 %v6356_v35, 0.0  ;;  %v6165_v57 = vadd.f32 %v9647_v53, %v6164_v13 }
 0x46a   : > { %v7871_v32 = vpop.f32.mrf.mxu0 }
 0x46b   : > { %6438 = vst [vmem:[%s9656_s29 + $0x20] sm:$0xff] %v6397_v63  ;;  %v6357_v31 = vadd.f32 %v6316_v11, %v6165_v57  ;;  %v6327_v32 = vld [vmem:[%s8484_s22 + $0x80] sm:$0xff] }
 0x46c   : > { %v6169_v3 = vpop.f32.mrf.mxu0 }
 0x46d   : > { %v6398_v25 = vmax.f32 %v6357_v31, 0.0  ;;  %v6170_v7 = vadd.f32 %v9647_v53, %v6169_v3 }
 0x46e   : > { %v7874_v1 = vpop.f32.mrf.mxu0 }
 0x46f   : > { %6439 = vst [vmem:[%s9656_s29 + $0x28] sm:$0xff] %v6398_v25  ;;  %v6358_v44 = vadd.f32 %v6317_v9, %v6170_v7  ;;  %v6328_v1 = vld [vmem:[%s8484_s22 + $0x88] sm:$0xff] }
 0x470   : > { %v6172_v17 = vpop.f32.mrf.mxu0 }
 0x471   : > { %v6399_v52 = vmax.f32 %v6358_v44, 0.0  ;;  %v6173_v16 = vadd.f32 %v9647_v53, %v6172_v17 }
 0x472   : > { %v7875_v60 = vpop.f32.mrf.mxu0 }
 0x473   : > { %6440 = vst [vmem:[%s9656_s29 + $0x30] sm:$0xff] %v6399_v52  ;;  %v6359_v8 = vadd.f32 %v6318_v21, %v6173_v16  ;;  %v6329_v60 = vld [vmem:[%s8484_s22 + $0x90] sm:$0xff] }
 0x474   : > { %v6177_v6 = vpop.f32.mrf.mxu0 }
 0x475   : > { %v6400_v34 = vmax.f32 %v6359_v8, 0.0  ;;  %v6178_v26 = vadd.f32 %v9647_v53, %v6177_v6 }
 0x476   : > { %v7878_v46 = vpop.f32.mrf.mxu0 }
 0x477   : > { %6441 = vst [vmem:[%s9656_s29 + $0x38] sm:$0xff] %v6400_v34  ;;  %v6360_v45 = vadd.f32 %v6319_v5, %v6178_v26  ;;  %v6330_v46 = vld [vmem:[%s8484_s22 + $0x98] sm:$0xff] }
 0x478   : > { %v6180_v24 = vpop.f32.mrf.mxu0 }
 0x479   : > { %v6401_v59 = vmax.f32 %v6360_v45, 0.0  ;;  %v6181_v12 = vadd.f32 %v9647_v53, %v6180_v24 }
 0x47a   : > { %v7879_v58 = vpop.f32.mrf.mxu0 }
 0x47b   : > { %6442 = vst [vmem:[%s9656_s29 + $0x40] sm:$0xff] %v6401_v59  ;;  %v6361_v22 = vadd.f32 %v6320_v2, %v6181_v12  ;;  %v6331_v58 = vld [vmem:[%s8484_s22 + $0xa0] sm:$0xff] }
 0x47c   : > { %v6185_v51 = vpop.f32.mrf.mxu0 }
 0x47d   : > { %v6402_v43 = vmax.f32 %v6361_v22, 0.0  ;;  %v6186_v61 = vadd.f32 %v9647_v53, %v6185_v51 }
 0x47e   : > { %v7882_v50 = vpop.f32.mrf.mxu0 }
 0x47f   : > { %6443 = vst [vmem:[%s9656_s29 + $0x48] sm:$0xff] %v6402_v43  ;;  %v6362_v39 = vadd.f32 %v6321_v0, %v6186_v61  ;;  %v6332_v50 = vld [vmem:[%s8484_s22 + $0xa8] sm:$0xff] }
 0x480   : > { %v6188_v18 = vpop.f32.mrf.mxu0 }
 0x481   : > { %v6403_v20 = vmax.f32 %v6362_v39, 0.0  ;;  %v6189_v4 = vadd.f32 %v9647_v53, %v6188_v18 }
 0x482   : > { %v7883_v40 = vpop.f32.mrf.mxu0 }
 0x483   : > { %6444 = vst [vmem:[%s9656_s29 + $0x50] sm:$0xff] %v6403_v20  ;;  %v6363_v38 = vadd.f32 %v6322_v28, %v6189_v4  ;;  %v6333_v40 = vld [vmem:[%s8484_s22 + $0xb0] sm:$0xff] }
 0x484   : > { %v6193_v56 = vpop.f32.mrf.mxu0 }
 0x485   : > { %v6404_v37 = vmax.f32 %v6363_v38, 0.0  ;;  %v6194_v48 = vadd.f32 %v9647_v53, %v6193_v56 }
 0x486   : > { %v7886_v42 = vpop.f32.mrf.mxu0 }
 0x487   : > { %6445 = vst [vmem:[%s9656_s29 + $0x58] sm:$0xff] %v6404_v37  ;;  %v6364_v36 = vadd.f32 %v6323_v19, %v6194_v48  ;;  %v6334_v42 = vld [vmem:[%s8484_s22 + $0xb8] sm:$0xff] }
 0x488   : > { %v6196_v55 = vpop.f32.mrf.mxu0 }
 0x489   : > { %v6405_v33 = vmax.f32 %v6364_v36, 0.0  ;;  %v6197_v27 = vadd.f32 %v9647_v53, %v6196_v55 }
 0x48a   : > { %v7887_v47 = vpop.f32.mrf.mxu0 }
 0x48b   : > { %6446 = vst [vmem:[%s9656_s29 + $0x60] sm:$0xff] %v6405_v33  ;;  %v6365_v10 = vadd.f32 %v6324_v15, %v6197_v27  ;;  %v6335_v47 = vld [vmem:[%s8484_s22 + $0xc0] sm:$0xff] }
 0x48c   : > { %v6201_v29 = vpop.f32.mrf.mxu0 }
 0x48d   : > { %v6406_v62 = vmax.f32 %v6365_v10, 0.0  ;;  %v6202_v49 = vadd.f32 %v9647_v53, %v6201_v29 }
 0x48e   : > { %v7890_v14 = vpop.f32.mrf.mxu0 }
 0x48f   : > { %6447 = vst [vmem:[%s9656_s29 + $0x68] sm:$0xff] %v6406_v62  ;;  %v6366_v54 = vadd.f32 %v6325_v41, %v6202_v49  ;;  %v6336_v14 = vld [vmem:[%s8484_s22 + $0xc8] sm:$0xff] }
 0x490   : > { %v6204_v30 = vpop.f32.mrf.mxu0 }
 0x491   : > { %v6407_v35 = vmax.f32 %v6366_v54, 0.0  ;;  %v6205_v13 = vadd.f32 %v9647_v53, %v6204_v30 }
 0x492   : > { %v7891_v11 = vpop.f32.mrf.mxu0 }
 0x493   : > { %6448 = vst [vmem:[%s9656_s29 + $0x70] sm:$0xff] %v6407_v35  ;;  %v6367_v63 = vadd.f32 %v6326_v23, %v6205_v13  ;;  %v6337_v11 = vld [vmem:[%s8484_s22 + $0xd0] sm:$0xff] }
 0x494   : > { %v6209_v57 = vpop.f32.mrf.mxu0 }
 0x495   : > { %v6408_v31 = vmax.f32 %v6367_v63, 0.0  ;;  %v6210_v3 = vadd.f32 %v9647_v53, %v6209_v57 }
 0x496   : > { %v7894_v9 = vpop.f32.mrf.mxu0 }
 0x497   : > { %6449 = vst [vmem:[%s9656_s29 + $0x78] sm:$0xff] %v6408_v31  ;;  %v6368_v25 = vadd.f32 %v6327_v32, %v6210_v3  ;;  %v6338_v9 = vld [vmem:[%s8484_s22 + $0xd8] sm:$0xff] }
 0x498   : > { %v6212_v7 = vpop.f32.mrf.mxu0 }
 0x499   : > { %v6409_v44 = vmax.f32 %v6368_v25, 0.0  ;;  %v6213_v17 = vadd.f32 %v9647_v53, %v6212_v7 }
 0x49a   : > { %v7895_v21 = vpop.f32.mrf.mxu0 }
 0x49b   : > { %6450 = vst [vmem:[%s9656_s29 + $0x80] sm:$0xff] %v6409_v44  ;;  %v6369_v52 = vadd.f32 %v6328_v1, %v6213_v17  ;;  %v6339_v21 = vld [vmem:[%s8484_s22 + $0xe0] sm:$0xff] }
 0x49c   : > { %v6217_v16 = vpop.f32.mrf.mxu0 }
 0x49d   : > { %v6410_v8 = vmax.f32 %v6369_v52, 0.0  ;;  %v6218_v6 = vadd.f32 %v9647_v53, %v6217_v16 }
 0x49e   : > { %v7898_v5 = vpop.f32.mrf.mxu0 }
 0x49f   : > { %6451 = vst [vmem:[%s9656_s29 + $0x88] sm:$0xff] %v6410_v8  ;;  %v6370_v34 = vadd.f32 %v6329_v60, %v6218_v6  ;;  %v6340_v5 = vld [vmem:[%s8484_s22 + $0xe8] sm:$0xff] }
 0x4a0   : > { %v6220_v26 = vpop.f32.mrf.mxu0 }
 0x4a1   : > { %v6411_v45 = vmax.f32 %v6370_v34, 0.0  ;;  %v6221_v24 = vadd.f32 %v9647_v53, %v6220_v26 }
 0x4a2   : > { %v7899_v2 = vpop.f32.mrf.mxu0 }
 0x4a3   : > { %6452 = vst [vmem:[%s9656_s29 + $0x90] sm:$0xff] %v6411_v45  ;;  %v6371_v59 = vadd.f32 %v6330_v46, %v6221_v24  ;;  %v6341_v2 = vld [vmem:[%s8484_s22 + $0xf0] sm:$0xff] }
 0x4a4   : > { %v6225_v12 = vpop.f32.mrf.mxu0 }
 0x4a5   : > { %v6412_v22 = vmax.f32 %v6371_v59, 0.0  ;;  %v6226_v51 = vadd.f32 %v9647_v53, %v6225_v12 }
 0x4a6   : > { %v7902_v0 = vpop.f32.mrf.mxu0 }
 0x4a7   : > { %6453 = vst [vmem:[%s9656_s29 + $0x98] sm:$0xff] %v6412_v22  ;;  %v6372_v43 = vadd.f32 %v6331_v58, %v6226_v51  ;;  %v6342_v0 = vld [vmem:[%s8484_s22 + $0xf8] sm:$0xff] }
 0x4a8   : > { %v6228_v61 = vpop.f32.mrf.mxu0 }
 0x4a9   : > { %v6413_v39 = vmax.f32 %v6372_v43, 0.0  ;;  %v6229_v18 = vadd.f32 %v9647_v53, %v6228_v61 }
 0x4aa   : > { %v7903_v28 = vpop.f32.mrf.mxu0 }
 0x4ab   : > { %6454 = vst [vmem:[%s9656_s29 + $0xa0] sm:$0xff] %v6413_v39  ;;  %v6373_v20 = vadd.f32 %v6332_v50, %v6229_v18  ;;  %v6343_v28 = vld [vmem:[%s8484_s22 + $0x100] sm:$0xff] }
 0x4ac   : > { %v6233_v4 = vpop.f32.mrf.mxu0 }
 0x4ad   : > { %v6414_v38 = vmax.f32 %v6373_v20, 0.0  ;;  %v6234_v56 = vadd.f32 %v9647_v53, %v6233_v4 }
 0x4ae   : > { %v7906_v19 = vpop.f32.mrf.mxu0 }
 0x4af   : > { %6455 = vst [vmem:[%s9656_s29 + $0xa8] sm:$0xff] %v6414_v38  ;;  %v6374_v37 = vadd.f32 %v6333_v40, %v6234_v56  ;;  %v6344_v19 = vld [vmem:[%s8484_s22 + $0x108] sm:$0xff] }
 0x4b0   : > { %v6236_v48 = vpop.f32.mrf.mxu0 }
 0x4b1   : > { %v6415_v36 = vmax.f32 %v6374_v37, 0.0  ;;  %v6237_v55 = vadd.f32 %v9647_v53, %v6236_v48 }
 0x4b2   : > { %v7907_v15 = vpop.f32.mrf.mxu0 }
 0x4b3   : > { %6456 = vst [vmem:[%s9656_s29 + $0xb0] sm:$0xff] %v6415_v36  ;;  %v6375_v33 = vadd.f32 %v6334_v42, %v6237_v55  ;;  %v6345_v15 = vld [vmem:[%s8484_s22 + $0x110] sm:$0xff] }
 0x4b4   : > { %v6241_v27 = vpop.f32.mrf.mxu0 }
 0x4b5   : > { %v6416_v10 = vmax.f32 %v6375_v33, 0.0  ;;  %v6242_v29 = vadd.f32 %v9647_v53, %v6241_v27 }
 0x4b6   : > { %v7910_v41 = vpop.f32.mrf.mxu0 }
 0x4b7   : > { %6457 = vst [vmem:[%s9656_s29 + $0xb8] sm:$0xff] %v6416_v10  ;;  %v6376_v62 = vadd.f32 %v6335_v47, %v6242_v29  ;;  %v6346_v41 = vld [vmem:[%s8484_s22 + $0x118] sm:$0xff] }
 0x4b8   : > { %v6244_v49 = vpop.f32.mrf.mxu0 }
 0x4b9   : > { %v6417_v54 = vmax.f32 %v6376_v62, 0.0  ;;  %v6245_v30 = vadd.f32 %v9647_v53, %v6244_v49 }
 0x4ba   : > { %v7911_v23 = vpop.f32.mrf.mxu0 }
 0x4bb   : > { %6458 = vst [vmem:[%s9656_s29 + $0xc0] sm:$0xff] %v6417_v54  ;;  %v6377_v35 = vadd.f32 %v6336_v14, %v6245_v30  ;;  %v6347_v23 = vld [vmem:[%s8484_s22 + $0x120] sm:$0xff] }
 0x4bc   : > { %v6249_v13 = vpop.f32.mrf.mxu0 }
 0x4bd   : > { %v6418_v63 = vmax.f32 %v6377_v35, 0.0  ;;  %v6250_v57 = vadd.f32 %v9647_v53, %v6249_v13 }
 0x4be   : > { %v7914_v32 = vpop.f32.mrf.mxu0 }
 0x4bf   : > { %6459 = vst [vmem:[%s9656_s29 + $0xc8] sm:$0xff] %v6418_v63  ;;  %v6378_v31 = vadd.f32 %v6337_v11, %v6250_v57  ;;  %v6348_v32 = vld [vmem:[%s8484_s22 + $0x128] sm:$0xff] }
 0x4c0   : > { %v6252_v3 = vpop.f32.mrf.mxu0 }
 0x4c1   : > { %v6419_v25 = vmax.f32 %v6378_v31, 0.0  ;;  %v6253_v7 = vadd.f32 %v9647_v53, %v6252_v3 }
 0x4c2   : > { %v7915_v1 = vpop.f32.mrf.mxu0 }
 0x4c3   : > { %6460 = vst [vmem:[%s9656_s29 + $0xd0] sm:$0xff] %v6419_v25  ;;  %v6379_v44 = vadd.f32 %v6338_v9, %v6253_v7  ;;  %v6349_v1 = vld [vmem:[%s8484_s22 + $0x130] sm:$0xff] }
 0x4c4   : > { %v6257_v17 = vpop.f32.mrf.mxu0 }
 0x4c5   : > { %v6420_v52 = vmax.f32 %v6379_v44, 0.0  ;;  %v6258_v16 = vadd.f32 %v9647_v53, %v6257_v17 }
 0x4c6   : > { %v7918_v60 = vpop.f32.mrf.mxu0 }
 0x4c7   : > { %6461 = vst [vmem:[%s9656_s29 + $0xd8] sm:$0xff] %v6420_v52  ;;  %v6380_v8 = vadd.f32 %v6339_v21, %v6258_v16  ;;  %v6350_v60 = vld [vmem:[%s8484_s22 + $0x138] sm:$0xff] }
 0x4c8   : > { %v6260_v6 = vpop.f32.mrf.mxu0 }
 0x4c9   : > { %v6421_v34 = vmax.f32 %v6380_v8, 0.0  ;;  %v6261_v26 = vadd.f32 %v9647_v53, %v6260_v6 }
 0x4ca   : > { %v7919_v46 = vpop.f32.mrf.mxu0 }
 0x4cb   : > { %6462 = vst [vmem:[%s9656_s29 + $0xe0] sm:$0xff] %v6421_v34  ;;  %v6381_v45 = vadd.f32 %v6340_v5, %v6261_v26  ;;  %v6351_v46 = vld [vmem:[%s8484_s22 + $0x140] sm:$0xf] }
 0x4cc   : > { %v6265_v24 = vpop.f32.mrf.mxu0 }
 0x4cd   : > { %v6422_v59 = vmax.f32 %v6381_v45, 0.0  ;;  %v6266_v12 = vadd.f32 %v9647_v53, %v6265_v24 }
 0x4ce   : > { %v7922_v58 = vpop.f32.mrf.mxu0 }
 0x4cf   : > { %6463 = vst [vmem:[%s9656_s29 + $0xe8] sm:$0xff] %v6422_v59  ;;  %v6382_v22 = vadd.f32 %v6341_v2, %v6266_v12 }
 0x4d0   : > { %v6268_v51 = vpop.f32.mrf.mxu0 }
 0x4d1   : > { %v6423_v43 = vmax.f32 %v6382_v22, 0.0  ;;  %v6269_v61 = vadd.f32 %v9647_v53, %v6268_v51 }
 0x4d2   : > { %v7923_v50 = vpop.f32.mrf.mxu0 }
 0x4d3   : > { %6464 = vst [vmem:[%s9656_s29 + $0xf0] sm:$0xff] %v6423_v43  ;;  %v6383_v39 = vadd.f32 %v6342_v0, %v6269_v61 }
 0x4d4   : > { %v6273_v18 = vpop.f32.mrf.mxu0 }
 0x4d5   : > { %v6424_v20 = vmax.f32 %v6383_v39, 0.0  ;;  %v6274_v4 = vadd.f32 %v9647_v53, %v6273_v18 }
 0x4d6   : > { %v7926_v40 = vpop.f32.mrf.mxu0 }
 0x4d7   : > { %6465 = vst [vmem:[%s9656_s29 + $0xf8] sm:$0xff] %v6424_v20  ;;  %v6384_v38 = vadd.f32 %v6343_v28, %v6274_v4 }
 0x4d8   : > { %v6276_v56 = vpop.f32.mrf.mxu0 }
 0x4d9   : > { %v6425_v37 = vmax.f32 %v6384_v38, 0.0  ;;  %v6277_v48 = vadd.f32 %v9647_v53, %v6276_v56 }
 0x4da   : > { %v7927_v42 = vpop.f32.mrf.mxu0 }
 0x4db   : > { %6466 = vst [vmem:[%s9656_s29 + $0x100] sm:$0xff] %v6425_v37  ;;  %v6385_v36 = vadd.f32 %v6344_v19, %v6277_v48 }
 0x4dc   : > { %v6281_v55 = vpop.f32.mrf.mxu0 }
 0x4dd   : > { %v6426_v33 = vmax.f32 %v6385_v36, 0.0  ;;  %v6282_v27 = vadd.f32 %v9647_v53, %v6281_v55 }
 0x4de   : > { %v7930_v47 = vpop.f32.mrf.mxu0 }
 0x4df   : > { %6467 = vst [vmem:[%s9656_s29 + $0x108] sm:$0xff] %v6426_v33  ;;  %v6386_v10 = vadd.f32 %v6345_v15, %v6282_v27 }
 0x4e0   : > { %v6284_v29 = vpop.f32.mrf.mxu0 }
 0x4e1   : > { %v6427_v62 = vmax.f32 %v6386_v10, 0.0  ;;  %v6285_v49 = vadd.f32 %v9647_v53, %v6284_v29 }
 0x4e2   : > { %v7931_v14 = vpop.f32.mrf.mxu0 }
 0x4e3   : > { %6468 = vst [vmem:[%s9656_s29 + $0x110] sm:$0xff] %v6427_v62  ;;  %v6387_v54 = vadd.f32 %v6346_v41, %v6285_v49 }
 0x4e4   : > { %v6289_v30 = vpop.f32.mrf.mxu0 }
 0x4e5   : > { %v6428_v35 = vmax.f32 %v6387_v54, 0.0  ;;  %v6290_v13 = vadd.f32 %v9647_v53, %v6289_v30 }
 0x4e6   : > { %v7934_v11 = vpop.f32.mrf.mxu0 }
 0x4e7   : > { %6469 = vst [vmem:[%s9656_s29 + $0x118] sm:$0xff] %v6428_v35  ;;  %v6388_v63 = vadd.f32 %v6347_v23, %v6290_v13 }
 0x4e8   : > { %v6292_v57 = vpop.f32.mrf.mxu0 }
 0x4e9   : > { %v6429_v31 = vmax.f32 %v6388_v63, 0.0  ;;  %v6293_v3 = vadd.f32 %v9647_v53, %v6292_v57 }
 0x4ea   : > { %v7935_v9 = vpop.f32.mrf.mxu0 }
 0x4eb   : > { %6470 = vst [vmem:[%s9656_s29 + $0x120] sm:$0xff] %v6429_v31  ;;  %v6389_v25 = vadd.f32 %v6348_v32, %v6293_v3 }
 0x4ec   : > { %v6297_v7 = vpop.f32.mrf.mxu0 }
 0x4ed   : > { %v6430_v44 = vmax.f32 %v6389_v25, 0.0  ;;  %v6298_v17 = vadd.f32 %v9647_v53, %v6297_v7 }
 0x4ee   : > { %v7938_v21 = vpop.f32.mrf.mxu0 }
 0x4ef   : > { %6471 = vst [vmem:[%s9656_s29 + $0x128] sm:$0xff] %v6430_v44  ;;  %v6390_v52 = vadd.f32 %v6349_v1, %v6298_v17 }
 0x4f0   : > { %v6300_v16 = vpop.f32.mrf.mxu0 }
 0x4f1   : > { %v6431_v8 = vmax.f32 %v6390_v52, 0.0  ;;  %v6301_v6 = vadd.f32 %v9647_v53, %v6300_v16 }
 0x4f2   : > { %v7939_v5 = vpop.f32.mrf.mxu0 }
 0x4f3   : > { %6472 = vst [vmem:[%s9656_s29 + $0x130] sm:$0xff] %v6431_v8  ;;  %v6391_v34 = vadd.f32 %v6350_v60, %v6301_v6 }
 0x4f4   : > { %v6305_v26 = vpop.f32.mrf.mxu0 }
 0x4f5   : > { %v6432_v45 = vmax.f32 %v6391_v34, 0.0  ;;  %v6306_v24 = vadd.f32 %v9647_v53, %v6305_v26 }
 0x4f6   : > { %v7942_v2 = vpop.f32.mrf.mxu0 }
 0x4f7   : > { %6473 = vst [vmem:[%s9656_s29 + $0x138] sm:$0xff] %v6432_v45  ;;  %v6392_v59 = vadd.f32 %v6351_v46, %v6306_v24 }
 0x4f8   : > { %v6308_v12 = vpop.f32.mrf.mxu0 }
 0x4f9   : > { %v6433_v58 = vmax.f32 %v6392_v59, 0.0 }
 0x4fa   : > { %v7943_v22 = vpop.f32.mrf.mxu0 }
 0x4fb   : > { %6474 = vst [vmem:[%s9656_s29 + $0x140] sm:$0xf] %v6433_v58 }
 0x4fc PF: > { %s18_s27 = sadd.s32 1, %s8342_s27  }
 0x4fd   : > { %p15_p4 = scmp.ge.s32.totalorder %s18_s27, 4  }
 0x4ff   :  { %17 = sbr.rel (!%p15_p4) target bundleno = 1 (0x1), region = 82 }

</bundles_post_ra>
